<compile_context>
chip_gen: v7x
topology: tpu7x:2x2x1
jax: 0.10.0
libtpu: 0.0.40
codegen_flags: <defaults>
</compile_context>

<pallas_src>
import math

import jax
import jax.numpy as jnp
import numpy as np
from jax.experimental import pallas as pl
from jax.experimental.pallas import tpu as pltpu


# ---------------------------------------------------------------------------
# Fused encoder kernel: one grid step == one image.
# ---------------------------------------------------------------------------
def _encoder_kernel(xp_ref, w1_ref, b1_ref, w2_ref, b2_ref, w3_ref, b3_ref,
                    wl_ref, bl_ref, o_ref, a1_ref, a2_ref, a3_ref):
    f32 = jnp.float32
    bf16 = jnp.bfloat16
    k1 = xp_ref.shape[-1]            # 16 * in_channels
    feat = o_ref.shape[-1]           # feature_dim

    # ---- conv1: 8x8 / stride 4 ---------------------------------------------
    # xp is the stride-8 space-to-depth of the image:
    #   xp[2*rho1+rho2, u, v, (s1,s2,c)] = x[8u + 4*rho1 + s1, 8v + 4*rho2 + s2, c]
    # (u, v zero-padded 8 -> 9).  The conv1 output is produced directly in
    # conv2's stride-2 phase-split layout  a1[(r1,r2), i, j, c]  (spatial
    # position (2i+r1, 2j+r2)), so conv2 never needs a strided read.
    a1_ref[...] = jnp.zeros(a1_ref.shape, f32)        # zero the i=8 / j=8 padding
    for r1 in range(2):
        for r2 in range(2):
            acc = jnp.zeros((64, 32), f32)
            for q1 in range(2):                       # 2x2 space-to-depth offsets
                for q2 in range(2):
                    rho1, d1 = (r1 + q1) % 2, (r1 + q1) // 2
                    rho2, d2 = (r2 + q2) % 2, (r2 + q2) // 2
                    win = xp_ref[0, 2 * rho1 + rho2, d1:d1 + 8, d2:d2 + 8, :]
                    lhs = win.reshape(64, k1).astype(bf16)     # 8-aligned merge
                    acc = acc + jnp.dot(lhs, w1_ref[2 * q1 + q2],
                                        preferred_element_type=f32)
            a1 = jnp.maximum(acc + b1_ref[...], 0.0)           # [64, 32] f32
            a1_ref[2 * r1 + r2, 0:8, 0:8, :] = a1.reshape(8, 8, 32)

    # ---- conv2: 4x4 / stride 2 ---------------------------------------------
    # Output on an 8x8 padded grid (valid 6x6); rows = ho2*8 + wo2.
    acc2 = jnp.zeros((64, 64), f32)
    for kh in range(4):
        for kw in range(4):
            q1, r1 = kh // 2, kh % 2
            q2, r2 = kw // 2, kw % 2
            win = a1_ref[2 * r1 + r2, q1:q1 + 8, q2:q2 + 8, :]
            acc2 = acc2 + jnp.dot(win.reshape(64, 32).astype(bf16),
                                  w2_ref[4 * kh + kw],
                                  preferred_element_type=f32)
    a2 = jnp.maximum(acc2 + b2_ref[...], 0.0)                  # [64, 64] f32
    a2_ref[...] = jnp.zeros(a2_ref.shape, f32)                 # zero cols >= 8
    a2_ref[:, 0:8, :] = a2.reshape(8, 8, 64)

    # ---- conv3: 3x3 / stride 1 ---------------------------------------------
    # Output on a 6x8 padded grid (valid 4x4); rows = ho3*8 + wo3.
    acc3 = jnp.zeros((48, 64), f32)
    for kh in range(3):
        for kw in range(3):
            win = a2_ref[kh:kh + 6, kw:kw + 8, :]
            acc3 = acc3 + jnp.dot(win.reshape(48, 64).astype(bf16),
                                  w3_ref[3 * kh + kw],
                                  preferred_element_type=f32)
    a3_ref[...] = jnp.maximum(acc3 + b3_ref[...], 0.0)         # [48, 64] f32

    # ---- Flatten + Linear + ReLU -------------------------------------------
    # PyTorch flattens NCHW (c, ho3, wo3); that order is folded into the
    # pre-permuted Linear weight wl[p] (p = ho3*4 + wo3), so here we just
    # contract the 16 valid spatial rows against their weight slabs.
    y = jnp.zeros((1, feat), f32)
    for p in range(16):
        row = (p // 4) * 8 + (p % 4)
        y = y + jnp.dot(a3_ref[row:row + 1, :].astype(bf16), wl_ref[p],
                        preferred_element_type=f32)
    y = jnp.maximum(y + bl_ref[...], 0.0)
    o_ref[...] = y.reshape(1, 1, feat)


# ---------------------------------------------------------------------------
# Wrapper-side layout plumbing (cheap; done on the tiny input / once on weights)
# ---------------------------------------------------------------------------
def _space_to_depth8(x):
    """NCHW [B,C,64,64] -> [B, 4, 9, 9, 16*C] stride-8 space-to-depth, zero padded."""
    B, C, H, W = x.shape
    t = jnp.transpose(x, (0, 2, 3, 1))                         # NHWC
    t = t.reshape(B, H // 8, 2, 4, W // 8, 2, 4, C)            # h = 8u + 4*rho1 + s1
    t = jnp.transpose(t, (0, 2, 5, 1, 4, 3, 6, 7))             # [B,rho1,rho2,u,v,s1,s2,C]
    t = t.reshape(B, 4, H // 8, W // 8, 16 * C)
    return jnp.pad(t, ((0, 0), (0, 0), (0, 1), (0, 1), (0, 0)))


def prepare_params(params):
    """One-time permutation of PyTorch-layout weights into kernel layouts (bf16)."""
    w1, w2, w3, wl = params["w1"], params["w2"], params["w3"], params["wl"]
    cout1, cin, _, _ = w1.shape
    feat = wl.shape[0]
    w1m = jnp.transpose(w1.reshape(cout1, cin, 2, 4, 2, 4), (2, 4, 3, 5, 1, 0))
    w1m = w1m.reshape(4, 16 * cin, cout1).astype(jnp.bfloat16)       # [(q1,q2),(s1,s2,c),co]
    w2m = jnp.transpose(w2, (2, 3, 1, 0)).reshape(16, 32, 64).astype(jnp.bfloat16)
    w3m = jnp.transpose(w3, (2, 3, 1, 0)).reshape(9, 64, 64).astype(jnp.bfloat16)
    wlm = jnp.transpose(wl.reshape(feat, 64, 16), (2, 1, 0)).astype(jnp.bfloat16)
    return {
        "w1m": w1m, "b1": params["b1"].reshape(1, -1).astype(jnp.float32),
        "w2m": w2m, "b2": params["b2"].reshape(1, -1).astype(jnp.float32),
        "w3m": w3m, "b3": params["b3"].reshape(1, -1).astype(jnp.float32),
        "wlm": wlm, "bl": params["bl"].reshape(1, -1).astype(jnp.float32),
    }


def encoder_forward(x, kparams):
    B, C, H, W = x.shape
    assert (H, W) == (64, 64), "Linear(in_features=1024) pins the input to 64x64"
    k1 = 16 * C
    feat = kparams["bl"].shape[-1]
    xp = _space_to_depth8(x)

    out = pl.pallas_call(
        _encoder_kernel,
        out_shape=jax.ShapeDtypeStruct((B, 1, feat), jnp.float32),
        grid=(B,),
        in_specs=[
            pl.BlockSpec((1, 4, 9, 9, k1), lambda b: (b, 0, 0, 0, 0)),
            pl.BlockSpec((4, k1, 32), lambda b: (0, 0, 0)),
            pl.BlockSpec((1, 32), lambda b: (0, 0)),
            pl.BlockSpec((16, 32, 64), lambda b: (0, 0, 0)),
            pl.BlockSpec((1, 64), lambda b: (0, 0)),
            pl.BlockSpec((9, 64, 64), lambda b: (0, 0, 0)),
            pl.BlockSpec((1, 64), lambda b: (0, 0)),
            pl.BlockSpec((16, 64, feat), lambda b: (0, 0, 0)),
            pl.BlockSpec((1, feat), lambda b: (0, 0)),
        ],
        out_specs=pl.BlockSpec((1, 1, feat), lambda b: (b, 0, 0)),
        scratch_shapes=[
            pltpu.VMEM((4, 9, 9, 32), jnp.float32),   # conv1 out (conv2-phase-split)
            pltpu.VMEM((8, 16, 64), jnp.float32),     # conv2 out (padded 8x16 grid)
            pltpu.VMEM((48, 64), jnp.float32),        # conv3 out (padded 6x8 grid)
        ],
        compiler_params=pltpu.CompilerParams(dimension_semantics=("parallel",)),
    )(xp, kparams["w1m"], kparams["b1"], kparams["w2m"], kparams["b2"],
      kparams["w3m"], kparams["b3"], kparams["wlm"], kparams["bl"])
    return out.reshape(B, feat)


# ---------------------------------------------------------------------------
# Pure-JAX reference (PyTorch semantics, same bf16-matmul / f32-accumulate math)
# ---------------------------------------------------------------------------
def _im2col(x, k, stride):
    B, C, H, W = x.shape
    Ho = (H - k) // stride + 1
    Wo = (W - k) // stride + 1
    idx_h = jnp.arange(Ho) * stride
    idx_w = jnp.arange(Wo) * stride
    rows = idx_h[:, None, None, None] + jnp.arange(k)[None, None, :, None]
    cols = idx_w[None, :, None, None] + jnp.arange(k)[None, None, None, :]
    patches = x[:, :, rows, cols]                              # [B,C,Ho,Wo,k,k]
    patches = jnp.transpose(patches, (0, 2, 3, 1, 4, 5))
    return patches.reshape(B * Ho * Wo, C * k * k), Ho, Wo


def _conv_relu_ref(x, w, b, stride):
    cout, cin, k, _ = w.shape
    p, Ho, Wo = _im2col(x, k, stride)
    wm = w.reshape(cout, cin * k * k).T
    out = jnp.dot(p.astype(jnp.bfloat16), wm.astype(jnp.bfloat16),
                  preferred_element_type=jnp.float32) + b
    out = jnp.maximum(out, 0.0)
    return out.reshape(x.shape[0], Ho, Wo, cout).transpose(0, 3, 1, 2)


def encoder_reference(x, params):
    h = _conv_relu_ref(x, params["w1"], params["b1"], 4)       # [B,32,15,15]
    h = _conv_relu_ref(h, params["w2"], params["b2"], 2)       # [B,64, 6, 6]
    h = _conv_relu_ref(h, params["w3"], params["b3"], 1)       # [B,64, 4, 4]
    flat = h.reshape(h.shape[0], -1)                           # NCHW flatten
    y = jnp.dot(flat.astype(jnp.bfloat16), params["wl"].T.astype(jnp.bfloat16),
                preferred_element_type=jnp.float32) + params["bl"]
    return jnp.maximum(y, 0.0)


# ---------------------------------------------------------------------------
# Deterministic parameter init (orthogonal, gain sqrt(2), zero bias)
# ---------------------------------------------------------------------------
def _orthogonal(key, rows, cols, gain):
    n = max(rows, cols)
    a = jax.random.normal(key, (n, n), jnp.float32)
    q, r = jnp.linalg.qr(a)
    q = q * jnp.sign(jnp.diag(r))[None, :]
    return (gain * q[:rows, :cols]).astype(jnp.float32)


def init_params(key, in_channels, feature_dim):
    gain = math.sqrt(2.0)
    k1, k2, k3, k4 = jax.random.split(key, 4)
    w1 = _orthogonal(k1, 32, in_channels * 8 * 8, gain).reshape(32, in_channels, 8, 8)
    w2 = _orthogonal(k2, 64, 32 * 4 * 4, gain).reshape(64, 32, 4, 4)
    w3 = _orthogonal(k3, 64, 64 * 3 * 3, gain).reshape(64, 64, 3, 3)
    wl = _orthogonal(k4, feature_dim, 1024, gain)
    return {
        "w1": w1, "b1": jnp.zeros((32,), jnp.float32),
        "w2": w2, "b2": jnp.zeros((64,), jnp.float32),
        "w3": w3, "b3": jnp.zeros((64,), jnp.float32),
        "wl": wl, "bl": jnp.zeros((feature_dim,), jnp.float32),
    }


if __name__ == "__main__":
    # Linear(in_features=1024) pins the spatial size: 64x64 -> 15 -> 6 -> 4.
    B, C, H, W = 2, 3, 64, 64
    feature_dim = 32

    key = jax.random.PRNGKey(0)
    kx, kp = jax.random.split(key)
    x = jax.random.normal(kx, (B, C, H, W), jnp.float32)
    params = init_params(kp, C, feature_dim)
    kparams = prepare_params(params)            # one-time weight re-layout

    fwd = jax.jit(encoder_forward)
    out = fwd(x, kparams)
    jax.block_until_ready(out)

    assert out.shape == (B, feature_dim), out.shape
    assert out.dtype == jnp.float32
    assert bool(jnp.all(out >= 0.0))            # final ReLU

    ref = jax.jit(encoder_reference)(x, params)
    np.testing.assert_allclose(np.asarray(out), np.asarray(ref), rtol=5e-3, atol=5e-3)
    print("KERNEL_OK")
</pallas_src>

<mosaic_0001>
module attributes {stable_mosaic.version = 11 : i64} {
  func.func @_encoder_kernel(%arg0: i32, %arg1: memref<1x4x9x9x48xf32, #tpu.memory_space<vmem>>, %arg2: memref<4x48x32xbf16, #tpu.memory_space<vmem>>, %arg3: memref<1x32xf32, #tpu.memory_space<vmem>>, %arg4: memref<16x32x64xbf16, #tpu.memory_space<vmem>>, %arg5: memref<1x64xf32, #tpu.memory_space<vmem>>, %arg6: memref<9x64x64xbf16, #tpu.memory_space<vmem>>, %arg7: memref<1x64xf32, #tpu.memory_space<vmem>>, %arg8: memref<16x64x32xbf16, #tpu.memory_space<vmem>>, %arg9: memref<1x32xf32, #tpu.memory_space<vmem>>, %arg10: memref<1x1x32xf32, #tpu.memory_space<vmem>>, %arg11: memref<4x9x9x32xf32, #tpu.memory_space<vmem>>, %arg12: memref<8x16x64xf32, #tpu.memory_space<vmem>>, %arg13: memref<48x64xf32, #tpu.memory_space<vmem>>) attributes {dimension_semantics = [#tpu.dimension_semantics<parallel>], iteration_bounds = array<i64: 2>, scalar_prefetch = 0 : i64, scratch_operands = 3 : i64, tpu.core_type = #tpu.core_type<tc>, window_params = [{transform_indices = @transform_0, window_bounds = array<i64: 1, 4, 9, 9, 48>}, {pipeline_mode = #tpu.pipeline_mode<synchronous>, transform_indices = @transform_1, window_bounds = array<i64: 4, 48, 32>}, {pipeline_mode = #tpu.pipeline_mode<synchronous>, transform_indices = @transform_2, window_bounds = array<i64: 1, 32>}, {pipeline_mode = #tpu.pipeline_mode<synchronous>, transform_indices = @transform_3, window_bounds = array<i64: 16, 32, 64>}, {pipeline_mode = #tpu.pipeline_mode<synchronous>, transform_indices = @transform_4, window_bounds = array<i64: 1, 64>}, {pipeline_mode = #tpu.pipeline_mode<synchronous>, transform_indices = @transform_5, window_bounds = array<i64: 9, 64, 64>}, {pipeline_mode = #tpu.pipeline_mode<synchronous>, transform_indices = @transform_6, window_bounds = array<i64: 1, 64>}, {pipeline_mode = #tpu.pipeline_mode<synchronous>, transform_indices = @transform_7, window_bounds = array<i64: 16, 64, 32>}, {pipeline_mode = #tpu.pipeline_mode<synchronous>, transform_indices = @transform_8, window_bounds = array<i64: 1, 32>}, {transform_indices = @transform_9, window_bounds = array<i64: 1, 1, 32>}]} {
    %cst = arith.constant 0.000000e+00 : f32
    %0 = vector.broadcast %cst : f32 to vector<4x9x9x32xf32>
    %c0 = arith.constant 0 : index
    %c0_0 = arith.constant 0 : index
    %c0_1 = arith.constant 0 : index
    %c0_2 = arith.constant 0 : index
    %1 = vector.load %arg11[%c0, %c0_0, %c0_1, %c0_2] : memref<4x9x9x32xf32, #tpu.memory_space<vmem>>, vector<4x9x9x32xf32>
    tpu.vector_store %arg11[%c0, %c0_0, %c0_1, %c0_2], %0 {strides = array<i32>} : memref<4x9x9x32xf32, #tpu.memory_space<vmem>>, vector<4x9x9x32xf32>,
    %cst_3 = arith.constant 0.000000e+00 : f32
    %2 = vector.broadcast %cst_3 : f32 to vector<64x32xf32>
    %c0_4 = arith.constant 0 : index
    %c0_5 = arith.constant 0 : index
    %c0_6 = arith.constant 0 : index
    %c0_7 = arith.constant 0 : index
    %c0_8 = arith.constant 0 : index
    %3 = vector.load %arg1[%c0_4, %c0_5, %c0_6, %c0_7, %c0_8] : memref<1x4x9x9x48xf32, #tpu.memory_space<vmem>>, vector<1x1x8x8x48xf32>
    %4 = vector.shape_cast %3 : vector<1x1x8x8x48xf32> to vector<8x8x48xf32>
    %5 = vector.shape_cast %4 : vector<8x8x48xf32> to vector<64x48xf32>
    %6 = arith.truncf %5 : vector<64x48xf32> to vector<64x48xbf16>
    %c0_9 = arith.constant 0 : index
    %c0_10 = arith.constant 0 : index
    %c0_11 = arith.constant 0 : index
    %7 = vector.load %arg2[%c0_9, %c0_10, %c0_11] : memref<4x48x32xbf16, #tpu.memory_space<vmem>>, vector<1x48x32xbf16>
    %8 = vector.shape_cast %7 : vector<1x48x32xbf16> to vector<48x32xbf16>
    %cst_12 = arith.constant dense<0.000000e+00> : vector<64x32xf32>
    %9 = tpu.matmul %6, %8, %cst_12 {dimension_numbers = #tpu.dot_dimension_numbers<[1], [0], [0], [1], [0, 0, 1, 1], [], []>} : vector<64x48xbf16>, vector<48x32xbf16>, vector<64x32xf32> -> vector<64x32xf32>
    %10 = arith.addf %2, %9 : vector<64x32xf32>
    %c0_13 = arith.constant 0 : index
    %c1 = arith.constant 1 : index
    %c0_14 = arith.constant 0 : index
    %c0_15 = arith.constant 0 : index
    %c0_16 = arith.constant 0 : index
    %11 = vector.load %arg1[%c0_13, %c1, %c0_14, %c0_15, %c0_16] : memref<1x4x9x9x48xf32, #tpu.memory_space<vmem>>, vector<1x1x8x8x48xf32>
    %12 = vector.shape_cast %11 : vector<1x1x8x8x48xf32> to vector<8x8x48xf32>
    %13 = vector.shape_cast %12 : vector<8x8x48xf32> to vector<64x48xf32>
    %14 = arith.truncf %13 : vector<64x48xf32> to vector<64x48xbf16>
    %c1_17 = arith.constant 1 : index
    %c0_18 = arith.constant 0 : index
    %c0_19 = arith.constant 0 : index
    %15 = vector.load %arg2[%c1_17, %c0_18, %c0_19] : memref<4x48x32xbf16, #tpu.memory_space<vmem>>, vector<1x48x32xbf16>
    %16 = vector.shape_cast %15 : vector<1x48x32xbf16> to vector<48x32xbf16>
    %cst_20 = arith.constant dense<0.000000e+00> : vector<64x32xf32>
    %17 = tpu.matmul %14, %16, %cst_20 {dimension_numbers = #tpu.dot_dimension_numbers<[1], [0], [0], [1], [0, 0, 1, 1], [], []>} : vector<64x48xbf16>, vector<48x32xbf16>, vector<64x32xf32> -> vector<64x32xf32>
    %18 = arith.addf %10, %17 : vector<64x32xf32>
    %c0_21 = arith.constant 0 : index
    %c2 = arith.constant 2 : index
    %c0_22 = arith.constant 0 : index
    %c0_23 = arith.constant 0 : index
    %c0_24 = arith.constant 0 : index
    %19 = vector.load %arg1[%c0_21, %c2, %c0_22, %c0_23, %c0_24] : memref<1x4x9x9x48xf32, #tpu.memory_space<vmem>>, vector<1x1x8x8x48xf32>
    %20 = vector.shape_cast %19 : vector<1x1x8x8x48xf32> to vector<8x8x48xf32>
    %21 = vector.shape_cast %20 : vector<8x8x48xf32> to vector<64x48xf32>
    %22 = arith.truncf %21 : vector<64x48xf32> to vector<64x48xbf16>
    %c2_25 = arith.constant 2 : index
    %c0_26 = arith.constant 0 : index
    %c0_27 = arith.constant 0 : index
    %23 = vector.load %arg2[%c2_25, %c0_26, %c0_27] : memref<4x48x32xbf16, #tpu.memory_space<vmem>>, vector<1x48x32xbf16>
    %24 = vector.shape_cast %23 : vector<1x48x32xbf16> to vector<48x32xbf16>
    %cst_28 = arith.constant dense<0.000000e+00> : vector<64x32xf32>
    %25 = tpu.matmul %22, %24, %cst_28 {dimension_numbers = #tpu.dot_dimension_numbers<[1], [0], [0], [1], [0, 0, 1, 1], [], []>} : vector<64x48xbf16>, vector<48x32xbf16>, vector<64x32xf32> -> vector<64x32xf32>
    %26 = arith.addf %18, %25 : vector<64x32xf32>
    %c0_29 = arith.constant 0 : index
    %c3 = arith.constant 3 : index
    %c0_30 = arith.constant 0 : index
    %c0_31 = arith.constant 0 : index
    %c0_32 = arith.constant 0 : index
    %27 = vector.load %arg1[%c0_29, %c3, %c0_30, %c0_31, %c0_32] : memref<1x4x9x9x48xf32, #tpu.memory_space<vmem>>, vector<1x1x8x8x48xf32>
    %28 = vector.shape_cast %27 : vector<1x1x8x8x48xf32> to vector<8x8x48xf32>
    %29 = vector.shape_cast %28 : vector<8x8x48xf32> to vector<64x48xf32>
    %30 = arith.truncf %29 : vector<64x48xf32> to vector<64x48xbf16>
    %c3_33 = arith.constant 3 : index
    %c0_34 = arith.constant 0 : index
    %c0_35 = arith.constant 0 : index
    %31 = vector.load %arg2[%c3_33, %c0_34, %c0_35] : memref<4x48x32xbf16, #tpu.memory_space<vmem>>, vector<1x48x32xbf16>
    %32 = vector.shape_cast %31 : vector<1x48x32xbf16> to vector<48x32xbf16>
    %cst_36 = arith.constant dense<0.000000e+00> : vector<64x32xf32>
    %33 = tpu.matmul %30, %32, %cst_36 {dimension_numbers = #tpu.dot_dimension_numbers<[1], [0], [0], [1], [0, 0, 1, 1], [], []>} : vector<64x48xbf16>, vector<48x32xbf16>, vector<64x32xf32> -> vector<64x32xf32>
    %34 = arith.addf %26, %33 : vector<64x32xf32>
    %c0_37 = arith.constant 0 : index
    %c0_38 = arith.constant 0 : index
    %35 = vector.load %arg3[%c0_37, %c0_38] : memref<1x32xf32, #tpu.memory_space<vmem>>, vector<1x32xf32>
    %36 = vector.broadcast %35 : vector<1x32xf32> to vector<64x32xf32>
    %37 = arith.addf %34, %36 : vector<64x32xf32>
    %cst_39 = arith.constant 0.000000e+00 : f32
    %38 = vector.broadcast %cst_39 : f32 to vector<64x32xf32>
    %39 = arith.maximumf %37, %38 : vector<64x32xf32>
    %40 = vector.shape_cast %39 : vector<64x32xf32> to vector<8x8x32xf32>
    %c0_40 = arith.constant 0 : index
    %c0_41 = arith.constant 0 : index
    %c0_42 = arith.constant 0 : index
    %c0_43 = arith.constant 0 : index
    %41 = vector.load %arg11[%c0_40, %c0_41, %c0_42, %c0_43] : memref<4x9x9x32xf32, #tpu.memory_space<vmem>>, vector<1x8x8x32xf32>
    %42 = vector.shape_cast %41 : vector<1x8x8x32xf32> to vector<8x8x32xf32>
    %43 = vector.shape_cast %40 : vector<8x8x32xf32> to vector<1x8x8x32xf32>
    tpu.vector_store %arg11[%c0_40, %c0_41, %c0_42, %c0_43], %43 {strides = array<i32>} : memref<4x9x9x32xf32, #tpu.memory_space<vmem>>, vector<1x8x8x32xf32>,
    %cst_44 = arith.constant 0.000000e+00 : f32
    %44 = vector.broadcast %cst_44 : f32 to vector<64x32xf32>
    %c0_45 = arith.constant 0 : index
    %c1_46 = arith.constant 1 : index
    %c0_47 = arith.constant 0 : index
    %c0_48 = arith.constant 0 : index
    %c0_49 = arith.constant 0 : index
    %45 = vector.load %arg1[%c0_45, %c1_46, %c0_47, %c0_48, %c0_49] : memref<1x4x9x9x48xf32, #tpu.memory_space<vmem>>, vector<1x1x8x8x48xf32>
    %46 = vector.shape_cast %45 : vector<1x1x8x8x48xf32> to vector<8x8x48xf32>
    %47 = vector.shape_cast %46 : vector<8x8x48xf32> to vector<64x48xf32>
    %48 = arith.truncf %47 : vector<64x48xf32> to vector<64x48xbf16>
    %c0_50 = arith.constant 0 : index
    %c0_51 = arith.constant 0 : index
    %c0_52 = arith.constant 0 : index
    %49 = vector.load %arg2[%c0_50, %c0_51, %c0_52] : memref<4x48x32xbf16, #tpu.memory_space<vmem>>, vector<1x48x32xbf16>
    %50 = vector.shape_cast %49 : vector<1x48x32xbf16> to vector<48x32xbf16>
    %cst_53 = arith.constant dense<0.000000e+00> : vector<64x32xf32>
    %51 = tpu.matmul %48, %50, %cst_53 {dimension_numbers = #tpu.dot_dimension_numbers<[1], [0], [0], [1], [0, 0, 1, 1], [], []>} : vector<64x48xbf16>, vector<48x32xbf16>, vector<64x32xf32> -> vector<64x32xf32>
    %52 = arith.addf %44, %51 : vector<64x32xf32>
    %c0_54 = arith.constant 0 : index
    %c0_55 = arith.constant 0 : index
    %c0_56 = arith.constant 0 : index
    %c1_57 = arith.constant 1 : index
    %c0_58 = arith.constant 0 : index
    %53 = vector.load %arg1[%c0_54, %c0_55, %c0_56, %c1_57, %c0_58] : memref<1x4x9x9x48xf32, #tpu.memory_space<vmem>>, vector<1x1x8x8x48xf32>
    %54 = vector.shape_cast %53 : vector<1x1x8x8x48xf32> to vector<8x8x48xf32>
    %55 = vector.shape_cast %54 : vector<8x8x48xf32> to vector<64x48xf32>
    %56 = arith.truncf %55 : vector<64x48xf32> to vector<64x48xbf16>
    %c1_59 = arith.constant 1 : index
    %c0_60 = arith.constant 0 : index
    %c0_61 = arith.constant 0 : index
    %57 = vector.load %arg2[%c1_59, %c0_60, %c0_61] : memref<4x48x32xbf16, #tpu.memory_space<vmem>>, vector<1x48x32xbf16>
    %58 = vector.shape_cast %57 : vector<1x48x32xbf16> to vector<48x32xbf16>
    %cst_62 = arith.constant dense<0.000000e+00> : vector<64x32xf32>
    %59 = tpu.matmul %56, %58, %cst_62 {dimension_numbers = #tpu.dot_dimension_numbers<[1], [0], [0], [1], [0, 0, 1, 1], [], []>} : vector<64x48xbf16>, vector<48x32xbf16>, vector<64x32xf32> -> vector<64x32xf32>
    %60 = arith.addf %52, %59 : vector<64x32xf32>
    %c0_63 = arith.constant 0 : index
    %c3_64 = arith.constant 3 : index
    %c0_65 = arith.constant 0 : index
    %c0_66 = arith.constant 0 : index
    %c0_67 = arith.constant 0 : index
    %61 = vector.load %arg1[%c0_63, %c3_64, %c0_65, %c0_66, %c0_67] : memref<1x4x9x9x48xf32, #tpu.memory_space<vmem>>, vector<1x1x8x8x48xf32>
    %62 = vector.shape_cast %61 : vector<1x1x8x8x48xf32> to vector<8x8x48xf32>
    %63 = vector.shape_cast %62 : vector<8x8x48xf32> to vector<64x48xf32>
    %64 = arith.truncf %63 : vector<64x48xf32> to vector<64x48xbf16>
    %c2_68 = arith.constant 2 : index
    %c0_69 = arith.constant 0 : index
    %c0_70 = arith.constant 0 : index
    %65 = vector.load %arg2[%c2_68, %c0_69, %c0_70] : memref<4x48x32xbf16, #tpu.memory_space<vmem>>, vector<1x48x32xbf16>
    %66 = vector.shape_cast %65 : vector<1x48x32xbf16> to vector<48x32xbf16>
    %cst_71 = arith.constant dense<0.000000e+00> : vector<64x32xf32>
    %67 = tpu.matmul %64, %66, %cst_71 {dimension_numbers = #tpu.dot_dimension_numbers<[1], [0], [0], [1], [0, 0, 1, 1], [], []>} : vector<64x48xbf16>, vector<48x32xbf16>, vector<64x32xf32> -> vector<64x32xf32>
    %68 = arith.addf %60, %67 : vector<64x32xf32>
    %c0_72 = arith.constant 0 : index
    %c2_73 = arith.constant 2 : index
    %c0_74 = arith.constant 0 : index
    %c1_75 = arith.constant 1 : index
    %c0_76 = arith.constant 0 : index
    %69 = vector.load %arg1[%c0_72, %c2_73, %c0_74, %c1_75, %c0_76] : memref<1x4x9x9x48xf32, #tpu.memory_space<vmem>>, vector<1x1x8x8x48xf32>
    %70 = vector.shape_cast %69 : vector<1x1x8x8x48xf32> to vector<8x8x48xf32>
    %71 = vector.shape_cast %70 : vector<8x8x48xf32> to vector<64x48xf32>
    %72 = arith.truncf %71 : vector<64x48xf32> to vector<64x48xbf16>
    %c3_77 = arith.constant 3 : index
    %c0_78 = arith.constant 0 : index
    %c0_79 = arith.constant 0 : index
    %73 = vector.load %arg2[%c3_77, %c0_78, %c0_79] : memref<4x48x32xbf16, #tpu.memory_space<vmem>>, vector<1x48x32xbf16>
    %74 = vector.shape_cast %73 : vector<1x48x32xbf16> to vector<48x32xbf16>
    %cst_80 = arith.constant dense<0.000000e+00> : vector<64x32xf32>
    %75 = tpu.matmul %72, %74, %cst_80 {dimension_numbers = #tpu.dot_dimension_numbers<[1], [0], [0], [1], [0, 0, 1, 1], [], []>} : vector<64x48xbf16>, vector<48x32xbf16>, vector<64x32xf32> -> vector<64x32xf32>
    %76 = arith.addf %68, %75 : vector<64x32xf32>
    %c0_81 = arith.constant 0 : index
    %c0_82 = arith.constant 0 : index
    %77 = vector.load %arg3[%c0_81, %c0_82] : memref<1x32xf32, #tpu.memory_space<vmem>>, vector<1x32xf32>
    %78 = vector.broadcast %77 : vector<1x32xf32> to vector<64x32xf32>
    %79 = arith.addf %76, %78 : vector<64x32xf32>
    %cst_83 = arith.constant 0.000000e+00 : f32
    %80 = vector.broadcast %cst_83 : f32 to vector<64x32xf32>
    %81 = arith.maximumf %79, %80 : vector<64x32xf32>
    %82 = vector.shape_cast %81 : vector<64x32xf32> to vector<8x8x32xf32>
    %c1_84 = arith.constant 1 : index
    %c0_85 = arith.constant 0 : index
    %c0_86 = arith.constant 0 : index
    %c0_87 = arith.constant 0 : index
    %83 = vector.load %arg11[%c1_84, %c0_85, %c0_86, %c0_87] : memref<4x9x9x32xf32, #tpu.memory_space<vmem>>, vector<1x8x8x32xf32>
    %84 = vector.shape_cast %83 : vector<1x8x8x32xf32> to vector<8x8x32xf32>
    %85 = vector.shape_cast %82 : vector<8x8x32xf32> to vector<1x8x8x32xf32>
    tpu.vector_store %arg11[%c1_84, %c0_85, %c0_86, %c0_87], %85 {strides = array<i32>} : memref<4x9x9x32xf32, #tpu.memory_space<vmem>>, vector<1x8x8x32xf32>,
    %cst_88 = arith.constant 0.000000e+00 : f32
    %86 = vector.broadcast %cst_88 : f32 to vector<64x32xf32>
    %c0_89 = arith.constant 0 : index
    %c2_90 = arith.constant 2 : index
    %c0_91 = arith.constant 0 : index
    %c0_92 = arith.constant 0 : index
    %c0_93 = arith.constant 0 : index
    %87 = vector.load %arg1[%c0_89, %c2_90, %c0_91, %c0_92, %c0_93] : memref<1x4x9x9x48xf32, #tpu.memory_space<vmem>>, vector<1x1x8x8x48xf32>
    %88 = vector.shape_cast %87 : vector<1x1x8x8x48xf32> to vector<8x8x48xf32>
    %89 = vector.shape_cast %88 : vector<8x8x48xf32> to vector<64x48xf32>
    %90 = arith.truncf %89 : vector<64x48xf32> to vector<64x48xbf16>
    %c0_94 = arith.constant 0 : index
    %c0_95 = arith.constant 0 : index
    %c0_96 = arith.constant 0 : index
    %91 = vector.load %arg2[%c0_94, %c0_95, %c0_96] : memref<4x48x32xbf16, #tpu.memory_space<vmem>>, vector<1x48x32xbf16>
    %92 = vector.shape_cast %91 : vector<1x48x32xbf16> to vector<48x32xbf16>
    %cst_97 = arith.constant dense<0.000000e+00> : vector<64x32xf32>
    %93 = tpu.matmul %90, %92, %cst_97 {dimension_numbers = #tpu.dot_dimension_numbers<[1], [0], [0], [1], [0, 0, 1, 1], [], []>} : vector<64x48xbf16>, vector<48x32xbf16>, vector<64x32xf32> -> vector<64x32xf32>
    %94 = arith.addf %86, %93 : vector<64x32xf32>
    %c0_98 = arith.constant 0 : index
    %c3_99 = arith.constant 3 : index
    %c0_100 = arith.constant 0 : index
    %c0_101 = arith.constant 0 : index
    %c0_102 = arith.constant 0 : index
    %95 = vector.load %arg1[%c0_98, %c3_99, %c0_100, %c0_101, %c0_102] : memref<1x4x9x9x48xf32, #tpu.memory_space<vmem>>, vector<1x1x8x8x48xf32>
    %96 = vector.shape_cast %95 : vector<1x1x8x8x48xf32> to vector<8x8x48xf32>
    %97 = vector.shape_cast %96 : vector<8x8x48xf32> to vector<64x48xf32>
    %98 = arith.truncf %97 : vector<64x48xf32> to vector<64x48xbf16>
    %c1_103 = arith.constant 1 : index
    %c0_104 = arith.constant 0 : index
    %c0_105 = arith.constant 0 : index
    %99 = vector.load %arg2[%c1_103, %c0_104, %c0_105] : memref<4x48x32xbf16, #tpu.memory_space<vmem>>, vector<1x48x32xbf16>
    %100 = vector.shape_cast %99 : vector<1x48x32xbf16> to vector<48x32xbf16>
    %cst_106 = arith.constant dense<0.000000e+00> : vector<64x32xf32>
    %101 = tpu.matmul %98, %100, %cst_106 {dimension_numbers = #tpu.dot_dimension_numbers<[1], [0], [0], [1], [0, 0, 1, 1], [], []>} : vector<64x48xbf16>, vector<48x32xbf16>, vector<64x32xf32> -> vector<64x32xf32>
    %102 = arith.addf %94, %101 : vector<64x32xf32>
    %c0_107 = arith.constant 0 : index
    %c0_108 = arith.constant 0 : index
    %c1_109 = arith.constant 1 : index
    %c0_110 = arith.constant 0 : index
    %c0_111 = arith.constant 0 : index
    %103 = vector.load %arg1[%c0_107, %c0_108, %c1_109, %c0_110, %c0_111] : memref<1x4x9x9x48xf32, #tpu.memory_space<vmem>>, vector<1x1x8x8x48xf32>
    %104 = vector.shape_cast %103 : vector<1x1x8x8x48xf32> to vector<8x8x48xf32>
    %105 = vector.shape_cast %104 : vector<8x8x48xf32> to vector<64x48xf32>
    %106 = arith.truncf %105 : vector<64x48xf32> to vector<64x48xbf16>
    %c2_112 = arith.constant 2 : index
    %c0_113 = arith.constant 0 : index
    %c0_114 = arith.constant 0 : index
    %107 = vector.load %arg2[%c2_112, %c0_113, %c0_114] : memref<4x48x32xbf16, #tpu.memory_space<vmem>>, vector<1x48x32xbf16>
    %108 = vector.shape_cast %107 : vector<1x48x32xbf16> to vector<48x32xbf16>
    %cst_115 = arith.constant dense<0.000000e+00> : vector<64x32xf32>
    %109 = tpu.matmul %106, %108, %cst_115 {dimension_numbers = #tpu.dot_dimension_numbers<[1], [0], [0], [1], [0, 0, 1, 1], [], []>} : vector<64x48xbf16>, vector<48x32xbf16>, vector<64x32xf32> -> vector<64x32xf32>
    %110 = arith.addf %102, %109 : vector<64x32xf32>
    %c0_116 = arith.constant 0 : index
    %c1_117 = arith.constant 1 : index
    %c1_118 = arith.constant 1 : index
    %c0_119 = arith.constant 0 : index
    %c0_120 = arith.constant 0 : index
    %111 = vector.load %arg1[%c0_116, %c1_117, %c1_118, %c0_119, %c0_120] : memref<1x4x9x9x48xf32, #tpu.memory_space<vmem>>, vector<1x1x8x8x48xf32>
    %112 = vector.shape_cast %111 : vector<1x1x8x8x48xf32> to vector<8x8x48xf32>
    %113 = vector.shape_cast %112 : vector<8x8x48xf32> to vector<64x48xf32>
    %114 = arith.truncf %113 : vector<64x48xf32> to vector<64x48xbf16>
    %c3_121 = arith.constant 3 : index
    %c0_122 = arith.constant 0 : index
    %c0_123 = arith.constant 0 : index
    %115 = vector.load %arg2[%c3_121, %c0_122, %c0_123] : memref<4x48x32xbf16, #tpu.memory_space<vmem>>, vector<1x48x32xbf16>
    %116 = vector.shape_cast %115 : vector<1x48x32xbf16> to vector<48x32xbf16>
    %cst_124 = arith.constant dense<0.000000e+00> : vector<64x32xf32>
    %117 = tpu.matmul %114, %116, %cst_124 {dimension_numbers = #tpu.dot_dimension_numbers<[1], [0], [0], [1], [0, 0, 1, 1], [], []>} : vector<64x48xbf16>, vector<48x32xbf16>, vector<64x32xf32> -> vector<64x32xf32>
    %118 = arith.addf %110, %117 : vector<64x32xf32>
    %c0_125 = arith.constant 0 : index
    %c0_126 = arith.constant 0 : index
    %119 = vector.load %arg3[%c0_125, %c0_126] : memref<1x32xf32, #tpu.memory_space<vmem>>, vector<1x32xf32>
    %120 = vector.broadcast %119 : vector<1x32xf32> to vector<64x32xf32>
    %121 = arith.addf %118, %120 : vector<64x32xf32>
    %cst_127 = arith.constant 0.000000e+00 : f32
    %122 = vector.broadcast %cst_127 : f32 to vector<64x32xf32>
    %123 = arith.maximumf %121, %122 : vector<64x32xf32>
    %124 = vector.shape_cast %123 : vector<64x32xf32> to vector<8x8x32xf32>
    %c2_128 = arith.constant 2 : index
    %c0_129 = arith.constant 0 : index
    %c0_130 = arith.constant 0 : index
    %c0_131 = arith.constant 0 : index
    %125 = vector.load %arg11[%c2_128, %c0_129, %c0_130, %c0_131] : memref<4x9x9x32xf32, #tpu.memory_space<vmem>>, vector<1x8x8x32xf32>
    %126 = vector.shape_cast %125 : vector<1x8x8x32xf32> to vector<8x8x32xf32>
    %127 = vector.shape_cast %124 : vector<8x8x32xf32> to vector<1x8x8x32xf32>
    tpu.vector_store %arg11[%c2_128, %c0_129, %c0_130, %c0_131], %127 {strides = array<i32>} : memref<4x9x9x32xf32, #tpu.memory_space<vmem>>, vector<1x8x8x32xf32>,
    %cst_132 = arith.constant 0.000000e+00 : f32
    %128 = vector.broadcast %cst_132 : f32 to vector<64x32xf32>
    %c0_133 = arith.constant 0 : index
    %c3_134 = arith.constant 3 : index
    %c0_135 = arith.constant 0 : index
    %c0_136 = arith.constant 0 : index
    %c0_137 = arith.constant 0 : index
    %129 = vector.load %arg1[%c0_133, %c3_134, %c0_135, %c0_136, %c0_137] : memref<1x4x9x9x48xf32, #tpu.memory_space<vmem>>, vector<1x1x8x8x48xf32>
    %130 = vector.shape_cast %129 : vector<1x1x8x8x48xf32> to vector<8x8x48xf32>
    %131 = vector.shape_cast %130 : vector<8x8x48xf32> to vector<64x48xf32>
    %132 = arith.truncf %131 : vector<64x48xf32> to vector<64x48xbf16>
    %c0_138 = arith.constant 0 : index
    %c0_139 = arith.constant 0 : index
    %c0_140 = arith.constant 0 : index
    %133 = vector.load %arg2[%c0_138, %c0_139, %c0_140] : memref<4x48x32xbf16, #tpu.memory_space<vmem>>, vector<1x48x32xbf16>
    %134 = vector.shape_cast %133 : vector<1x48x32xbf16> to vector<48x32xbf16>
    %cst_141 = arith.constant dense<0.000000e+00> : vector<64x32xf32>
    %135 = tpu.matmul %132, %134, %cst_141 {dimension_numbers = #tpu.dot_dimension_numbers<[1], [0], [0], [1], [0, 0, 1, 1], [], []>} : vector<64x48xbf16>, vector<48x32xbf16>, vector<64x32xf32> -> vector<64x32xf32>
    %136 = arith.addf %128, %135 : vector<64x32xf32>
    %c0_142 = arith.constant 0 : index
    %c2_143 = arith.constant 2 : index
    %c0_144 = arith.constant 0 : index
    %c1_145 = arith.constant 1 : index
    %c0_146 = arith.constant 0 : index
    %137 = vector.load %arg1[%c0_142, %c2_143, %c0_144, %c1_145, %c0_146] : memref<1x4x9x9x48xf32, #tpu.memory_space<vmem>>, vector<1x1x8x8x48xf32>
    %138 = vector.shape_cast %137 : vector<1x1x8x8x48xf32> to vector<8x8x48xf32>
    %139 = vector.shape_cast %138 : vector<8x8x48xf32> to vector<64x48xf32>
    %140 = arith.truncf %139 : vector<64x48xf32> to vector<64x48xbf16>
    %c1_147 = arith.constant 1 : index
    %c0_148 = arith.constant 0 : index
    %c0_149 = arith.constant 0 : index
    %141 = vector.load %arg2[%c1_147, %c0_148, %c0_149] : memref<4x48x32xbf16, #tpu.memory_space<vmem>>, vector<1x48x32xbf16>
    %142 = vector.shape_cast %141 : vector<1x48x32xbf16> to vector<48x32xbf16>
    %cst_150 = arith.constant dense<0.000000e+00> : vector<64x32xf32>
    %143 = tpu.matmul %140, %142, %cst_150 {dimension_numbers = #tpu.dot_dimension_numbers<[1], [0], [0], [1], [0, 0, 1, 1], [], []>} : vector<64x48xbf16>, vector<48x32xbf16>, vector<64x32xf32> -> vector<64x32xf32>
    %144 = arith.addf %136, %143 : vector<64x32xf32>
    %c0_151 = arith.constant 0 : index
    %c1_152 = arith.constant 1 : index
    %c1_153 = arith.constant 1 : index
    %c0_154 = arith.constant 0 : index
    %c0_155 = arith.constant 0 : index
    %145 = vector.load %arg1[%c0_151, %c1_152, %c1_153, %c0_154, %c0_155] : memref<1x4x9x9x48xf32, #tpu.memory_space<vmem>>, vector<1x1x8x8x48xf32>
    %146 = vector.shape_cast %145 : vector<1x1x8x8x48xf32> to vector<8x8x48xf32>
    %147 = vector.shape_cast %146 : vector<8x8x48xf32> to vector<64x48xf32>
    %148 = arith.truncf %147 : vector<64x48xf32> to vector<64x48xbf16>
    %c2_156 = arith.constant 2 : index
    %c0_157 = arith.constant 0 : index
    %c0_158 = arith.constant 0 : index
    %149 = vector.load %arg2[%c2_156, %c0_157, %c0_158] : memref<4x48x32xbf16, #tpu.memory_space<vmem>>, vector<1x48x32xbf16>
    %150 = vector.shape_cast %149 : vector<1x48x32xbf16> to vector<48x32xbf16>
    %cst_159 = arith.constant dense<0.000000e+00> : vector<64x32xf32>
    %151 = tpu.matmul %148, %150, %cst_159 {dimension_numbers = #tpu.dot_dimension_numbers<[1], [0], [0], [1], [0, 0, 1, 1], [], []>} : vector<64x48xbf16>, vector<48x32xbf16>, vector<64x32xf32> -> vector<64x32xf32>
    %152 = arith.addf %144, %151 : vector<64x32xf32>
    %c0_160 = arith.constant 0 : index
    %c0_161 = arith.constant 0 : index
    %c1_162 = arith.constant 1 : index
    %c1_163 = arith.constant 1 : index
    %c0_164 = arith.constant 0 : index
    %153 = vector.load %arg1[%c0_160, %c0_161, %c1_162, %c1_163, %c0_164] : memref<1x4x9x9x48xf32, #tpu.memory_space<vmem>>, vector<1x1x8x8x48xf32>
    %154 = vector.shape_cast %153 : vector<1x1x8x8x48xf32> to vector<8x8x48xf32>
    %155 = vector.shape_cast %154 : vector<8x8x48xf32> to vector<64x48xf32>
    %156 = arith.truncf %155 : vector<64x48xf32> to vector<64x48xbf16>
    %c3_165 = arith.constant 3 : index
    %c0_166 = arith.constant 0 : index
    %c0_167 = arith.constant 0 : index
    %157 = vector.load %arg2[%c3_165, %c0_166, %c0_167] : memref<4x48x32xbf16, #tpu.memory_space<vmem>>, vector<1x48x32xbf16>
    %158 = vector.shape_cast %157 : vector<1x48x32xbf16> to vector<48x32xbf16>
    %cst_168 = arith.constant dense<0.000000e+00> : vector<64x32xf32>
    %159 = tpu.matmul %156, %158, %cst_168 {dimension_numbers = #tpu.dot_dimension_numbers<[1], [0], [0], [1], [0, 0, 1, 1], [], []>} : vector<64x48xbf16>, vector<48x32xbf16>, vector<64x32xf32> -> vector<64x32xf32>
    %160 = arith.addf %152, %159 : vector<64x32xf32>
    %c0_169 = arith.constant 0 : index
    %c0_170 = arith.constant 0 : index
    %161 = vector.load %arg3[%c0_169, %c0_170] : memref<1x32xf32, #tpu.memory_space<vmem>>, vector<1x32xf32>
    %162 = vector.broadcast %161 : vector<1x32xf32> to vector<64x32xf32>
    %163 = arith.addf %160, %162 : vector<64x32xf32>
    %cst_171 = arith.constant 0.000000e+00 : f32
    %164 = vector.broadcast %cst_171 : f32 to vector<64x32xf32>
    %165 = arith.maximumf %163, %164 : vector<64x32xf32>
    %166 = vector.shape_cast %165 : vector<64x32xf32> to vector<8x8x32xf32>
    %c3_172 = arith.constant 3 : index
    %c0_173 = arith.constant 0 : index
    %c0_174 = arith.constant 0 : index
    %c0_175 = arith.constant 0 : index
    %167 = vector.load %arg11[%c3_172, %c0_173, %c0_174, %c0_175] : memref<4x9x9x32xf32, #tpu.memory_space<vmem>>, vector<1x8x8x32xf32>
    %168 = vector.shape_cast %167 : vector<1x8x8x32xf32> to vector<8x8x32xf32>
    %169 = vector.shape_cast %166 : vector<8x8x32xf32> to vector<1x8x8x32xf32>
    tpu.vector_store %arg11[%c3_172, %c0_173, %c0_174, %c0_175], %169 {strides = array<i32>} : memref<4x9x9x32xf32, #tpu.memory_space<vmem>>, vector<1x8x8x32xf32>,
    %cst_176 = arith.constant 0.000000e+00 : f32
    %170 = vector.broadcast %cst_176 : f32 to vector<64x64xf32>
    %c0_177 = arith.constant 0 : index
    %c0_178 = arith.constant 0 : index
    %c0_179 = arith.constant 0 : index
    %c0_180 = arith.constant 0 : index
    %171 = vector.load %arg11[%c0_177, %c0_178, %c0_179, %c0_180] : memref<4x9x9x32xf32, #tpu.memory_space<vmem>>, vector<1x8x8x32xf32>
    %172 = vector.shape_cast %171 : vector<1x8x8x32xf32> to vector<8x8x32xf32>
    %173 = vector.shape_cast %172 : vector<8x8x32xf32> to vector<64x32xf32>
    %174 = arith.truncf %173 : vector<64x32xf32> to vector<64x32xbf16>
    %c0_181 = arith.constant 0 : index
    %c0_182 = arith.constant 0 : index
    %c0_183 = arith.constant 0 : index
    %175 = vector.load %arg4[%c0_181, %c0_182, %c0_183] : memref<16x32x64xbf16, #tpu.memory_space<vmem>>, vector<1x32x64xbf16>
    %176 = vector.shape_cast %175 : vector<1x32x64xbf16> to vector<32x64xbf16>
    %cst_184 = arith.constant dense<0.000000e+00> : vector<64x64xf32>
    %177 = tpu.matmul %174, %176, %cst_184 {dimension_numbers = #tpu.dot_dimension_numbers<[1], [0], [0], [1], [0, 0, 1, 1], [], []>} : vector<64x32xbf16>, vector<32x64xbf16>, vector<64x64xf32> -> vector<64x64xf32>
    %178 = arith.addf %170, %177 : vector<64x64xf32>
    %c1_185 = arith.constant 1 : index
    %c0_186 = arith.constant 0 : index
    %c0_187 = arith.constant 0 : index
    %c0_188 = arith.constant 0 : index
    %179 = vector.load %arg11[%c1_185, %c0_186, %c0_187, %c0_188] : memref<4x9x9x32xf32, #tpu.memory_space<vmem>>, vector<1x8x8x32xf32>
    %180 = vector.shape_cast %179 : vector<1x8x8x32xf32> to vector<8x8x32xf32>
    %181 = vector.shape_cast %180 : vector<8x8x32xf32> to vector<64x32xf32>
    %182 = arith.truncf %181 : vector<64x32xf32> to vector<64x32xbf16>
    %c1_189 = arith.constant 1 : index
    %c0_190 = arith.constant 0 : index
    %c0_191 = arith.constant 0 : index
    %183 = vector.load %arg4[%c1_189, %c0_190, %c0_191] : memref<16x32x64xbf16, #tpu.memory_space<vmem>>, vector<1x32x64xbf16>
    %184 = vector.shape_cast %183 : vector<1x32x64xbf16> to vector<32x64xbf16>
    %cst_192 = arith.constant dense<0.000000e+00> : vector<64x64xf32>
    %185 = tpu.matmul %182, %184, %cst_192 {dimension_numbers = #tpu.dot_dimension_numbers<[1], [0], [0], [1], [0, 0, 1, 1], [], []>} : vector<64x32xbf16>, vector<32x64xbf16>, vector<64x64xf32> -> vector<64x64xf32>
    %186 = arith.addf %178, %185 : vector<64x64xf32>
    %c0_193 = arith.constant 0 : index
    %c0_194 = arith.constant 0 : index
    %c1_195 = arith.constant 1 : index
    %c0_196 = arith.constant 0 : index
    %187 = vector.load %arg11[%c0_193, %c0_194, %c1_195, %c0_196] : memref<4x9x9x32xf32, #tpu.memory_space<vmem>>, vector<1x8x8x32xf32>
    %188 = vector.shape_cast %187 : vector<1x8x8x32xf32> to vector<8x8x32xf32>
    %189 = vector.shape_cast %188 : vector<8x8x32xf32> to vector<64x32xf32>
    %190 = arith.truncf %189 : vector<64x32xf32> to vector<64x32xbf16>
    %c2_197 = arith.constant 2 : index
    %c0_198 = arith.constant 0 : index
    %c0_199 = arith.constant 0 : index
    %191 = vector.load %arg4[%c2_197, %c0_198, %c0_199] : memref<16x32x64xbf16, #tpu.memory_space<vmem>>, vector<1x32x64xbf16>
    %192 = vector.shape_cast %191 : vector<1x32x64xbf16> to vector<32x64xbf16>
    %cst_200 = arith.constant dense<0.000000e+00> : vector<64x64xf32>
    %193 = tpu.matmul %190, %192, %cst_200 {dimension_numbers = #tpu.dot_dimension_numbers<[1], [0], [0], [1], [0, 0, 1, 1], [], []>} : vector<64x32xbf16>, vector<32x64xbf16>, vector<64x64xf32> -> vector<64x64xf32>
    %194 = arith.addf %186, %193 : vector<64x64xf32>
    %c1_201 = arith.constant 1 : index
    %c0_202 = arith.constant 0 : index
    %c1_203 = arith.constant 1 : index
    %c0_204 = arith.constant 0 : index
    %195 = vector.load %arg11[%c1_201, %c0_202, %c1_203, %c0_204] : memref<4x9x9x32xf32, #tpu.memory_space<vmem>>, vector<1x8x8x32xf32>
    %196 = vector.shape_cast %195 : vector<1x8x8x32xf32> to vector<8x8x32xf32>
    %197 = vector.shape_cast %196 : vector<8x8x32xf32> to vector<64x32xf32>
    %198 = arith.truncf %197 : vector<64x32xf32> to vector<64x32xbf16>
    %c3_205 = arith.constant 3 : index
    %c0_206 = arith.constant 0 : index
    %c0_207 = arith.constant 0 : index
    %199 = vector.load %arg4[%c3_205, %c0_206, %c0_207] : memref<16x32x64xbf16, #tpu.memory_space<vmem>>, vector<1x32x64xbf16>
    %200 = vector.shape_cast %199 : vector<1x32x64xbf16> to vector<32x64xbf16>
    %cst_208 = arith.constant dense<0.000000e+00> : vector<64x64xf32>
    %201 = tpu.matmul %198, %200, %cst_208 {dimension_numbers = #tpu.dot_dimension_numbers<[1], [0], [0], [1], [0, 0, 1, 1], [], []>} : vector<64x32xbf16>, vector<32x64xbf16>, vector<64x64xf32> -> vector<64x64xf32>
    %202 = arith.addf %194, %201 : vector<64x64xf32>
    %c2_209 = arith.constant 2 : index
    %c0_210 = arith.constant 0 : index
    %c0_211 = arith.constant 0 : index
    %c0_212 = arith.constant 0 : index
    %203 = vector.load %arg11[%c2_209, %c0_210, %c0_211, %c0_212] : memref<4x9x9x32xf32, #tpu.memory_space<vmem>>, vector<1x8x8x32xf32>
    %204 = vector.shape_cast %203 : vector<1x8x8x32xf32> to vector<8x8x32xf32>
    %205 = vector.shape_cast %204 : vector<8x8x32xf32> to vector<64x32xf32>
    %206 = arith.truncf %205 : vector<64x32xf32> to vector<64x32xbf16>
    %c4 = arith.constant 4 : index
    %c0_213 = arith.constant 0 : index
    %c0_214 = arith.constant 0 : index
    %207 = vector.load %arg4[%c4, %c0_213, %c0_214] : memref<16x32x64xbf16, #tpu.memory_space<vmem>>, vector<1x32x64xbf16>
    %208 = vector.shape_cast %207 : vector<1x32x64xbf16> to vector<32x64xbf16>
    %cst_215 = arith.constant dense<0.000000e+00> : vector<64x64xf32>
    %209 = tpu.matmul %206, %208, %cst_215 {dimension_numbers = #tpu.dot_dimension_numbers<[1], [0], [0], [1], [0, 0, 1, 1], [], []>} : vector<64x32xbf16>, vector<32x64xbf16>, vector<64x64xf32> -> vector<64x64xf32>
    %210 = arith.addf %202, %209 : vector<64x64xf32>
    %c3_216 = arith.constant 3 : index
    %c0_217 = arith.constant 0 : index
    %c0_218 = arith.constant 0 : index
    %c0_219 = arith.constant 0 : index
    %211 = vector.load %arg11[%c3_216, %c0_217, %c0_218, %c0_219] : memref<4x9x9x32xf32, #tpu.memory_space<vmem>>, vector<1x8x8x32xf32>
    %212 = vector.shape_cast %211 : vector<1x8x8x32xf32> to vector<8x8x32xf32>
    %213 = vector.shape_cast %212 : vector<8x8x32xf32> to vector<64x32xf32>
    %214 = arith.truncf %213 : vector<64x32xf32> to vector<64x32xbf16>
    %c5 = arith.constant 5 : index
    %c0_220 = arith.constant 0 : index
    %c0_221 = arith.constant 0 : index
    %215 = vector.load %arg4[%c5, %c0_220, %c0_221] : memref<16x32x64xbf16, #tpu.memory_space<vmem>>, vector<1x32x64xbf16>
    %216 = vector.shape_cast %215 : vector<1x32x64xbf16> to vector<32x64xbf16>
    %cst_222 = arith.constant dense<0.000000e+00> : vector<64x64xf32>
    %217 = tpu.matmul %214, %216, %cst_222 {dimension_numbers = #tpu.dot_dimension_numbers<[1], [0], [0], [1], [0, 0, 1, 1], [], []>} : vector<64x32xbf16>, vector<32x64xbf16>, vector<64x64xf32> -> vector<64x64xf32>
    %218 = arith.addf %210, %217 : vector<64x64xf32>
    %c2_223 = arith.constant 2 : index
    %c0_224 = arith.constant 0 : index
    %c1_225 = arith.constant 1 : index
    %c0_226 = arith.constant 0 : index
    %219 = vector.load %arg11[%c2_223, %c0_224, %c1_225, %c0_226] : memref<4x9x9x32xf32, #tpu.memory_space<vmem>>, vector<1x8x8x32xf32>
    %220 = vector.shape_cast %219 : vector<1x8x8x32xf32> to vector<8x8x32xf32>
    %221 = vector.shape_cast %220 : vector<8x8x32xf32> to vector<64x32xf32>
    %222 = arith.truncf %221 : vector<64x32xf32> to vector<64x32xbf16>
    %c6 = arith.constant 6 : index
    %c0_227 = arith.constant 0 : index
    %c0_228 = arith.constant 0 : index
    %223 = vector.load %arg4[%c6, %c0_227, %c0_228] : memref<16x32x64xbf16, #tpu.memory_space<vmem>>, vector<1x32x64xbf16>
    %224 = vector.shape_cast %223 : vector<1x32x64xbf16> to vector<32x64xbf16>
    %cst_229 = arith.constant dense<0.000000e+00> : vector<64x64xf32>
    %225 = tpu.matmul %222, %224, %cst_229 {dimension_numbers = #tpu.dot_dimension_numbers<[1], [0], [0], [1], [0, 0, 1, 1], [], []>} : vector<64x32xbf16>, vector<32x64xbf16>, vector<64x64xf32> -> vector<64x64xf32>
    %226 = arith.addf %218, %225 : vector<64x64xf32>
    %c3_230 = arith.constant 3 : index
    %c0_231 = arith.constant 0 : index
    %c1_232 = arith.constant 1 : index
    %c0_233 = arith.constant 0 : index
    %227 = vector.load %arg11[%c3_230, %c0_231, %c1_232, %c0_233] : memref<4x9x9x32xf32, #tpu.memory_space<vmem>>, vector<1x8x8x32xf32>
    %228 = vector.shape_cast %227 : vector<1x8x8x32xf32> to vector<8x8x32xf32>
    %229 = vector.shape_cast %228 : vector<8x8x32xf32> to vector<64x32xf32>
    %230 = arith.truncf %229 : vector<64x32xf32> to vector<64x32xbf16>
    %c7 = arith.constant 7 : index
    %c0_234 = arith.constant 0 : index
    %c0_235 = arith.constant 0 : index
    %231 = vector.load %arg4[%c7, %c0_234, %c0_235] : memref<16x32x64xbf16, #tpu.memory_space<vmem>>, vector<1x32x64xbf16>
    %232 = vector.shape_cast %231 : vector<1x32x64xbf16> to vector<32x64xbf16>
    %cst_236 = arith.constant dense<0.000000e+00> : vector<64x64xf32>
    %233 = tpu.matmul %230, %232, %cst_236 {dimension_numbers = #tpu.dot_dimension_numbers<[1], [0], [0], [1], [0, 0, 1, 1], [], []>} : vector<64x32xbf16>, vector<32x64xbf16>, vector<64x64xf32> -> vector<64x64xf32>
    %234 = arith.addf %226, %233 : vector<64x64xf32>
    %c0_237 = arith.constant 0 : index
    %c1_238 = arith.constant 1 : index
    %c0_239 = arith.constant 0 : index
    %c0_240 = arith.constant 0 : index
    %235 = vector.load %arg11[%c0_237, %c1_238, %c0_239, %c0_240] : memref<4x9x9x32xf32, #tpu.memory_space<vmem>>, vector<1x8x8x32xf32>
    %236 = vector.shape_cast %235 : vector<1x8x8x32xf32> to vector<8x8x32xf32>
    %237 = vector.shape_cast %236 : vector<8x8x32xf32> to vector<64x32xf32>
    %238 = arith.truncf %237 : vector<64x32xf32> to vector<64x32xbf16>
    %c8 = arith.constant 8 : index
    %c0_241 = arith.constant 0 : index
    %c0_242 = arith.constant 0 : index
    %239 = vector.load %arg4[%c8, %c0_241, %c0_242] : memref<16x32x64xbf16, #tpu.memory_space<vmem>>, vector<1x32x64xbf16>
    %240 = vector.shape_cast %239 : vector<1x32x64xbf16> to vector<32x64xbf16>
    %cst_243 = arith.constant dense<0.000000e+00> : vector<64x64xf32>
    %241 = tpu.matmul %238, %240, %cst_243 {dimension_numbers = #tpu.dot_dimension_numbers<[1], [0], [0], [1], [0, 0, 1, 1], [], []>} : vector<64x32xbf16>, vector<32x64xbf16>, vector<64x64xf32> -> vector<64x64xf32>
    %242 = arith.addf %234, %241 : vector<64x64xf32>
    %c1_244 = arith.constant 1 : index
    %c1_245 = arith.constant 1 : index
    %c0_246 = arith.constant 0 : index
    %c0_247 = arith.constant 0 : index
    %243 = vector.load %arg11[%c1_244, %c1_245, %c0_246, %c0_247] : memref<4x9x9x32xf32, #tpu.memory_space<vmem>>, vector<1x8x8x32xf32>
    %244 = vector.shape_cast %243 : vector<1x8x8x32xf32> to vector<8x8x32xf32>
    %245 = vector.shape_cast %244 : vector<8x8x32xf32> to vector<64x32xf32>
    %246 = arith.truncf %245 : vector<64x32xf32> to vector<64x32xbf16>
    %c9 = arith.constant 9 : index
    %c0_248 = arith.constant 0 : index
    %c0_249 = arith.constant 0 : index
    %247 = vector.load %arg4[%c9, %c0_248, %c0_249] : memref<16x32x64xbf16, #tpu.memory_space<vmem>>, vector<1x32x64xbf16>
    %248 = vector.shape_cast %247 : vector<1x32x64xbf16> to vector<32x64xbf16>
    %cst_250 = arith.constant dense<0.000000e+00> : vector<64x64xf32>
    %249 = tpu.matmul %246, %248, %cst_250 {dimension_numbers = #tpu.dot_dimension_numbers<[1], [0], [0], [1], [0, 0, 1, 1], [], []>} : vector<64x32xbf16>, vector<32x64xbf16>, vector<64x64xf32> -> vector<64x64xf32>
    %250 = arith.addf %242, %249 : vector<64x64xf32>
    %c0_251 = arith.constant 0 : index
    %c1_252 = arith.constant 1 : index
    %c1_253 = arith.constant 1 : index
    %c0_254 = arith.constant 0 : index
    %251 = vector.load %arg11[%c0_251, %c1_252, %c1_253, %c0_254] : memref<4x9x9x32xf32, #tpu.memory_space<vmem>>, vector<1x8x8x32xf32>
    %252 = vector.shape_cast %251 : vector<1x8x8x32xf32> to vector<8x8x32xf32>
    %253 = vector.shape_cast %252 : vector<8x8x32xf32> to vector<64x32xf32>
    %254 = arith.truncf %253 : vector<64x32xf32> to vector<64x32xbf16>
    %c10 = arith.constant 10 : index
    %c0_255 = arith.constant 0 : index
    %c0_256 = arith.constant 0 : index
    %255 = vector.load %arg4[%c10, %c0_255, %c0_256] : memref<16x32x64xbf16, #tpu.memory_space<vmem>>, vector<1x32x64xbf16>
    %256 = vector.shape_cast %255 : vector<1x32x64xbf16> to vector<32x64xbf16>
    %cst_257 = arith.constant dense<0.000000e+00> : vector<64x64xf32>
    %257 = tpu.matmul %254, %256, %cst_257 {dimension_numbers = #tpu.dot_dimension_numbers<[1], [0], [0], [1], [0, 0, 1, 1], [], []>} : vector<64x32xbf16>, vector<32x64xbf16>, vector<64x64xf32> -> vector<64x64xf32>
    %258 = arith.addf %250, %257 : vector<64x64xf32>
    %c1_258 = arith.constant 1 : index
    %c1_259 = arith.constant 1 : index
    %c1_260 = arith.constant 1 : index
    %c0_261 = arith.constant 0 : index
    %259 = vector.load %arg11[%c1_258, %c1_259, %c1_260, %c0_261] : memref<4x9x9x32xf32, #tpu.memory_space<vmem>>, vector<1x8x8x32xf32>
    %260 = vector.shape_cast %259 : vector<1x8x8x32xf32> to vector<8x8x32xf32>
    %261 = vector.shape_cast %260 : vector<8x8x32xf32> to vector<64x32xf32>
    %262 = arith.truncf %261 : vector<64x32xf32> to vector<64x32xbf16>
    %c11 = arith.constant 11 : index
    %c0_262 = arith.constant 0 : index
    %c0_263 = arith.constant 0 : index
    %263 = vector.load %arg4[%c11, %c0_262, %c0_263] : memref<16x32x64xbf16, #tpu.memory_space<vmem>>, vector<1x32x64xbf16>
    %264 = vector.shape_cast %263 : vector<1x32x64xbf16> to vector<32x64xbf16>
    %cst_264 = arith.constant dense<0.000000e+00> : vector<64x64xf32>
    %265 = tpu.matmul %262, %264, %cst_264 {dimension_numbers = #tpu.dot_dimension_numbers<[1], [0], [0], [1], [0, 0, 1, 1], [], []>} : vector<64x32xbf16>, vector<32x64xbf16>, vector<64x64xf32> -> vector<64x64xf32>
    %266 = arith.addf %258, %265 : vector<64x64xf32>
    %c2_265 = arith.constant 2 : index
    %c1_266 = arith.constant 1 : index
    %c0_267 = arith.constant 0 : index
    %c0_268 = arith.constant 0 : index
    %267 = vector.load %arg11[%c2_265, %c1_266, %c0_267, %c0_268] : memref<4x9x9x32xf32, #tpu.memory_space<vmem>>, vector<1x8x8x32xf32>
    %268 = vector.shape_cast %267 : vector<1x8x8x32xf32> to vector<8x8x32xf32>
    %269 = vector.shape_cast %268 : vector<8x8x32xf32> to vector<64x32xf32>
    %270 = arith.truncf %269 : vector<64x32xf32> to vector<64x32xbf16>
    %c12 = arith.constant 12 : index
    %c0_269 = arith.constant 0 : index
    %c0_270 = arith.constant 0 : index
    %271 = vector.load %arg4[%c12, %c0_269, %c0_270] : memref<16x32x64xbf16, #tpu.memory_space<vmem>>, vector<1x32x64xbf16>
    %272 = vector.shape_cast %271 : vector<1x32x64xbf16> to vector<32x64xbf16>
    %cst_271 = arith.constant dense<0.000000e+00> : vector<64x64xf32>
    %273 = tpu.matmul %270, %272, %cst_271 {dimension_numbers = #tpu.dot_dimension_numbers<[1], [0], [0], [1], [0, 0, 1, 1], [], []>} : vector<64x32xbf16>, vector<32x64xbf16>, vector<64x64xf32> -> vector<64x64xf32>
    %274 = arith.addf %266, %273 : vector<64x64xf32>
    %c3_272 = arith.constant 3 : index
    %c1_273 = arith.constant 1 : index
    %c0_274 = arith.constant 0 : index
    %c0_275 = arith.constant 0 : index
    %275 = vector.load %arg11[%c3_272, %c1_273, %c0_274, %c0_275] : memref<4x9x9x32xf32, #tpu.memory_space<vmem>>, vector<1x8x8x32xf32>
    %276 = vector.shape_cast %275 : vector<1x8x8x32xf32> to vector<8x8x32xf32>
    %277 = vector.shape_cast %276 : vector<8x8x32xf32> to vector<64x32xf32>
    %278 = arith.truncf %277 : vector<64x32xf32> to vector<64x32xbf16>
    %c13 = arith.constant 13 : index
    %c0_276 = arith.constant 0 : index
    %c0_277 = arith.constant 0 : index
    %279 = vector.load %arg4[%c13, %c0_276, %c0_277] : memref<16x32x64xbf16, #tpu.memory_space<vmem>>, vector<1x32x64xbf16>
    %280 = vector.shape_cast %279 : vector<1x32x64xbf16> to vector<32x64xbf16>
    %cst_278 = arith.constant dense<0.000000e+00> : vector<64x64xf32>
    %281 = tpu.matmul %278, %280, %cst_278 {dimension_numbers = #tpu.dot_dimension_numbers<[1], [0], [0], [1], [0, 0, 1, 1], [], []>} : vector<64x32xbf16>, vector<32x64xbf16>, vector<64x64xf32> -> vector<64x64xf32>
    %282 = arith.addf %274, %281 : vector<64x64xf32>
    %c2_279 = arith.constant 2 : index
    %c1_280 = arith.constant 1 : index
    %c1_281 = arith.constant 1 : index
    %c0_282 = arith.constant 0 : index
    %283 = vector.load %arg11[%c2_279, %c1_280, %c1_281, %c0_282] : memref<4x9x9x32xf32, #tpu.memory_space<vmem>>, vector<1x8x8x32xf32>
    %284 = vector.shape_cast %283 : vector<1x8x8x32xf32> to vector<8x8x32xf32>
    %285 = vector.shape_cast %284 : vector<8x8x32xf32> to vector<64x32xf32>
    %286 = arith.truncf %285 : vector<64x32xf32> to vector<64x32xbf16>
    %c14 = arith.constant 14 : index
    %c0_283 = arith.constant 0 : index
    %c0_284 = arith.constant 0 : index
    %287 = vector.load %arg4[%c14, %c0_283, %c0_284] : memref<16x32x64xbf16, #tpu.memory_space<vmem>>, vector<1x32x64xbf16>
    %288 = vector.shape_cast %287 : vector<1x32x64xbf16> to vector<32x64xbf16>
    %cst_285 = arith.constant dense<0.000000e+00> : vector<64x64xf32>
    %289 = tpu.matmul %286, %288, %cst_285 {dimension_numbers = #tpu.dot_dimension_numbers<[1], [0], [0], [1], [0, 0, 1, 1], [], []>} : vector<64x32xbf16>, vector<32x64xbf16>, vector<64x64xf32> -> vector<64x64xf32>
    %290 = arith.addf %282, %289 : vector<64x64xf32>
    %c3_286 = arith.constant 3 : index
    %c1_287 = arith.constant 1 : index
    %c1_288 = arith.constant 1 : index
    %c0_289 = arith.constant 0 : index
    %291 = vector.load %arg11[%c3_286, %c1_287, %c1_288, %c0_289] : memref<4x9x9x32xf32, #tpu.memory_space<vmem>>, vector<1x8x8x32xf32>
    %292 = vector.shape_cast %291 : vector<1x8x8x32xf32> to vector<8x8x32xf32>
    %293 = vector.shape_cast %292 : vector<8x8x32xf32> to vector<64x32xf32>
    %294 = arith.truncf %293 : vector<64x32xf32> to vector<64x32xbf16>
    %c15 = arith.constant 15 : index
    %c0_290 = arith.constant 0 : index
    %c0_291 = arith.constant 0 : index
    %295 = vector.load %arg4[%c15, %c0_290, %c0_291] : memref<16x32x64xbf16, #tpu.memory_space<vmem>>, vector<1x32x64xbf16>
    %296 = vector.shape_cast %295 : vector<1x32x64xbf16> to vector<32x64xbf16>
    %cst_292 = arith.constant dense<0.000000e+00> : vector<64x64xf32>
    %297 = tpu.matmul %294, %296, %cst_292 {dimension_numbers = #tpu.dot_dimension_numbers<[1], [0], [0], [1], [0, 0, 1, 1], [], []>} : vector<64x32xbf16>, vector<32x64xbf16>, vector<64x64xf32> -> vector<64x64xf32>
    %298 = arith.addf %290, %297 : vector<64x64xf32>
    %c0_293 = arith.constant 0 : index
    %c0_294 = arith.constant 0 : index
    %299 = vector.load %arg5[%c0_293, %c0_294] : memref<1x64xf32, #tpu.memory_space<vmem>>, vector<1x64xf32>
    %300 = vector.broadcast %299 : vector<1x64xf32> to vector<64x64xf32>
    %301 = arith.addf %298, %300 : vector<64x64xf32>
    %cst_295 = arith.constant 0.000000e+00 : f32
    %302 = vector.broadcast %cst_295 : f32 to vector<64x64xf32>
    %303 = arith.maximumf %301, %302 : vector<64x64xf32>
    %cst_296 = arith.constant 0.000000e+00 : f32
    %304 = vector.broadcast %cst_296 : f32 to vector<8x16x64xf32>
    %c0_297 = arith.constant 0 : index
    %c0_298 = arith.constant 0 : index
    %c0_299 = arith.constant 0 : index
    %305 = vector.load %arg12[%c0_297, %c0_298, %c0_299] : memref<8x16x64xf32, #tpu.memory_space<vmem>>, vector<8x16x64xf32>
    tpu.vector_store %arg12[%c0_297, %c0_298, %c0_299], %304 {strides = array<i32>} : memref<8x16x64xf32, #tpu.memory_space<vmem>>, vector<8x16x64xf32>,
    %306 = vector.shape_cast %303 : vector<64x64xf32> to vector<8x8x64xf32>
    %c0_300 = arith.constant 0 : index
    %c0_301 = arith.constant 0 : index
    %c0_302 = arith.constant 0 : index
    %307 = vector.load %arg12[%c0_300, %c0_301, %c0_302] : memref<8x16x64xf32, #tpu.memory_space<vmem>>, vector<8x8x64xf32>
    tpu.vector_store %arg12[%c0_300, %c0_301, %c0_302], %306 {strides = array<i32>} : memref<8x16x64xf32, #tpu.memory_space<vmem>>, vector<8x8x64xf32>,
    %cst_303 = arith.constant 0.000000e+00 : f32
    %308 = vector.broadcast %cst_303 : f32 to vector<48x64xf32>
    %c0_304 = arith.constant 0 : index
    %c0_305 = arith.constant 0 : index
    %c0_306 = arith.constant 0 : index
    %309 = vector.load %arg12[%c0_304, %c0_305, %c0_306] : memref<8x16x64xf32, #tpu.memory_space<vmem>>, vector<6x8x64xf32>
    %310 = vector.shape_cast %309 : vector<6x8x64xf32> to vector<48x64xf32>
    %311 = arith.truncf %310 : vector<48x64xf32> to vector<48x64xbf16>
    %c0_307 = arith.constant 0 : index
    %c0_308 = arith.constant 0 : index
    %c0_309 = arith.constant 0 : index
    %312 = vector.load %arg6[%c0_307, %c0_308, %c0_309] : memref<9x64x64xbf16, #tpu.memory_space<vmem>>, vector<1x64x64xbf16>
    %313 = vector.shape_cast %312 : vector<1x64x64xbf16> to vector<64x64xbf16>
    %cst_310 = arith.constant dense<0.000000e+00> : vector<48x64xf32>
    %314 = tpu.matmul %311, %313, %cst_310 {dimension_numbers = #tpu.dot_dimension_numbers<[1], [0], [0], [1], [0, 0, 1, 1], [], []>} : vector<48x64xbf16>, vector<64x64xbf16>, vector<48x64xf32> -> vector<48x64xf32>
    %315 = arith.addf %308, %314 : vector<48x64xf32>
    %c0_311 = arith.constant 0 : index
    %c1_312 = arith.constant 1 : index
    %c0_313 = arith.constant 0 : index
    %316 = vector.load %arg12[%c0_311, %c1_312, %c0_313] : memref<8x16x64xf32, #tpu.memory_space<vmem>>, vector<6x8x64xf32>
    %317 = vector.shape_cast %316 : vector<6x8x64xf32> to vector<48x64xf32>
    %318 = arith.truncf %317 : vector<48x64xf32> to vector<48x64xbf16>
    %c1_314 = arith.constant 1 : index
    %c0_315 = arith.constant 0 : index
    %c0_316 = arith.constant 0 : index
    %319 = vector.load %arg6[%c1_314, %c0_315, %c0_316] : memref<9x64x64xbf16, #tpu.memory_space<vmem>>, vector<1x64x64xbf16>
    %320 = vector.shape_cast %319 : vector<1x64x64xbf16> to vector<64x64xbf16>
    %cst_317 = arith.constant dense<0.000000e+00> : vector<48x64xf32>
    %321 = tpu.matmul %318, %320, %cst_317 {dimension_numbers = #tpu.dot_dimension_numbers<[1], [0], [0], [1], [0, 0, 1, 1], [], []>} : vector<48x64xbf16>, vector<64x64xbf16>, vector<48x64xf32> -> vector<48x64xf32>
    %322 = arith.addf %315, %321 : vector<48x64xf32>
    %c0_318 = arith.constant 0 : index
    %c2_319 = arith.constant 2 : index
    %c0_320 = arith.constant 0 : index
    %323 = vector.load %arg12[%c0_318, %c2_319, %c0_320] : memref<8x16x64xf32, #tpu.memory_space<vmem>>, vector<6x8x64xf32>
    %324 = vector.shape_cast %323 : vector<6x8x64xf32> to vector<48x64xf32>
    %325 = arith.truncf %324 : vector<48x64xf32> to vector<48x64xbf16>
    %c2_321 = arith.constant 2 : index
    %c0_322 = arith.constant 0 : index
    %c0_323 = arith.constant 0 : index
    %326 = vector.load %arg6[%c2_321, %c0_322, %c0_323] : memref<9x64x64xbf16, #tpu.memory_space<vmem>>, vector<1x64x64xbf16>
    %327 = vector.shape_cast %326 : vector<1x64x64xbf16> to vector<64x64xbf16>
    %cst_324 = arith.constant dense<0.000000e+00> : vector<48x64xf32>
    %328 = tpu.matmul %325, %327, %cst_324 {dimension_numbers = #tpu.dot_dimension_numbers<[1], [0], [0], [1], [0, 0, 1, 1], [], []>} : vector<48x64xbf16>, vector<64x64xbf16>, vector<48x64xf32> -> vector<48x64xf32>
    %329 = arith.addf %322, %328 : vector<48x64xf32>
    %c1_325 = arith.constant 1 : index
    %c0_326 = arith.constant 0 : index
    %c0_327 = arith.constant 0 : index
    %330 = vector.load %arg12[%c1_325, %c0_326, %c0_327] : memref<8x16x64xf32, #tpu.memory_space<vmem>>, vector<6x8x64xf32>
    %331 = vector.shape_cast %330 : vector<6x8x64xf32> to vector<48x64xf32>
    %332 = arith.truncf %331 : vector<48x64xf32> to vector<48x64xbf16>
    %c3_328 = arith.constant 3 : index
    %c0_329 = arith.constant 0 : index
    %c0_330 = arith.constant 0 : index
    %333 = vector.load %arg6[%c3_328, %c0_329, %c0_330] : memref<9x64x64xbf16, #tpu.memory_space<vmem>>, vector<1x64x64xbf16>
    %334 = vector.shape_cast %333 : vector<1x64x64xbf16> to vector<64x64xbf16>
    %cst_331 = arith.constant dense<0.000000e+00> : vector<48x64xf32>
    %335 = tpu.matmul %332, %334, %cst_331 {dimension_numbers = #tpu.dot_dimension_numbers<[1], [0], [0], [1], [0, 0, 1, 1], [], []>} : vector<48x64xbf16>, vector<64x64xbf16>, vector<48x64xf32> -> vector<48x64xf32>
    %336 = arith.addf %329, %335 : vector<48x64xf32>
    %c1_332 = arith.constant 1 : index
    %c1_333 = arith.constant 1 : index
    %c0_334 = arith.constant 0 : index
    %337 = vector.load %arg12[%c1_332, %c1_333, %c0_334] : memref<8x16x64xf32, #tpu.memory_space<vmem>>, vector<6x8x64xf32>
    %338 = vector.shape_cast %337 : vector<6x8x64xf32> to vector<48x64xf32>
    %339 = arith.truncf %338 : vector<48x64xf32> to vector<48x64xbf16>
    %c4_335 = arith.constant 4 : index
    %c0_336 = arith.constant 0 : index
    %c0_337 = arith.constant 0 : index
    %340 = vector.load %arg6[%c4_335, %c0_336, %c0_337] : memref<9x64x64xbf16, #tpu.memory_space<vmem>>, vector<1x64x64xbf16>
    %341 = vector.shape_cast %340 : vector<1x64x64xbf16> to vector<64x64xbf16>
    %cst_338 = arith.constant dense<0.000000e+00> : vector<48x64xf32>
    %342 = tpu.matmul %339, %341, %cst_338 {dimension_numbers = #tpu.dot_dimension_numbers<[1], [0], [0], [1], [0, 0, 1, 1], [], []>} : vector<48x64xbf16>, vector<64x64xbf16>, vector<48x64xf32> -> vector<48x64xf32>
    %343 = arith.addf %336, %342 : vector<48x64xf32>
    %c1_339 = arith.constant 1 : index
    %c2_340 = arith.constant 2 : index
    %c0_341 = arith.constant 0 : index
    %344 = vector.load %arg12[%c1_339, %c2_340, %c0_341] : memref<8x16x64xf32, #tpu.memory_space<vmem>>, vector<6x8x64xf32>
    %345 = vector.shape_cast %344 : vector<6x8x64xf32> to vector<48x64xf32>
    %346 = arith.truncf %345 : vector<48x64xf32> to vector<48x64xbf16>
    %c5_342 = arith.constant 5 : index
    %c0_343 = arith.constant 0 : index
    %c0_344 = arith.constant 0 : index
    %347 = vector.load %arg6[%c5_342, %c0_343, %c0_344] : memref<9x64x64xbf16, #tpu.memory_space<vmem>>, vector<1x64x64xbf16>
    %348 = vector.shape_cast %347 : vector<1x64x64xbf16> to vector<64x64xbf16>
    %cst_345 = arith.constant dense<0.000000e+00> : vector<48x64xf32>
    %349 = tpu.matmul %346, %348, %cst_345 {dimension_numbers = #tpu.dot_dimension_numbers<[1], [0], [0], [1], [0, 0, 1, 1], [], []>} : vector<48x64xbf16>, vector<64x64xbf16>, vector<48x64xf32> -> vector<48x64xf32>
    %350 = arith.addf %343, %349 : vector<48x64xf32>
    %c2_346 = arith.constant 2 : index
    %c0_347 = arith.constant 0 : index
    %c0_348 = arith.constant 0 : index
    %351 = vector.load %arg12[%c2_346, %c0_347, %c0_348] : memref<8x16x64xf32, #tpu.memory_space<vmem>>, vector<6x8x64xf32>
    %352 = vector.shape_cast %351 : vector<6x8x64xf32> to vector<48x64xf32>
    %353 = arith.truncf %352 : vector<48x64xf32> to vector<48x64xbf16>
    %c6_349 = arith.constant 6 : index
    %c0_350 = arith.constant 0 : index
    %c0_351 = arith.constant 0 : index
    %354 = vector.load %arg6[%c6_349, %c0_350, %c0_351] : memref<9x64x64xbf16, #tpu.memory_space<vmem>>, vector<1x64x64xbf16>
    %355 = vector.shape_cast %354 : vector<1x64x64xbf16> to vector<64x64xbf16>
    %cst_352 = arith.constant dense<0.000000e+00> : vector<48x64xf32>
    %356 = tpu.matmul %353, %355, %cst_352 {dimension_numbers = #tpu.dot_dimension_numbers<[1], [0], [0], [1], [0, 0, 1, 1], [], []>} : vector<48x64xbf16>, vector<64x64xbf16>, vector<48x64xf32> -> vector<48x64xf32>
    %357 = arith.addf %350, %356 : vector<48x64xf32>
    %c2_353 = arith.constant 2 : index
    %c1_354 = arith.constant 1 : index
    %c0_355 = arith.constant 0 : index
    %358 = vector.load %arg12[%c2_353, %c1_354, %c0_355] : memref<8x16x64xf32, #tpu.memory_space<vmem>>, vector<6x8x64xf32>
    %359 = vector.shape_cast %358 : vector<6x8x64xf32> to vector<48x64xf32>
    %360 = arith.truncf %359 : vector<48x64xf32> to vector<48x64xbf16>
    %c7_356 = arith.constant 7 : index
    %c0_357 = arith.constant 0 : index
    %c0_358 = arith.constant 0 : index
    %361 = vector.load %arg6[%c7_356, %c0_357, %c0_358] : memref<9x64x64xbf16, #tpu.memory_space<vmem>>, vector<1x64x64xbf16>
    %362 = vector.shape_cast %361 : vector<1x64x64xbf16> to vector<64x64xbf16>
    %cst_359 = arith.constant dense<0.000000e+00> : vector<48x64xf32>
    %363 = tpu.matmul %360, %362, %cst_359 {dimension_numbers = #tpu.dot_dimension_numbers<[1], [0], [0], [1], [0, 0, 1, 1], [], []>} : vector<48x64xbf16>, vector<64x64xbf16>, vector<48x64xf32> -> vector<48x64xf32>
    %364 = arith.addf %357, %363 : vector<48x64xf32>
    %c2_360 = arith.constant 2 : index
    %c2_361 = arith.constant 2 : index
    %c0_362 = arith.constant 0 : index
    %365 = vector.load %arg12[%c2_360, %c2_361, %c0_362] : memref<8x16x64xf32, #tpu.memory_space<vmem>>, vector<6x8x64xf32>
    %366 = vector.shape_cast %365 : vector<6x8x64xf32> to vector<48x64xf32>
    %367 = arith.truncf %366 : vector<48x64xf32> to vector<48x64xbf16>
    %c8_363 = arith.constant 8 : index
    %c0_364 = arith.constant 0 : index
    %c0_365 = arith.constant 0 : index
    %368 = vector.load %arg6[%c8_363, %c0_364, %c0_365] : memref<9x64x64xbf16, #tpu.memory_space<vmem>>, vector<1x64x64xbf16>
    %369 = vector.shape_cast %368 : vector<1x64x64xbf16> to vector<64x64xbf16>
    %cst_366 = arith.constant dense<0.000000e+00> : vector<48x64xf32>
    %370 = tpu.matmul %367, %369, %cst_366 {dimension_numbers = #tpu.dot_dimension_numbers<[1], [0], [0], [1], [0, 0, 1, 1], [], []>} : vector<48x64xbf16>, vector<64x64xbf16>, vector<48x64xf32> -> vector<48x64xf32>
    %371 = arith.addf %364, %370 : vector<48x64xf32>
    %c0_367 = arith.constant 0 : index
    %c0_368 = arith.constant 0 : index
    %372 = vector.load %arg7[%c0_367, %c0_368] : memref<1x64xf32, #tpu.memory_space<vmem>>, vector<1x64xf32>
    %373 = vector.broadcast %372 : vector<1x64xf32> to vector<48x64xf32>
    %374 = arith.addf %371, %373 : vector<48x64xf32>
    %cst_369 = arith.constant 0.000000e+00 : f32
    %375 = vector.broadcast %cst_369 : f32 to vector<48x64xf32>
    %376 = arith.maximumf %374, %375 : vector<48x64xf32>
    %c0_370 = arith.constant 0 : index
    %c0_371 = arith.constant 0 : index
    %377 = vector.load %arg13[%c0_370, %c0_371] : memref<48x64xf32, #tpu.memory_space<vmem>>, vector<48x64xf32>
    tpu.vector_store %arg13[%c0_370, %c0_371], %376 {strides = array<i32>} : memref<48x64xf32, #tpu.memory_space<vmem>>, vector<48x64xf32>,
    %cst_372 = arith.constant 0.000000e+00 : f32
    %378 = vector.broadcast %cst_372 : f32 to vector<1x32xf32>
    %c0_373 = arith.constant 0 : index
    %c0_374 = arith.constant 0 : index
    %379 = vector.load %arg13[%c0_373, %c0_374] : memref<48x64xf32, #tpu.memory_space<vmem>>, vector<1x64xf32>
    %380 = arith.truncf %379 : vector<1x64xf32> to vector<1x64xbf16>
    %c0_375 = arith.constant 0 : index
    %c0_376 = arith.constant 0 : index
    %c0_377 = arith.constant 0 : index
    %381 = vector.load %arg8[%c0_375, %c0_376, %c0_377] : memref<16x64x32xbf16, #tpu.memory_space<vmem>>, vector<1x64x32xbf16>
    %382 = vector.shape_cast %381 : vector<1x64x32xbf16> to vector<64x32xbf16>
    %cst_378 = arith.constant dense<0.000000e+00> : vector<1x32xf32>
    %383 = tpu.matmul %380, %382, %cst_378 {dimension_numbers = #tpu.dot_dimension_numbers<[1], [0], [0], [1], [0, 0, 1, 1], [], []>} : vector<1x64xbf16>, vector<64x32xbf16>, vector<1x32xf32> -> vector<1x32xf32>
    %384 = arith.addf %378, %383 : vector<1x32xf32>
    %c1_379 = arith.constant 1 : index
    %c0_380 = arith.constant 0 : index
    %385 = vector.load %arg13[%c1_379, %c0_380] : memref<48x64xf32, #tpu.memory_space<vmem>>, vector<1x64xf32>
    %386 = arith.truncf %385 : vector<1x64xf32> to vector<1x64xbf16>
    %c1_381 = arith.constant 1 : index
    %c0_382 = arith.constant 0 : index
    %c0_383 = arith.constant 0 : index
    %387 = vector.load %arg8[%c1_381, %c0_382, %c0_383] : memref<16x64x32xbf16, #tpu.memory_space<vmem>>, vector<1x64x32xbf16>
    %388 = vector.shape_cast %387 : vector<1x64x32xbf16> to vector<64x32xbf16>
    %cst_384 = arith.constant dense<0.000000e+00> : vector<1x32xf32>
    %389 = tpu.matmul %386, %388, %cst_384 {dimension_numbers = #tpu.dot_dimension_numbers<[1], [0], [0], [1], [0, 0, 1, 1], [], []>} : vector<1x64xbf16>, vector<64x32xbf16>, vector<1x32xf32> -> vector<1x32xf32>
    %390 = arith.addf %384, %389 : vector<1x32xf32>
    %c2_385 = arith.constant 2 : index
    %c0_386 = arith.constant 0 : index
    %391 = vector.load %arg13[%c2_385, %c0_386] : memref<48x64xf32, #tpu.memory_space<vmem>>, vector<1x64xf32>
    %392 = arith.truncf %391 : vector<1x64xf32> to vector<1x64xbf16>
    %c2_387 = arith.constant 2 : index
    %c0_388 = arith.constant 0 : index
    %c0_389 = arith.constant 0 : index
    %393 = vector.load %arg8[%c2_387, %c0_388, %c0_389] : memref<16x64x32xbf16, #tpu.memory_space<vmem>>, vector<1x64x32xbf16>
    %394 = vector.shape_cast %393 : vector<1x64x32xbf16> to vector<64x32xbf16>
    %cst_390 = arith.constant dense<0.000000e+00> : vector<1x32xf32>
    %395 = tpu.matmul %392, %394, %cst_390 {dimension_numbers = #tpu.dot_dimension_numbers<[1], [0], [0], [1], [0, 0, 1, 1], [], []>} : vector<1x64xbf16>, vector<64x32xbf16>, vector<1x32xf32> -> vector<1x32xf32>
    %396 = arith.addf %390, %395 : vector<1x32xf32>
    %c3_391 = arith.constant 3 : index
    %c0_392 = arith.constant 0 : index
    %397 = vector.load %arg13[%c3_391, %c0_392] : memref<48x64xf32, #tpu.memory_space<vmem>>, vector<1x64xf32>
    %398 = arith.truncf %397 : vector<1x64xf32> to vector<1x64xbf16>
    %c3_393 = arith.constant 3 : index
    %c0_394 = arith.constant 0 : index
    %c0_395 = arith.constant 0 : index
    %399 = vector.load %arg8[%c3_393, %c0_394, %c0_395] : memref<16x64x32xbf16, #tpu.memory_space<vmem>>, vector<1x64x32xbf16>
    %400 = vector.shape_cast %399 : vector<1x64x32xbf16> to vector<64x32xbf16>
    %cst_396 = arith.constant dense<0.000000e+00> : vector<1x32xf32>
    %401 = tpu.matmul %398, %400, %cst_396 {dimension_numbers = #tpu.dot_dimension_numbers<[1], [0], [0], [1], [0, 0, 1, 1], [], []>} : vector<1x64xbf16>, vector<64x32xbf16>, vector<1x32xf32> -> vector<1x32xf32>
    %402 = arith.addf %396, %401 : vector<1x32xf32>
    %c8_397 = arith.constant 8 : index
    %c0_398 = arith.constant 0 : index
    %403 = vector.load %arg13[%c8_397, %c0_398] : memref<48x64xf32, #tpu.memory_space<vmem>>, vector<1x64xf32>
    %404 = arith.truncf %403 : vector<1x64xf32> to vector<1x64xbf16>
    %c4_399 = arith.constant 4 : index
    %c0_400 = arith.constant 0 : index
    %c0_401 = arith.constant 0 : index
    %405 = vector.load %arg8[%c4_399, %c0_400, %c0_401] : memref<16x64x32xbf16, #tpu.memory_space<vmem>>, vector<1x64x32xbf16>
    %406 = vector.shape_cast %405 : vector<1x64x32xbf16> to vector<64x32xbf16>
    %cst_402 = arith.constant dense<0.000000e+00> : vector<1x32xf32>
    %407 = tpu.matmul %404, %406, %cst_402 {dimension_numbers = #tpu.dot_dimension_numbers<[1], [0], [0], [1], [0, 0, 1, 1], [], []>} : vector<1x64xbf16>, vector<64x32xbf16>, vector<1x32xf32> -> vector<1x32xf32>
    %408 = arith.addf %402, %407 : vector<1x32xf32>
    %c9_403 = arith.constant 9 : index
    %c0_404 = arith.constant 0 : index
    %409 = vector.load %arg13[%c9_403, %c0_404] : memref<48x64xf32, #tpu.memory_space<vmem>>, vector<1x64xf32>
    %410 = arith.truncf %409 : vector<1x64xf32> to vector<1x64xbf16>
    %c5_405 = arith.constant 5 : index
    %c0_406 = arith.constant 0 : index
    %c0_407 = arith.constant 0 : index
    %411 = vector.load %arg8[%c5_405, %c0_406, %c0_407] : memref<16x64x32xbf16, #tpu.memory_space<vmem>>, vector<1x64x32xbf16>
    %412 = vector.shape_cast %411 : vector<1x64x32xbf16> to vector<64x32xbf16>
    %cst_408 = arith.constant dense<0.000000e+00> : vector<1x32xf32>
    %413 = tpu.matmul %410, %412, %cst_408 {dimension_numbers = #tpu.dot_dimension_numbers<[1], [0], [0], [1], [0, 0, 1, 1], [], []>} : vector<1x64xbf16>, vector<64x32xbf16>, vector<1x32xf32> -> vector<1x32xf32>
    %414 = arith.addf %408, %413 : vector<1x32xf32>
    %c10_409 = arith.constant 10 : index
    %c0_410 = arith.constant 0 : index
    %415 = vector.load %arg13[%c10_409, %c0_410] : memref<48x64xf32, #tpu.memory_space<vmem>>, vector<1x64xf32>
    %416 = arith.truncf %415 : vector<1x64xf32> to vector<1x64xbf16>
    %c6_411 = arith.constant 6 : index
    %c0_412 = arith.constant 0 : index
    %c0_413 = arith.constant 0 : index
    %417 = vector.load %arg8[%c6_411, %c0_412, %c0_413] : memref<16x64x32xbf16, #tpu.memory_space<vmem>>, vector<1x64x32xbf16>
    %418 = vector.shape_cast %417 : vector<1x64x32xbf16> to vector<64x32xbf16>
    %cst_414 = arith.constant dense<0.000000e+00> : vector<1x32xf32>
    %419 = tpu.matmul %416, %418, %cst_414 {dimension_numbers = #tpu.dot_dimension_numbers<[1], [0], [0], [1], [0, 0, 1, 1], [], []>} : vector<1x64xbf16>, vector<64x32xbf16>, vector<1x32xf32> -> vector<1x32xf32>
    %420 = arith.addf %414, %419 : vector<1x32xf32>
    %c11_415 = arith.constant 11 : index
    %c0_416 = arith.constant 0 : index
    %421 = vector.load %arg13[%c11_415, %c0_416] : memref<48x64xf32, #tpu.memory_space<vmem>>, vector<1x64xf32>
    %422 = arith.truncf %421 : vector<1x64xf32> to vector<1x64xbf16>
    %c7_417 = arith.constant 7 : index
    %c0_418 = arith.constant 0 : index
    %c0_419 = arith.constant 0 : index
    %423 = vector.load %arg8[%c7_417, %c0_418, %c0_419] : memref<16x64x32xbf16, #tpu.memory_space<vmem>>, vector<1x64x32xbf16>
    %424 = vector.shape_cast %423 : vector<1x64x32xbf16> to vector<64x32xbf16>
    %cst_420 = arith.constant dense<0.000000e+00> : vector<1x32xf32>
    %425 = tpu.matmul %422, %424, %cst_420 {dimension_numbers = #tpu.dot_dimension_numbers<[1], [0], [0], [1], [0, 0, 1, 1], [], []>} : vector<1x64xbf16>, vector<64x32xbf16>, vector<1x32xf32> -> vector<1x32xf32>
    %426 = arith.addf %420, %425 : vector<1x32xf32>
    %c16 = arith.constant 16 : index
    %c0_421 = arith.constant 0 : index
    %427 = vector.load %arg13[%c16, %c0_421] : memref<48x64xf32, #tpu.memory_space<vmem>>, vector<1x64xf32>
    %428 = arith.truncf %427 : vector<1x64xf32> to vector<1x64xbf16>
    %c8_422 = arith.constant 8 : index
    %c0_423 = arith.constant 0 : index
    %c0_424 = arith.constant 0 : index
    %429 = vector.load %arg8[%c8_422, %c0_423, %c0_424] : memref<16x64x32xbf16, #tpu.memory_space<vmem>>, vector<1x64x32xbf16>
    %430 = vector.shape_cast %429 : vector<1x64x32xbf16> to vector<64x32xbf16>
    %cst_425 = arith.constant dense<0.000000e+00> : vector<1x32xf32>
    %431 = tpu.matmul %428, %430, %cst_425 {dimension_numbers = #tpu.dot_dimension_numbers<[1], [0], [0], [1], [0, 0, 1, 1], [], []>} : vector<1x64xbf16>, vector<64x32xbf16>, vector<1x32xf32> -> vector<1x32xf32>
    %432 = arith.addf %426, %431 : vector<1x32xf32>
    %c17 = arith.constant 17 : index
    %c0_426 = arith.constant 0 : index
    %433 = vector.load %arg13[%c17, %c0_426] : memref<48x64xf32, #tpu.memory_space<vmem>>, vector<1x64xf32>
    %434 = arith.truncf %433 : vector<1x64xf32> to vector<1x64xbf16>
    %c9_427 = arith.constant 9 : index
    %c0_428 = arith.constant 0 : index
    %c0_429 = arith.constant 0 : index
    %435 = vector.load %arg8[%c9_427, %c0_428, %c0_429] : memref<16x64x32xbf16, #tpu.memory_space<vmem>>, vector<1x64x32xbf16>
    %436 = vector.shape_cast %435 : vector<1x64x32xbf16> to vector<64x32xbf16>
    %cst_430 = arith.constant dense<0.000000e+00> : vector<1x32xf32>
    %437 = tpu.matmul %434, %436, %cst_430 {dimension_numbers = #tpu.dot_dimension_numbers<[1], [0], [0], [1], [0, 0, 1, 1], [], []>} : vector<1x64xbf16>, vector<64x32xbf16>, vector<1x32xf32> -> vector<1x32xf32>
    %438 = arith.addf %432, %437 : vector<1x32xf32>
    %c18 = arith.constant 18 : index
    %c0_431 = arith.constant 0 : index
    %439 = vector.load %arg13[%c18, %c0_431] : memref<48x64xf32, #tpu.memory_space<vmem>>, vector<1x64xf32>
    %440 = arith.truncf %439 : vector<1x64xf32> to vector<1x64xbf16>
    %c10_432 = arith.constant 10 : index
    %c0_433 = arith.constant 0 : index
    %c0_434 = arith.constant 0 : index
    %441 = vector.load %arg8[%c10_432, %c0_433, %c0_434] : memref<16x64x32xbf16, #tpu.memory_space<vmem>>, vector<1x64x32xbf16>
    %442 = vector.shape_cast %441 : vector<1x64x32xbf16> to vector<64x32xbf16>
    %cst_435 = arith.constant dense<0.000000e+00> : vector<1x32xf32>
    %443 = tpu.matmul %440, %442, %cst_435 {dimension_numbers = #tpu.dot_dimension_numbers<[1], [0], [0], [1], [0, 0, 1, 1], [], []>} : vector<1x64xbf16>, vector<64x32xbf16>, vector<1x32xf32> -> vector<1x32xf32>
    %444 = arith.addf %438, %443 : vector<1x32xf32>
    %c19 = arith.constant 19 : index
    %c0_436 = arith.constant 0 : index
    %445 = vector.load %arg13[%c19, %c0_436] : memref<48x64xf32, #tpu.memory_space<vmem>>, vector<1x64xf32>
    %446 = arith.truncf %445 : vector<1x64xf32> to vector<1x64xbf16>
    %c11_437 = arith.constant 11 : index
    %c0_438 = arith.constant 0 : index
    %c0_439 = arith.constant 0 : index
    %447 = vector.load %arg8[%c11_437, %c0_438, %c0_439] : memref<16x64x32xbf16, #tpu.memory_space<vmem>>, vector<1x64x32xbf16>
    %448 = vector.shape_cast %447 : vector<1x64x32xbf16> to vector<64x32xbf16>
    %cst_440 = arith.constant dense<0.000000e+00> : vector<1x32xf32>
    %449 = tpu.matmul %446, %448, %cst_440 {dimension_numbers = #tpu.dot_dimension_numbers<[1], [0], [0], [1], [0, 0, 1, 1], [], []>} : vector<1x64xbf16>, vector<64x32xbf16>, vector<1x32xf32> -> vector<1x32xf32>
    %450 = arith.addf %444, %449 : vector<1x32xf32>
    %c24 = arith.constant 24 : index
    %c0_441 = arith.constant 0 : index
    %451 = vector.load %arg13[%c24, %c0_441] : memref<48x64xf32, #tpu.memory_space<vmem>>, vector<1x64xf32>
    %452 = arith.truncf %451 : vector<1x64xf32> to vector<1x64xbf16>
    %c12_442 = arith.constant 12 : index
    %c0_443 = arith.constant 0 : index
    %c0_444 = arith.constant 0 : index
    %453 = vector.load %arg8[%c12_442, %c0_443, %c0_444] : memref<16x64x32xbf16, #tpu.memory_space<vmem>>, vector<1x64x32xbf16>
    %454 = vector.shape_cast %453 : vector<1x64x32xbf16> to vector<64x32xbf16>
    %cst_445 = arith.constant dense<0.000000e+00> : vector<1x32xf32>
    %455 = tpu.matmul %452, %454, %cst_445 {dimension_numbers = #tpu.dot_dimension_numbers<[1], [0], [0], [1], [0, 0, 1, 1], [], []>} : vector<1x64xbf16>, vector<64x32xbf16>, vector<1x32xf32> -> vector<1x32xf32>
    %456 = arith.addf %450, %455 : vector<1x32xf32>
    %c25 = arith.constant 25 : index
    %c0_446 = arith.constant 0 : index
    %457 = vector.load %arg13[%c25, %c0_446] : memref<48x64xf32, #tpu.memory_space<vmem>>, vector<1x64xf32>
    %458 = arith.truncf %457 : vector<1x64xf32> to vector<1x64xbf16>
    %c13_447 = arith.constant 13 : index
    %c0_448 = arith.constant 0 : index
    %c0_449 = arith.constant 0 : index
    %459 = vector.load %arg8[%c13_447, %c0_448, %c0_449] : memref<16x64x32xbf16, #tpu.memory_space<vmem>>, vector<1x64x32xbf16>
    %460 = vector.shape_cast %459 : vector<1x64x32xbf16> to vector<64x32xbf16>
    %cst_450 = arith.constant dense<0.000000e+00> : vector<1x32xf32>
    %461 = tpu.matmul %458, %460, %cst_450 {dimension_numbers = #tpu.dot_dimension_numbers<[1], [0], [0], [1], [0, 0, 1, 1], [], []>} : vector<1x64xbf16>, vector<64x32xbf16>, vector<1x32xf32> -> vector<1x32xf32>
    %462 = arith.addf %456, %461 : vector<1x32xf32>
    %c26 = arith.constant 26 : index
    %c0_451 = arith.constant 0 : index
    %463 = vector.load %arg13[%c26, %c0_451] : memref<48x64xf32, #tpu.memory_space<vmem>>, vector<1x64xf32>
    %464 = arith.truncf %463 : vector<1x64xf32> to vector<1x64xbf16>
    %c14_452 = arith.constant 14 : index
    %c0_453 = arith.constant 0 : index
    %c0_454 = arith.constant 0 : index
    %465 = vector.load %arg8[%c14_452, %c0_453, %c0_454] : memref<16x64x32xbf16, #tpu.memory_space<vmem>>, vector<1x64x32xbf16>
    %466 = vector.shape_cast %465 : vector<1x64x32xbf16> to vector<64x32xbf16>
    %cst_455 = arith.constant dense<0.000000e+00> : vector<1x32xf32>
    %467 = tpu.matmul %464, %466, %cst_455 {dimension_numbers = #tpu.dot_dimension_numbers<[1], [0], [0], [1], [0, 0, 1, 1], [], []>} : vector<1x64xbf16>, vector<64x32xbf16>, vector<1x32xf32> -> vector<1x32xf32>
    %468 = arith.addf %462, %467 : vector<1x32xf32>
    %c27 = arith.constant 27 : index
    %c0_456 = arith.constant 0 : index
    %469 = vector.load %arg13[%c27, %c0_456] : memref<48x64xf32, #tpu.memory_space<vmem>>, vector<1x64xf32>
    %470 = arith.truncf %469 : vector<1x64xf32> to vector<1x64xbf16>
    %c15_457 = arith.constant 15 : index
    %c0_458 = arith.constant 0 : index
    %c0_459 = arith.constant 0 : index
    %471 = vector.load %arg8[%c15_457, %c0_458, %c0_459] : memref<16x64x32xbf16, #tpu.memory_space<vmem>>, vector<1x64x32xbf16>
    %472 = vector.shape_cast %471 : vector<1x64x32xbf16> to vector<64x32xbf16>
    %cst_460 = arith.constant dense<0.000000e+00> : vector<1x32xf32>
    %473 = tpu.matmul %470, %472, %cst_460 {dimension_numbers = #tpu.dot_dimension_numbers<[1], [0], [0], [1], [0, 0, 1, 1], [], []>} : vector<1x64xbf16>, vector<64x32xbf16>, vector<1x32xf32> -> vector<1x32xf32>
    %474 = arith.addf %468, %473 : vector<1x32xf32>
    %c0_461 = arith.constant 0 : index
    %c0_462 = arith.constant 0 : index
    %475 = vector.load %arg9[%c0_461, %c0_462] : memref<1x32xf32, #tpu.memory_space<vmem>>, vector<1x32xf32>
    %476 = arith.addf %474, %475 : vector<1x32xf32>
    %cst_463 = arith.constant 0.000000e+00 : f32
    %477 = vector.broadcast %cst_463 : f32 to vector<1x32xf32>
    %478 = arith.maximumf %476, %477 : vector<1x32xf32>
    %479 = vector.shape_cast %478 : vector<1x32xf32> to vector<1x1x32xf32>
    %c0_464 = arith.constant 0 : index
    %c0_465 = arith.constant 0 : index
    %c0_466 = arith.constant 0 : index
    %480 = vector.load %arg10[%c0_464, %c0_465, %c0_466] : memref<1x1x32xf32, #tpu.memory_space<vmem>>, vector<1x1x32xf32>
    tpu.vector_store %arg10[%c0_464, %c0_465, %c0_466], %479 {strides = array<i32>} : memref<1x1x32xf32, #tpu.memory_space<vmem>>, vector<1x1x32xf32>,
    return
  }
  func.func @transform_0(%arg0: i32) -> (i32, i32, i32, i32, i32) {
    %c0_i32 = arith.constant 0 : i32
    %c0_i32_0 = arith.constant 0 : i32
    %c0_i32_1 = arith.constant 0 : i32
    %c0_i32_2 = arith.constant 0 : i32
    %c0_i32_3 = arith.constant 0 : i32
    return %arg0, %c0_i32, %c0_i32_0, %c0_i32_1, %c0_i32_2 : i32, i32, i32, i32, i32
  }
  func.func @transform_1(%arg0: i32) -> (i32, i32, i32) {
    %c0_i32 = arith.constant 0 : i32
    %c0_i32_0 = arith.constant 0 : i32
    %c0_i32_1 = arith.constant 0 : i32
    %c0_i32_2 = arith.constant 0 : i32
    return %c0_i32, %c0_i32_0, %c0_i32_1 : i32, i32, i32
  }
  func.func @transform_2(%arg0: i32) -> (i32, i32) {
    %c0_i32 = arith.constant 0 : i32
    %c0_i32_0 = arith.constant 0 : i32
    %c0_i32_1 = arith.constant 0 : i32
    return %c0_i32, %c0_i32_0 : i32, i32
  }
  func.func @transform_3(%arg0: i32) -> (i32, i32, i32) {
    %c0_i32 = arith.constant 0 : i32
    %c0_i32_0 = arith.constant 0 : i32
    %c0_i32_1 = arith.constant 0 : i32
    %c0_i32_2 = arith.constant 0 : i32
    return %c0_i32, %c0_i32_0, %c0_i32_1 : i32, i32, i32
  }
  func.func @transform_4(%arg0: i32) -> (i32, i32) {
    %c0_i32 = arith.constant 0 : i32
    %c0_i32_0 = arith.constant 0 : i32
    %c0_i32_1 = arith.constant 0 : i32
    return %c0_i32, %c0_i32_0 : i32, i32
  }
  func.func @transform_5(%arg0: i32) -> (i32, i32, i32) {
    %c0_i32 = arith.constant 0 : i32
    %c0_i32_0 = arith.constant 0 : i32
    %c0_i32_1 = arith.constant 0 : i32
    %c0_i32_2 = arith.constant 0 : i32
    return %c0_i32, %c0_i32_0, %c0_i32_1 : i32, i32, i32
  }
  func.func @transform_6(%arg0: i32) -> (i32, i32) {
    %c0_i32 = arith.constant 0 : i32
    %c0_i32_0 = arith.constant 0 : i32
    %c0_i32_1 = arith.constant 0 : i32
    return %c0_i32, %c0_i32_0 : i32, i32
  }
  func.func @transform_7(%arg0: i32) -> (i32, i32, i32) {
    %c0_i32 = arith.constant 0 : i32
    %c0_i32_0 = arith.constant 0 : i32
    %c0_i32_1 = arith.constant 0 : i32
    %c0_i32_2 = arith.constant 0 : i32
    return %c0_i32, %c0_i32_0, %c0_i32_1 : i32, i32, i32
  }
  func.func @transform_8(%arg0: i32) -> (i32, i32) {
    %c0_i32 = arith.constant 0 : i32
    %c0_i32_0 = arith.constant 0 : i32
    %c0_i32_1 = arith.constant 0 : i32
    return %c0_i32, %c0_i32_0 : i32, i32
  }
  func.func @transform_9(%arg0: i32) -> (i32, i32, i32) {
    %c0_i32 = arith.constant 0 : i32
    %c0_i32_0 = arith.constant 0 : i32
    %c0_i32_1 = arith.constant 0 : i32
    return %arg0, %c0_i32, %c0_i32_0 : i32, i32, i32
  }
}

</mosaic_0001>

<bundles_post_ra>
// kernel: encoder_forward.1
= control target key start
LH: loop header
LB: loop body
LE: loop exit
PB: predicated region body
PF: predicated region fallthrough
CT: control target
= control target key end

     0   :  { %14 = vsyncpa [#allocation6], 0  ;;  %s11003_s0 = inlined_call_operand.vmem [shape: f32[2,4,9,9,48], index: 0, kind: input, shape index: {}]   ;;  %s11004_s1 = inlined_call_operand.vmem [shape: bf16[4,48,32], index: 1, kind: input, shape index: {}]   ;;  %s11005_s2 = inlined_call_operand.vmem [shape: f32[1,32], index: 2, kind: input, shape index: {}]   ;;  %s11006_s3 = inlined_call_operand.vmem [shape: bf16[16,32,64], index: 3, kind: input, shape index: {}]   ;;  %s11007_s4 = inlined_call_operand.vmem [shape: f32[1,64], index: 4, kind: input, shape index: {}]   ;;  %s11008_s5 = inlined_call_operand.vmem [shape: bf16[9,64,64], index: 5, kind: input, shape index: {}]   ;;  %s11009_s6 = inlined_call_operand.vmem [shape: f32[1,64], index: 6, kind: input, shape index: {}]   ;;  %s11010_s7 = inlined_call_operand.vmem [shape: bf16[16,64,32], index: 7, kind: input, shape index: {}]   ;;  %s11011_s8 = inlined_call_operand.vmem [shape: f32[1,32], index: 8, kind: input, shape index: {}]   ;;  %s11012_s9 = inlined_call_operand.hbm [shape: f32[2,1,32], index: 9, kind: output, shape index: {}]  }
   0x1   :  { %16 = vsyncpa [#allocation6 + $0x1], 0  ;;  %s9132_s30 = smov 0   ;;  %s9134_s10 = smov 0  }
   0x2   :  { %s9136_s11 = smov 0   ;;  %s9138_s12 = smov 0  }
   0x3 LB: > { %s9153_s13 = sadd.s32 4294967295, %s9077_s12   ;;  %s6645_s14 = sadd.s32 4294967294, %s9077_s12   ;;  %s9077_s12 = sphi %s9138_s12, %s11044_s12   ;;  %s9073_s11 = sphi %s9136_s11, %s11043_s11   ;;  %s9069_s10 = sphi %s9134_s10, %s11042_s10   ;;  %s9065_s30 = sphi %s9132_s30, %s11041_s30  }
   0x4   : > { %s9157_s15 = sadd.s32 1, %s9077_s12   ;;  %s223_s16 = sadd.s32 1, %s9073_s11 }
   0x5   : > { %s220_s17 = ssub.s32 %s9077_s12, %s9157_s15  ;;  %p233_p0 = scmp.ne.s32.totalorder %s9073_s11, %s9069_s10 }
   0x6   : > { %p221_p1 = scmp.eq.s32.totalorder %s220_s17, 0  ;;  %p234_p2 = scmp.eq.s32.totalorder %s9153_s13, 1 }
   0x7   : > { %p239_p3 = scmp.ne.s32.totalorder %s9069_s10, %s9065_s30  ;;  %p240_p4 = scmp.eq.s32.totalorder %s6645_s14, 1 }
   0x8   : > { %s9168_s18 = scalar_select %p221_p1, %s9073_s11, %s223_s16  }
   0x9   : > { %p9170_p5 = por %p234_p2, %p233_p0  ;;  %p9174_p6 = por %p240_p4, %p239_p3 }
   0xa   : > { %p6648_p7 = scmp.ge.s32.totalorder %s9077_s12, 1  ;;  %p290_p8 = scmp.lt.s32.totalorder %s9077_s12, 3 }
   0xc   : > { %p291_p9 = pnand %p6648_p7, %p290_p8 }
   0xd   : > { %v8835_v0 = vld [vmem:[%s11004_s1 + $0x18] sm:$0xff] (!%p291_p9)   ;;  %p325_p10 = scmp.lt.s32.totalorder (!%p291_p9), %s9153_s13, 1  ;;  %v8837_v2 = vld [vmem:[%s11004_s1 + $0x20] sm:$0xff] (!%p291_p9)   ;;  %v9197_v4 = vld [vmem:[%s11004_s1 + $0x28] sm:$0xff] (!%p291_p9)   ;;  %vm461_vm0 = vcmask (!%p291_p9), 392192   ;;  %vm331_vm1 = vcmask (!%p291_p9), 261120  }
   0xe   : > { %294 = sbr.rel (%p291_p9) target bundleno = 1561 (0x619), region = 56  ;;  %v8836_v1 = vld [vmem:[%s11004_s1 + $0x18] sm:$0xff] (!%p291_p9)   ;;  %7789 = vmatprep.subr.bf16.mxu0 (!%p291_p9), %v8835_v0  ;;  %v8838_v3 = vld [vmem:[%s11004_s1 + $0x20] sm:$0xff] (!%p291_p9)   ;;  %v9202_v5 = vld [vmem:[%s11004_s1 + $0x28] sm:$0xff] (!%p291_p9)   ;;  %v11013_v14 = vmov (!%p291_p9), 0.0   ;;  %vm333_vm2 = vcmask (!%p291_p9), 253952  }
   0xf   : > { %7845 = vmatprep.subr.bf16.mxu1 (!%p291_p9), %v8836_v1  ;;  %7790 = vmatpush3.bf16.msra.mxu0 (!%p291_p9), %v8835_v0  ;;  %v9212_v6 = vld [vmem:[%s11004_s1] sm:$0xff] (!%p291_p9)   ;;  %337 = vst.msk [vmem:[#allocation2 + $0x20] sm:$0xff] (!%p291_p9), %vm331_vm1, %v11013_v14  ;;  %332 = vst.msk [vmem:[#allocation2] sm:$0xff] (!%p291_p9), %vm331_vm1, %v11013_v14  ;;  %v8843_v23 = vld [vmem:[%s11004_s1 + $0x8] sm:$0xff] (!%p291_p9)   ;;  %vm4247_vm3 = vcmask (!%p291_p9), 523264   ;;  %vm9080_vm4 = vmmov (!%p291_p9), 0  }
  0x10   : > { %7846 = vmatpush3.bf16.msra.mxu1 (!%p291_p9), %v8836_v1  ;;  %7791 = vmatprep.subr.bf16.mxu0 (!%p291_p9), %v8837_v2  ;;  %335 = vst.msk [vmem:[#allocation2 + $0x10] sm:$0xff] (!%p291_p9), %vm331_vm1, %v11013_v14  ;;  %339 = vst.msk [vmem:[#allocation2 + $0x30] sm:$0xff] (!%p291_p9), %vm331_vm1, %v11013_v14  ;;  %v8842_v20 = vld [vmem:[%s11004_s1] sm:$0xff] (!%p291_p9)   ;;  %v8844_v24 = vld [vmem:[%s11004_s1 + $0x8] sm:$0xff] (!%p291_p9)   ;;  %s323_s23 = sand.u32 (!%p291_p9), 1, %s9069_s10   ;;  %s7435_s28 = sshll.u32 (!%p291_p9), %s9153_s13, 4 }
  0x11   : > { %7847 = vmatprep.subr.bf16.mxu1 (!%p291_p9), %v8838_v3  ;;  %341 = vst.msk [vmem:[#allocation2 + $0x40] sm:$0xff] (!%p291_p9), %vm331_vm1, %v11013_v14  ;;  %343 = vst.msk [vmem:[#allocation2 + $0x50] sm:$0xff] (!%p291_p9), %vm331_vm1, %v11013_v14  ;;  %v8845_v39 = vld [vmem:[%s11004_s1 + $0x10] sm:$0xff] (!%p291_p9)   ;;  %v8849_v57 = vld [vmem:[%s11004_s1 + $0x38] sm:$0xff] (!%p291_p9)  }
  0x12   : > { %345 = vst.msk [vmem:[#allocation2 + $0x60] sm:$0xff] (!%p291_p9), %vm331_vm1, %v11013_v14  ;;  %347 = vst.msk [vmem:[#allocation2 + $0x70] sm:$0xff] (!%p291_p9), %vm331_vm1, %v11013_v14  ;;  %v8846_v40 = vld [vmem:[%s11004_s1 + $0x10] sm:$0xff] (!%p291_p9)   ;;  %v8850_v58 = vld [vmem:[%s11004_s1 + $0x38] sm:$0xff] (!%p291_p9)  }
  0x13   : > { %7792 = vmatpush3.bf16.msra.mxu0 (!%p291_p9), %v8837_v2  ;;  %349 = vst.msk [vmem:[#allocation2 + $0x80] sm:$0xff] (!%p291_p9), %vm331_vm1, %v11013_v14  ;;  %351 = vst.msk [vmem:[#allocation2 + $0x90] sm:$0xff] (!%p291_p9), %vm331_vm1, %v11013_v14  ;;  %v8847_v49 = vld [vmem:[%s11004_s1 + $0x30] sm:$0xff] (!%p291_p9)   ;;  %v8851_v61 = vld [vmem:[%s11004_s1 + $0x40] sm:$0xff] (!%p291_p9)  }
  0x14   : > { %7848 = vmatpush3.bf16.msra.mxu1 (!%p291_p9), %v8838_v3  ;;  %7793 = vmatprep.subr.bf16.mxu0 (!%p291_p9), %v9197_v4  ;;  %353 = vst.msk [vmem:[#allocation2 + $0xa0] sm:$0xff] (!%p291_p9), %vm331_vm1, %v11013_v14  ;;  %355 = vst.msk [vmem:[#allocation2 + $0xb0] sm:$0xff] (!%p291_p9), %vm331_vm1, %v11013_v14  ;;  %v8848_v50 = vld [vmem:[%s11004_s1 + $0x30] sm:$0xff] (!%p291_p9)   ;;  %v8852_v62 = vld [vmem:[%s11004_s1 + $0x40] sm:$0xff] (!%p291_p9)  }
  0x15   : > { %s326_s27 = scalar_select %p325_p10, %s9153_s13, 1  ;;  %357 = vst.msk [vmem:[#allocation2 + $0xc0] sm:$0xff] %vm331_vm1, %v11013_v14  ;;  %359 = vst.msk [vmem:[#allocation2 + $0xd0] sm:$0xff] %vm331_vm1, %v11013_v14  ;;  %7849 = vmatprep.subr.bf16.mxu1 %v9202_v5 }
  0x16   : > { %361 = vst.msk [vmem:[#allocation2 + $0xe0] sm:$0xff] %vm331_vm1, %v11013_v14  ;;  %363 = vst.msk [vmem:[#allocation2 + $0xf0] sm:$0xff] %vm331_vm1, %v11013_v14  ;;  %s9081_s13 = smov [#allocation5]  }
  0x17   : > { %s8793_s17 = smul.u32 576, %s326_s27  ;;  %365 = vst.msk [vmem:[#allocation2 + $0x100] sm:$0xff] %vm331_vm1, %v11013_v14  ;;  %367 = vst.msk [vmem:[#allocation2 + $0x110] sm:$0xff] %vm331_vm1, %v11013_v14  ;;  %7794 = vmatpush3.bf16.msra.mxu0 %v9197_v4  ;;  %s324_s27 = scalar_lea.vmem [#allocation5], %s323_s23 }
  0x18   : > { %369 = vst.msk [vmem:[#allocation2 + $0x120] sm:$0xff] %vm331_vm1, %v11013_v14  ;;  %371 = vst.msk [vmem:[#allocation2 + $0x130] sm:$0xff] %vm331_vm1, %v11013_v14  ;;  %7850 = vmatpush3.bf16.msra.mxu1 %v9202_v5  ;;  %7803 = vmatprep.subr.bf16.mxu0 %v9212_v6  ;;  %s6590_s29 = sshll.u32 %s324_s27, 4  ;;  %s9019_s22 = sshll.u32 %s9081_s13, 4  ;;  %s10962_s29 = int_to_ptr.vmem [resolvable:$true] %s6590_s29  ;;  %s9020_s22 = int_to_ptr.vmem [resolvable:$false] %s9019_s22 }
  0x19   : > { %s9207_s25 = scalar_lea.vmem %s11003_s0, %s8793_s17  ;;  %373 = vst.msk [vmem:[#allocation2 + $0x140] sm:$0xff] %vm331_vm1, %v11013_v14  ;;  %375 = vst.msk [vmem:[#allocation2 + $0x150] sm:$0xff] %vm331_vm1, %v11013_v14  ;;  %7859 = vmatprep.subr.bf16.mxu1 %v8842_v20  ;;  %s10960_s17 = scalar_lea.hbm %s11012_s9, %s7435_s28 }
  0x1a   : > { %v6650_v7 = vld [vmem:[%s9207_s25 + $0x90] sm:$0xff]  ;;  %v6651_v8 = vld [vmem:[%s9207_s25 + $0xa0] sm:$0xff]  ;;  %377 = vst.msk [vmem:[#allocation2 + $0x160] sm:$0xff] %vm331_vm1, %v11013_v14  ;;  %379 = vst.msk [vmem:[#allocation2 + $0x170] sm:$0xff] %vm331_vm1, %v11013_v14  ;;  %s9015_s21 = scalar_lea.vmem %s10962_s29, 16  ;;  %s9021_s24 = scalar_lea.vmem %s9020_s22, 32 }
  0x1b   : > { %v929_v9 = vld [vmem:[%s9207_s25 + $0x1] sm:$0xff]  ;;  %v9218_v10 = vpack.c.bf16 %v6651_v8, %v6650_v7  ;;  %v9221_v11 = vld [vmem:[%s9207_s25 + $0x11] sm:$0xff]  ;;  %381 = vst.msk [vmem:[#allocation2 + $0x180] sm:$0xff] %vm331_vm1, %v11013_v14  ;;  %383 = vst.msk [vmem:[#allocation2 + $0x190] sm:$0xff] %vm331_vm1, %v11013_v14  ;;  %p9016_p11 = scmp.ne.s32.totalorder %s10962_s29, %s9015_s21  ;;  %p9022_p0 = scmp.lt.s32.totalorder %s10962_s29, %s9020_s22 }
  0x1c   : > { %v6652_v12 = vld [vmem:[%s9207_s25 + $0xb0] sm:$0xff]  ;;  %v6653_v13 = vld [vmem:[%s9207_s25 + $0xc0] sm:$0xff]  ;;  %385 = vst.msk [vmem:[#allocation2 + $0x1a0] sm:$0xff] %vm331_vm1, %v11013_v14  ;;  %387 = vst.msk [vmem:[#allocation2 + $0x1b0] sm:$0xff] %vm331_vm1, %v11013_v14  ;;  %v937_v15 = vpack.c.bf16 %v9221_v11, %v929_v9  ;;  %p9023_p1 = scmp.lt.s32.totalorder %s9021_s24, %s9015_s21 }
  0x1d   : > { %389 = vst.msk [vmem:[#allocation2 + $0x1c0] sm:$0xff] %vm331_vm1, %v11013_v14  ;;  %391 = vst.msk [vmem:[#allocation2 + $0x1d0] sm:$0xff] %vm331_vm1, %v11013_v14  ;;  %v9300_v16 = vld [vmem:[%s9207_s25 + $0x21] sm:$0xff]  ;;  %v9303_v17 = vld [vmem:[%s9207_s25 + $0x31] sm:$0xff]  ;;  %v9305_v18 = vpack.c.bf16 %v6652_v12, %v6651_v8  ;;  %7795 = vmatprep.mubr.msk.bf16.mxu0 %vm461_vm0, %v9218_v10  ;;  %v9309_v19 = vpack.c.bf16 %v6653_v13, %v6652_v12  ;;  %p9017_p12 = pnand %p9016_p11, %p9170_p5 }
  0x1e   : > { %393 = vst.msk [vmem:[#allocation2 + $0x1e0] sm:$0xff] %vm331_vm1, %v11013_v14  ;;  %395 = vst.msk [vmem:[#allocation2 + $0x1f0] sm:$0xff] %vm331_vm1, %v11013_v14  ;;  %v2268_v21 = vpack.c.bf16 %v9300_v16, %v9221_v11  ;;  %7851 = vmatprep.mubr.msk.bf16.mxu1 %vm461_vm0, %v937_v15  ;;  %v938_v22 = vpack.c.bf16 %v9303_v17, %v9300_v16  ;;  %v6654_v25 = vld [vmem:[%s9207_s25 + $0xd0] sm:$0xff]  ;;  %v6655_v26 = vld [vmem:[%s9207_s25 + $0xe0] sm:$0xff]  ;;  %p9024_p2 = por %p9023_p1, %p9022_p0 }
  0x1f   : > { %397 = vst.msk [vmem:[#allocation2 + $0x200] sm:$0xff] %vm331_vm1, %v11013_v14  ;;  %399 = vst.msk [vmem:[#allocation2 + $0x210] sm:$0xff] %vm331_vm1, %v11013_v14  ;;  %v9331_v27 = vld [vmem:[%s9207_s25 + $0x41] sm:$0xff]  ;;  %v9334_v28 = vld [vmem:[%s9207_s25 + $0x51] sm:$0xff]  ;;  %v9336_v29 = vpack.c.bf16 %v6654_v25, %v6653_v13  ;;  %7796 = vmatmul.mubr.msk.bf16.vlgmr.msra.gmra.mrb[0].mxu0 %vm461_vm0, %v9309_v19  ;;  %v434_v30 = vpack.c.bf16 %v6655_v26, %v6654_v25  ;;  %p9018_p13 = pneg %p9017_p12 }
  0x20   : > { %401 = vst.msk [vmem:[#allocation2 + $0x220] sm:$0xff] %vm331_vm1, %v11013_v14  ;;  %403 = vst.msk [vmem:[#allocation2 + $0x230] sm:$0xff] %vm331_vm1, %v11013_v14  ;;  %v939_v31 = vpack.c.bf16 %v9334_v28, %v9331_v27  ;;  %v6656_v32 = vld [vmem:[%s9207_s25 + $0xf0] sm:$0xff]  ;;  %v9344_v33 = vld [vmem:[%s9207_s25 + $0x100] sm:$0xff]  ;;  %v2269_v35 = vpack.c.bf16 %v9331_v27, %v9303_v17  ;;  %7852 = vmatmul.mubr.msk.bf16.vlgmr.msra.gmra.mrb[0].mxu1 %vm461_vm0, %v938_v22  ;;  %7804 = vmatpush3.bf16.msra.mxu0 %v9212_v6 }
  0x21   : > { %v9347_v34 = vld [vmem:[%s9207_s25 + $0x61] sm:$0xff]  ;;  %v9354_v36 = vld [vmem:[%s9207_s25 + $0x71] sm:$0xff]  ;;  %v9356_v37 = vpack.c.bf16 %v6656_v32, %v6655_v26  ;;  %7860 = vmatpush3.bf16.msra.mxu1 %v8842_v20  ;;  %7805 = vmatprep.subr.bf16.mxu0 %v8843_v23  ;;  %v435_v43 = vpack.c.bf16 %v9344_v33, %v6656_v32  ;;  %334 = vst.msk [vmem:[#allocation2 + $0x8] sm:$0x1] %vm333_vm2, %v11013_v14  ;;  %336 = vst.msk [vmem:[#allocation2 + $0x18] sm:$0x1] %vm333_vm2, %v11013_v14  ;;  %p9025_p3 = pnand %p9024_p2, %p9018_p13 }
  0x22   : > { %v2270_v38 = vpack.c.bf16 %v9347_v34, %v9334_v28  ;;  %7861 = vmatprep.subr.bf16.mxu1 %v8844_v24  ;;  %7799 = vmatprep.mubr.msk.bf16.mxu0 %vm461_vm0, %v434_v30  ;;  %v405_v41 = vld [vmem:[%s9207_s25] sm:$0xff]  ;;  %v9369_v42 = vld [vmem:[%s9207_s25 + $0x10] sm:$0xff]  ;;  %v940_v45 = vpack.c.bf16 %v9354_v36, %v9347_v34  ;;  %v8853_v7 = vld [vmem:[%s11004_s1 + $0x48] sm:$0xff]   ;;  %338 = vst.msk [vmem:[#allocation2 + $0x28] sm:$0x1] %vm333_vm2, %v11013_v14 }
  0x23   : > { %7855 = vmatprep.mubr.msk.bf16.mxu1 %vm461_vm0, %v939_v31  ;;  %v9374_v44 = vld [vmem:[%s9207_s25 + $0x20] sm:$0xff]  ;;  %v413_v47 = vpack.c.bf16 %v9369_v42, %v405_v41  ;;  %v9382_v48 = vld [vmem:[%s9207_s25 + $0x30] sm:$0xff]  ;;  %v8854_v9 = vld [vmem:[%s11004_s1 + $0x48] sm:$0xff]   ;;  %340 = vst.msk [vmem:[#allocation2 + $0x38] sm:$0x1] %vm333_vm2, %v11013_v14 }
  0x24   : > { %7806 = vmatpush3.bf16.msra.mxu0 %v8843_v23  ;;  %v1646_v46 = vpack.c.bf16 %v9374_v44, %v9369_v42  ;;  %v9392_v51 = vld [vmem:[%s9207_s25 + $0x40] sm:$0xff]  ;;  %v9396_v52 = vld [vmem:[%s9207_s25 + $0x50] sm:$0xff]  ;;  %v414_v56 = vpack.c.bf16 %v9382_v48, %v9374_v44  ;;  %v8857_v41 = vld [vmem:[%s11004_s1 + $0x58] sm:$0xff]   ;;  %342 = vst.msk [vmem:[#allocation2 + $0x48] sm:$0x1] %vm333_vm2, %v11013_v14 }
  0x25   : > { %7862 = vmatpush3.bf16.msra.mxu1 %v8844_v24  ;;  %7807 = vmatprep.subr.bf16.mxu0 %v8845_v39  ;;  %v9399_v53 = vld [vmem:[%s9207_s25 + $0x60] sm:$0xff]  ;;  %v1647_v54 = vpack.c.bf16 %v9392_v51, %v9382_v48  ;;  %v415_v59 = vpack.c.bf16 %v9396_v52, %v9392_v51  ;;  %v9422_v60 = vld [vmem:[%s9207_s25 + $0x70] sm:$0xff]  ;;  %v8881_v42 = vld [vmem:[%s11004_s1 + $0x58] sm:$0xff]   ;;  %344 = vst.msk [vmem:[#allocation2 + $0x58] sm:$0x1] %vm333_vm2, %v11013_v14 }
  0x26   : > { %7863 = vmatprep.subr.bf16.mxu1 %v8846_v40  ;;  %v1648_v55 = vpack.c.bf16 %v9399_v53, %v9396_v52  ;;  %v6678_v63 = vld [vmem:[%s9207_s25 + $0x120] sm:$0xff]  ;;  %v6679_v0 = vld [vmem:[%s9207_s25 + $0x130] sm:$0xff]  ;;  %v416_v1 = vpack.c.bf16 %v9422_v60, %v9399_v53  ;;  %v8882_v44 = vld [vmem:[%s11004_s1 + $0x58] sm:$0xff]   ;;  %346 = vst.msk [vmem:[#allocation2 + $0x68] sm:$0x1] %vm333_vm2, %v11013_v14 }
  0x27   : > { %7800 = vmatmul.mubr.msk.bf16.gmra.mrb[4].mxu0 %vm461_vm0, %v435_v43  ;;  %v6749_v2 = vld [vmem:[%s9207_s25 + $0x1b0] sm:$0xff]  ;;  %v6750_v3 = vld [vmem:[%s9207_s25 + $0x1c0] sm:$0xff]  ;;  %v9438_v4 = vpack.c.bf16 %v6679_v0, %v6678_v63  ;;  %348 = vst.msk [vmem:[#allocation2 + $0x78] sm:$0x1] %vm333_vm2, %v11013_v14  ;;  %350 = vst.msk [vmem:[#allocation2 + $0x88] sm:$0x1] %vm333_vm2, %v11013_v14 }
  0x28   : > { %7856 = vmatmul.mubr.msk.bf16.gmra.mrb[4].mxu1 %vm461_vm0, %v940_v45  ;;  %7808 = vmatpush3.bf16.msra.mxu0 %v8845_v39  ;;  %v9440_v5 = vpack.c.bf16 %v6750_v3, %v6749_v2  ;;  %v6680_v6 = vld [vmem:[%s9207_s25 + $0x140] sm:$0xff]  ;;  %v6681_v8 = vld [vmem:[%s9207_s25 + $0x150] sm:$0xff]  ;;  %352 = vst.msk [vmem:[#allocation2 + $0x98] sm:$0x1] %vm333_vm2, %v11013_v14  ;;  %354 = vst.msk [vmem:[#allocation2 + $0xa8] sm:$0x1] %vm333_vm2, %v11013_v14 }
  0x29   : > { %7864 = vmatpush3.bf16.msra.mxu1 %v8846_v40  ;;  %7809 = vmatprep.mubr.msk.bf16.mxu0 %vm461_vm0, %v413_v47  ;;  %v6752_v12 = vld [vmem:[%s9207_s25 + $0x1e0] sm:$0xff]  ;;  %v9458_v13 = vpack.c.bf16 %v6681_v8, %v6680_v6  ;;  %v8855_v15 = vld [vmem:[%s11004_s1 + $0x50] sm:$0xff]   ;;  %356 = vst.msk [vmem:[#allocation2 + $0xb8] sm:$0x1] %vm333_vm2, %v11013_v14  ;;  %358 = vst.msk [vmem:[#allocation2 + $0xc8] sm:$0x1] %vm333_vm2, %v11013_v14 }
  0x2a   : > { %7865 = vmatprep.mubr.msk.bf16.mxu1 %vm461_vm0, %v9218_v10  ;;  %7817 = vmatprep.subr.bf16.mxu0 %v8847_v49  ;;  %v6751_v10 = vld [vmem:[%s9207_s25 + $0x1d0] sm:$0xff]  ;;  %v6754_v24 = vld [vmem:[%s9207_s25 + $0x200] sm:$0xff]  ;;  %360 = vst.msk [vmem:[#allocation2 + $0xd8] sm:$0x1] %vm333_vm2, %v11013_v14  ;;  %362 = vst.msk [vmem:[#allocation2 + $0xe8] sm:$0x1] %vm333_vm2, %v11013_v14 }
  0x2b   : > { %7873 = vmatprep.subr.bf16.mxu1 %v8848_v50  ;;  %v6683_v20 = vld [vmem:[%s9207_s25 + $0x170] sm:$0xff]  ;;  %v9466_v23 = vpack.c.bf16 %v6752_v12, %v6751_v10  ;;  %v6756_v40 = vld [vmem:[%s9207_s25 + $0x220] sm:$0xff]  ;;  %364 = vst.msk [vmem:[#allocation2 + $0xf8] sm:$0x1] %vm333_vm2, %v11013_v14  ;;  %366 = vst.msk [vmem:[#allocation2 + $0x108] sm:$0x1] %vm333_vm2, %v11013_v14 }
  0x2c   : > { %v6753_v22 = vld [vmem:[%s9207_s25 + $0x1f0] sm:$0xff]  ;;  %v6770_v45 = vld [vmem:[%s9207_s25 + $0x121] sm:$0xff]  ;;  %368 = vst.msk [vmem:[#allocation2 + $0x118] sm:$0x1] %vm333_vm2, %v11013_v14  ;;  %370 = vst.msk [vmem:[#allocation2 + $0x128] sm:$0x1] %vm333_vm2, %v11013_v14 }
  0x2d   : > { %v8856_v25 = vld [vmem:[%s11004_s1 + $0x50] sm:$0xff]   ;;  %v9478_v32 = vpack.c.bf16 %v6754_v24, %v6753_v22  ;;  %v9521_v3 = vld [vmem:[%s9207_s25 + $0x80] sm:$0xff]  ;;  %372 = vst.msk [vmem:[#allocation2 + $0x138] sm:$0x1] %vm333_vm2, %v11013_v14  ;;  %374 = vst.msk [vmem:[#allocation2 + $0x148] sm:$0x1] %vm333_vm2, %v11013_v14 }
  0x2e   : > { %v6685_v31 = vld [vmem:[%s9207_s25 + $0x190] sm:$0xff]  ;;  %v1649_v10 = vpack.c.bf16 %v9521_v3, %v9422_v60  ;;  %v8865_v24 = vld [vmem:[%s11004_s1] sm:$0xff]   ;;  %376 = vst.msk [vmem:[#allocation2 + $0x158] sm:$0x1] %vm333_vm2, %v11013_v14  ;;  %378 = vst.msk [vmem:[#allocation2 + $0x168] sm:$0x1] %vm333_vm2, %v11013_v14 }
  0x2f   : > { %7810 = vmatmul.mubr.msk.bf16.vlgmr.msra.gmra.mrb[0].mxu0 %vm461_vm0, %v414_v56  ;;  %v6755_v39 = vld [vmem:[%s9207_s25 + $0x210] sm:$0xff]  ;;  %380 = vst.msk [vmem:[#allocation2 + $0x178] sm:$0x1] %vm333_vm2, %v11013_v14  ;;  %382 = vst.msk [vmem:[#allocation2 + $0x188] sm:$0x1] %vm333_vm2, %v11013_v14  ;;  %v8884_v16 = vld [vmem:[%s11006_s3 + $0x18] sm:$0xff]  }
  0x30   : > { %7866 = vmatmul.mubr.msk.bf16.vlgmr.msra.gmra.mrb[0].mxu1 %vm461_vm0, %v9309_v19  ;;  %7818 = vmatpush3.bf16.msra.mxu0 %v8847_v49  ;;  %v6682_v19 = vld [vmem:[%s9207_s25 + $0x160] sm:$0xff]  ;;  %v6771_v49 = vld [vmem:[%s9207_s25 + $0x131] sm:$0xff]  ;;  %384 = vst.msk [vmem:[#allocation2 + $0x198] sm:$0x1] %vm333_vm2, %v11013_v14  ;;  %386 = vst.msk [vmem:[#allocation2 + $0x1a8] sm:$0x1] %vm333_vm2, %v11013_v14 }
  0x31   : > { %7874 = vmatpush3.bf16.msra.mxu1 %v8848_v50  ;;  %7819 = vmatprep.subr.bf16.mxu0 %v8849_v57  ;;  %v9472_v26 = vpack.c.bf16 %v6683_v20, %v6682_v19  ;;  %v9498_v50 = vpack.c.bf16 %v6756_v40, %v6755_v39  ;;  %v1266_v56 = vpack.c.bf16 %v6771_v49, %v6770_v45  ;;  %v6775_v63 = vld [vmem:[%s9207_s25 + $0x171] sm:$0xff]  ;;  %v8864_v19 = vld [vmem:[%s11004_s1 + $0x28] sm:$0xff]   ;;  %v9766_v17 = vld [vmem:[%s11006_s3] sm:$0xff]  }
  0x32   : > { %7875 = vmatprep.subr.bf16.mxu1 %v8850_v58  ;;  %7813 = vmatprep.mubr.msk.bf16.mxu0 %vm461_vm0, %v415_v59  ;;  %v6772_v59 = vld [vmem:[%s9207_s25 + $0x141] sm:$0xff]  ;;  %v6914_v6 = vld [vmem:[%s9207_s25 + $0x110] sm:$0xff]  ;;  %v8873_v45 = vld [vmem:[%s11004_s1 + $0x38] sm:$0xff]   ;;  %388 = vst.msk [vmem:[#allocation2 + $0x1b8] sm:$0x1] %vm333_vm2, %v11013_v14 }
  0x33   : > { %7869 = vmatprep.mubr.msk.bf16.mxu1 %vm461_vm0, %v434_v30  ;;  %v6684_v30 = vld [vmem:[%s9207_s25 + $0x180] sm:$0xff]  ;;  %v6777_v8 = vld [vmem:[%s9207_s25 + $0x191] sm:$0xff]  ;;  %v9534_v12 = vpack.c.bf16 %v6914_v6, %v9344_v33  ;;  %390 = vst.msk [vmem:[#allocation2 + $0x1c8] sm:$0x1] %vm333_vm2, %v11013_v14  ;;  %392 = vst.msk [vmem:[#allocation2 + $0x1d8] sm:$0x1] %vm333_vm2, %v11013_v14 }
  0x34   : > { %7820 = vmatpush3.bf16.msra.mxu0 %v8849_v57  ;;  %v9495_v47 = vpack.c.bf16 %v6685_v31, %v6684_v30  ;;  %v8859_v57 = vld [vmem:[%s11004_s1 + $0x18] sm:$0xff]   ;;  %v9544_v20 = vld [vmem:[%s9207_s25 + $0x81] sm:$0xff]  ;;  %v8869_v39 = vld [vmem:[%s11004_s1 + $0x10] sm:$0xff]   ;;  %394 = vst.msk [vmem:[#allocation2 + $0x1e8] sm:$0x1] %vm333_vm2, %v11013_v14 }
  0x35   : > { %7876 = vmatpush3.bf16.msra.mxu1 %v8850_v58  ;;  %7821 = vmatprep.subr.bf16.mxu0 %v8851_v61  ;;  %v8860_v58 = vld [vmem:[%s11004_s1 + $0x18] sm:$0xff]   ;;  %v2271_v33 = vpack.c.bf16 %v9544_v20, %v9354_v36  ;;  %v8867_v30 = vld [vmem:[%s11004_s1 + $0x8] sm:$0xff]   ;;  %v8870_v40 = vld [vmem:[%s11004_s1 + $0x10] sm:$0xff]   ;;  %396 = vst.msk [vmem:[#allocation2 + $0x1f8] sm:$0x1] %vm333_vm2, %v11013_v14 }
  0x36   : > { %7877 = vmatprep.subr.bf16.mxu1 %v8852_v62  ;;  %v8868_v31 = vld [vmem:[%s11004_s1 + $0x8] sm:$0xff]   ;;  %v8874_v49 = vld [vmem:[%s11004_s1 + $0x38] sm:$0xff]   ;;  %398 = vst.msk [vmem:[#allocation2 + $0x208] sm:$0x1] %vm333_vm2, %v11013_v14  ;;  %400 = vst.msk [vmem:[#allocation2 + $0x218] sm:$0x1] %vm333_vm2, %v11013_v14 }
  0x37   : > { %7814 = vmatmul.mubr.msk.bf16.gmra.mrb[4].mxu0 %vm461_vm0, %v416_v1  ;;  %v8861_v1 = vld [vmem:[%s11004_s1 + $0x20] sm:$0xff]   ;;  %402 = vst.msk [vmem:[#allocation2 + $0x228] sm:$0x1] %vm333_vm2, %v11013_v14  ;;  %404 = vst.msk [vmem:[#allocation2 + $0x238] sm:$0x1] %vm333_vm2, %v11013_v14  ;;  %v8883_v11 = vld [vmem:[%s11006_s3 + $0x10] sm:$0xff]  }
  0x38   : > { %7870 = vmatmul.mubr.msk.bf16.gmra.mrb[4].mxu1 %vm461_vm0, %v435_v43  ;;  %7822 = vmatpush3.bf16.msra.mxu0 %v8851_v61  ;;  %v8858_v43 = vld [vmem:[%s11004_s1 + $0x58] sm:$0xff]  }
  0x39   : > { %7878 = vmatpush3.bf16.msra.mxu1 %v8852_v62  ;;  %7823 = vmatprep.mubr.msk.bf16.mxu0 %vm461_vm0, %v9438_v4  ;;  %v6773_v61 = vld [vmem:[%s9207_s25 + $0x151] sm:$0xff]  ;;  %v6774_v62 = vld [vmem:[%s9207_s25 + $0x161] sm:$0xff] }
  0x3a   : > { %7879 = vmatprep.mubr.msk.bf16.mxu1 %vm461_vm0, %v9440_v5  ;;  %7831 = vmatprep.subr.bf16.mxu0 %v8853_v7  ;;  %v1267_v0 = vpack.c.bf16 %v6773_v61, %v6772_v59  ;;  %v1268_v2 = vpack.c.bf16 %v6775_v63, %v6774_v62 }
  0x3b   : > { %7887 = vmatprep.subr.bf16.mxu1 %v8854_v9 }
  0x3f   : > { %7824 = vmatmul.mubr.msk.bf16.vlgmr.msra.gmra.mrb[0].mxu0 %vm461_vm0, %v9458_v13 }
  0x40   : > { %7880 = vmatmul.mubr.msk.bf16.vlgmr.msra.gmra.mrb[0].mxu1 %vm461_vm0, %v9466_v23  ;;  %7832 = vmatpush3.bf16.msra.mxu0 %v8853_v7  ;;  %v6776_v7 = vld [vmem:[%s9207_s25 + $0x181] sm:$0xff]  ;;  %s6578_s25 = scalar_lea.sflag [#allocation6], %s323_s23 }
  0x41   : > { %7888 = vmatpush3.bf16.msra.mxu1 %v8854_v9  ;;  %7833 = vmatprep.subr.bf16.mxu0 %v8855_v15  ;;  %v8862_v9 = vld [vmem:[%s11004_s1 + $0x20] sm:$0xff]   ;;  %v1269_v22 = vpack.c.bf16 %v6777_v8, %v6776_v7 }
  0x42   : > { %7889 = vmatprep.subr.bf16.mxu1 %v8856_v25  ;;  %7827 = vmatprep.mubr.msk.bf16.mxu0 %vm461_vm0, %v9472_v26 }
  0x43   : > { %7883 = vmatprep.mubr.msk.bf16.mxu1 %vm461_vm0, %v9478_v32 }
  0x44   : > { %7834 = vmatpush3.bf16.msra.mxu0 %v8855_v15  ;;  %v8863_v15 = vld [vmem:[%s11004_s1 + $0x28] sm:$0xff]  }
  0x45   : > { %7890 = vmatpush3.bf16.msra.mxu1 %v8856_v25  ;;  %7835 = vmatprep.subr.bf16.mxu0 %v8857_v41  ;;  %v8866_v25 = vld [vmem:[%s11004_s1] sm:$0xff]  }
  0x46   : > { %7891 = vmatprep.subr.bf16.mxu1 %v8858_v43 }
  0x47   : > { %7828 = vmatmul.mubr.msk.bf16.gmra.mrb[4].mxu0 %vm461_vm0, %v9495_v47 }
  0x48   : > { %7884 = vmatmul.mubr.msk.bf16.gmra.mrb[4].mxu1 %vm461_vm0, %v9498_v50  ;;  %7836 = vmatpush3.bf16.msra.mxu0 %v8857_v41  ;;  %v8871_v41 = vld [vmem:[%s11004_s1 + $0x30] sm:$0xff]  }
  0x49   : > { %7892 = vmatpush3.bf16.msra.mxu1 %v8858_v43  ;;  %7837 = vmatprep.mubr.msk.bf16.mxu0 %vm461_vm0, %v9440_v5  ;;  %v8872_v43 = vld [vmem:[%s11004_s1 + $0x30] sm:$0xff]  }
  0x4a   : > { %7893 = vmatprep.mubr.msk.bf16.mxu1 %vm461_vm0, %v1266_v56  ;;  %7901 = vmatprep.subr.bf16.mxu0 %v8859_v57 }
  0x4b   : > { %7957 = vmatprep.subr.bf16.mxu1 %v8860_v58 }
  0x4f   : > { %7838 = vmatmul.mubr.msk.bf16.vlgmr.msra.gmra.mrb[0].mxu0 %vm461_vm0, %v9466_v23 }
  0x50   : > { %7894 = vmatmul.mubr.msk.bf16.vlgmr.msra.gmra.mrb[0].mxu1 %vm461_vm0, %v1267_v0  ;;  %7902 = vmatpush3.bf16.msra.mxu0 %v8859_v57 }
  0x51   : > { %7958 = vmatpush3.bf16.msra.mxu1 %v8860_v58  ;;  %7903 = vmatprep.subr.bf16.mxu0 %v8861_v1 }
  0x52   : > { %7841 = vmatprep.mubr.msk.bf16.mxu0 %vm461_vm0, %v9478_v32  ;;  %7897 = vmatprep.mubr.msk.bf16.mxu1 %vm461_vm0, %v1268_v2 }
  0x53   : > { %7959 = vmatprep.subr.bf16.mxu1 %v8862_v9 }
  0x54   : > { %7904 = vmatpush3.bf16.msra.mxu0 %v8861_v1 }
  0x55   : > { %7960 = vmatpush3.bf16.msra.mxu1 %v8862_v9  ;;  %7905 = vmatprep.subr.bf16.mxu0 %v8863_v15 }
  0x56   : > { %7961 = vmatprep.subr.bf16.mxu1 %v8864_v19 }
  0x57   : > { %7842 = vmatmul.mubr.msk.bf16.gmra.mrb[4].mxu0 %vm461_vm0, %v9498_v50 }
  0x58   : > { %7898 = vmatmul.mubr.msk.bf16.gmra.mrb[4].mxu1 %vm461_vm0, %v1269_v22  ;;  %7906 = vmatpush3.bf16.msra.mxu0 %v8863_v15 }
  0x59   : > { %7962 = vmatpush3.bf16.msra.mxu1 %v8864_v19  ;;  %7907 = vmatprep.mubr.msk.bf16.mxu0 %vm461_vm0, %v9440_v5 }
  0x5a   : > { %7963 = vmatprep.mubr.msk.bf16.mxu1 %vm461_vm0, %v1266_v56  ;;  %7915 = vmatprep.subr.bf16.mxu0 %v8865_v24 }
  0x5b   : > { %7971 = vmatprep.subr.bf16.mxu1 %v8866_v25 }
  0x5f   : > { %7908 = vmatmul.mubr.msk.bf16.vlgmr.msra.gmra.mrb[8].mxu0 %vm461_vm0, %v9466_v23 }
  0x60   : > { %7964 = vmatmul.mubr.msk.bf16.vlgmr.msra.gmra.mrb[8].mxu1 %vm461_vm0, %v1267_v0  ;;  %7916 = vmatpush3.bf16.msra.mxu0 %v8865_v24 }
  0x61   : > { %7972 = vmatpush3.bf16.msra.mxu1 %v8866_v25  ;;  %7917 = vmatprep.subr.bf16.mxu0 %v8867_v30 }
  0x62   : > { %7911 = vmatprep.mubr.msk.bf16.mxu0 %vm461_vm0, %v9478_v32  ;;  %7967 = vmatprep.mubr.msk.bf16.mxu1 %vm461_vm0, %v1268_v2 }
  0x63   : > { %7973 = vmatprep.subr.bf16.mxu1 %v8868_v31 }
  0x64   : > { %7918 = vmatpush3.bf16.msra.mxu0 %v8867_v30 }
  0x65   : > { %7974 = vmatpush3.bf16.msra.mxu1 %v8868_v31  ;;  %7919 = vmatprep.subr.bf16.mxu0 %v8869_v39 }
  0x66   : > { %7975 = vmatprep.subr.bf16.mxu1 %v8870_v40 }
  0x67   : > { %7912 = vmatmul.mubr.msk.bf16.gmra.mrb[12].mxu0 %vm461_vm0, %v9498_v50 }
  0x68   : > { %7968 = vmatmul.mubr.msk.bf16.gmra.mrb[12].mxu1 %vm461_vm0, %v1269_v22  ;;  %7920 = vmatpush3.bf16.msra.mxu0 %v8869_v39 }
  0x69   : > { %7976 = vmatpush3.bf16.msra.mxu1 %v8870_v40  ;;  %7921 = vmatprep.mubr.msk.bf16.mxu0 %vm461_vm0, %v9438_v4  ;;  %v8875_v4 = vld [vmem:[%s11004_s1 + $0x40] sm:$0xff]  }
  0x6a   : > { %7977 = vmatprep.mubr.msk.bf16.mxu1 %vm461_vm0, %v9440_v5  ;;  %7929 = vmatprep.subr.bf16.mxu0 %v8871_v41  ;;  %v8876_v5 = vld [vmem:[%s11004_s1 + $0x40] sm:$0xff]  }
  0x6b   : > { %7985 = vmatprep.subr.bf16.mxu1 %v8872_v43 }
  0x6f   : > { %7922 = vmatmul.mubr.msk.bf16.vlgmr.msra.gmra.mrb[8].mxu0 %vm461_vm0, %v9458_v13  ;;  %v8877_v13 = vld [vmem:[%s11004_s1 + $0x48] sm:$0xff]  }
  0x70   : > { %7978 = vmatmul.mubr.msk.bf16.vlgmr.msra.gmra.mrb[8].mxu1 %vm461_vm0, %v9466_v23  ;;  %7930 = vmatpush3.bf16.msra.mxu0 %v8871_v41  ;;  %v8878_v23 = vld [vmem:[%s11004_s1 + $0x48] sm:$0xff]  }
  0x71   : > { %7986 = vmatpush3.bf16.msra.mxu1 %v8872_v43  ;;  %7931 = vmatprep.subr.bf16.mxu0 %v8873_v45 }
  0x72   : > { %7925 = vmatprep.mubr.msk.bf16.mxu0 %vm461_vm0, %v9472_v26  ;;  %7981 = vmatprep.mubr.msk.bf16.mxu1 %vm461_vm0, %v9478_v32  ;;  %v8879_v26 = vld [vmem:[%s11004_s1 + $0x50] sm:$0xff]  }
  0x73   : > { %7987 = vmatprep.subr.bf16.mxu1 %v8874_v49  ;;  %v8880_v32 = vld [vmem:[%s11004_s1 + $0x50] sm:$0xff]  }
  0x74   : > { %7932 = vmatpush3.bf16.msra.mxu0 %v8873_v45 }
  0x75   : > { %7988 = vmatpush3.bf16.msra.mxu1 %v8874_v49  ;;  %7933 = vmatprep.subr.bf16.mxu0 %v8875_v4 }
  0x76   : > { %7989 = vmatprep.subr.bf16.mxu1 %v8876_v5 }
  0x77   : > { %7926 = vmatmul.mubr.msk.bf16.gmra.mrb[12].mxu0 %vm461_vm0, %v9495_v47 }
  0x78   : > { %7982 = vmatmul.mubr.msk.bf16.gmra.mrb[12].mxu1 %vm461_vm0, %v9498_v50  ;;  %7934 = vmatpush3.bf16.msra.mxu0 %v8875_v4 }
  0x79   : > { %7990 = vmatpush3.bf16.msra.mxu1 %v8876_v5  ;;  %7935 = vmatprep.mubr.msk.bf16.mxu0 %vm461_vm0, %v1646_v46 }
  0x7a   : > { %7991 = vmatprep.mubr.msk.bf16.mxu1 %vm461_vm0, %v9305_v18  ;;  %7943 = vmatprep.subr.bf16.mxu0 %v8877_v13 }
  0x7b   : > { %7999 = vmatprep.subr.bf16.mxu1 %v8878_v23 }
  0x7f   : > { %7936 = vmatmul.mubr.msk.bf16.vlgmr.msra.gmra.mrb[8].mxu0 %vm461_vm0, %v1647_v54 }
  0x80   : > { %7992 = vmatmul.mubr.msk.bf16.vlgmr.msra.gmra.mrb[8].mxu1 %vm461_vm0, %v9336_v29  ;;  %7944 = vmatpush3.bf16.msra.mxu0 %v8877_v13 }
  0x81   : > { %8000 = vmatpush3.bf16.msra.mxu1 %v8878_v23  ;;  %7945 = vmatprep.subr.bf16.mxu0 %v8879_v26 }
  0x82   : > { %7939 = vmatprep.mubr.msk.bf16.mxu0 %vm461_vm0, %v1648_v55  ;;  %7995 = vmatprep.mubr.msk.bf16.mxu1 %vm461_vm0, %v9356_v37 }
  0x83   : > { %8001 = vmatprep.subr.bf16.mxu1 %v8880_v32 }
  0x84   : > { %7946 = vmatpush3.bf16.msra.mxu0 %v8879_v26 }
  0x85   : > { %8002 = vmatpush3.bf16.msra.mxu1 %v8880_v32  ;;  %7947 = vmatprep.subr.bf16.mxu0 %v8881_v42 }
  0x86   : > { %8003 = vmatprep.subr.bf16.mxu1 %v8882_v44 }
  0x87   : > { %7940 = vmatmul.mubr.msk.bf16.gmra.mrb[12].mxu0 %vm461_vm0, %v1649_v10 }
  0x88   : > { %7996 = vmatmul.mubr.msk.bf16.gmra.mrb[12].mxu1 %vm461_vm0, %v9534_v12  ;;  %7948 = vmatpush3.bf16.msra.mxu0 %v8881_v42 }
  0x89   : > { %8004 = vmatpush3.bf16.msra.mxu1 %v8882_v44  ;;  %7949 = vmatprep.mubr.msk.bf16.mxu0 %vm461_vm0, %v9305_v18  ;;  %v9772_v18 = vld [vmem:[%s11005_s2] ss:$0 sm:$0xff] }
  0x8a   : > { %8005 = vmatprep.mubr.msk.bf16.mxu1 %vm461_vm0, %v2268_v21  ;;  %8205 = vmatprep.subr.bf16.mxu1 %v11013_v14 }
  0x8b   : > { %8013 = vmatprep.subr.bf16.mxu0 %v8883_v11 }
  0x8f   : > { %7950 = vmatmul.mubr.msk.bf16.vlgmr.msra.gmra.mrb[8].mxu0 %vm461_vm0, %v9336_v29 }
  0x90   : > { %8006 = vmatmul.mubr.msk.bf16.vlgmr.msra.gmra.mrb[8].mxu1 %vm461_vm0, %v2269_v35  ;;  %7953 = vmatprep.mubr.msk.bf16.mxu0 %vm461_vm0, %v9356_v37 }
  0x91   : > { %8009 = vmatprep.mubr.msk.bf16.mxu1 %vm461_vm0, %v2270_v38  ;;  %8014 = vmatpush3.bf16.msra.mxu0 %v8883_v11 }
  0x92   : > { %8015 = vmatprep.subr.bf16.mxu0 %v8884_v16 }
  0x95   : > { %8016 = vmatpush3.bf16.msra.mxu0 %v8884_v16 }
  0x96   : > { %8025 = vmatprep.subr.bf16.mxu0 %v9766_v17 }
  0x97   : > { %7954 = vmatmul.mubr.msk.bf16.gmra.mrb[12].mxu0 %vm461_vm0, %v9534_v12 }
  0x98   : > { %8010 = vmatmul.mubr.msk.bf16.gmra.mrb[12].mxu1 %vm461_vm0, %v2271_v33 }
 0x122   : > { %v7839_v21 = vpop.f32.mrb[0].mxu0 }
 0x123   : > { %v889_v27 = vadd.f32 %v7839_v21, %v9772_v18  ;;  %v7895_v28 = vpop.f32.mrb[0].mxu1  ;;  %v841_v29 = vpop.f32.mrb[1].mxu0 }
 0x124   : > { %v1388_v34 = vadd.f32 %v7895_v28, %v9772_v18  ;;  %v887_v35 = vadd.f32 %v9772_v18, %v841_v29  ;;  %v1340_v36 = vpop.f32.mrb[1].mxu1  ;;  %v7840_v37 = vpop.f32.mrb[2].mxu0  ;;  %v8886_v28 = vld [vmem:[%s11006_s3 + $0x8] sm:$0xff]  }
 0x125   : > { %v897_v38 = vmax.f32 %v889_v27, 0.0  ;;  %v1386_v46 = vadd.f32 %v9772_v18, %v1340_v36  ;;  %v890_v48 = vadd.f32 %v7840_v37, %v9772_v18  ;;  %v7896_v51 = vpop.f32.mrb[2].mxu1  ;;  %v844_v52 = vpop.f32.mrb[3].mxu0 }
 0x126   : > { %v1396_v53 = vmax.f32 %v1388_v34, 0.0  ;;  %v895_v54 = vmax.f32 %v887_v35, 0.0  ;;  %v1389_v55 = vadd.f32 %v7896_v51, %v9772_v18  ;;  %v888_v60 = vadd.f32 %v9772_v18, %v844_v52  ;;  %v1343_v47 = vpop.f32.mrb[3].mxu1  ;;  %v8887_v35 = vld [vmem:[%s11006_s3 + $0x20] sm:$0xff]  }
 0x127   : > { %905 = vst.msk [vmem:[#allocation2 + $0x20] sm:$0xff] %vm331_vm1, %v897_v38  ;;  %v1394_v50 = vmax.f32 %v1386_v46, 0.0  ;;  %v898_v56 = vmax.f32 %v890_v48, 0.0  ;;  %v1387_v57 = vadd.f32 %v9772_v18, %v1343_v47 }
 0x128   : > { %1405 = vst.msk [vmem:[#allocation2 + $0xb0] sm:$0xff] %vm331_vm1, %v1396_v53  ;;  %903 = vst.msk [vmem:[#allocation2] sm:$0xff] %vm331_vm1, %v895_v54  ;;  %v1397_v58 = vmax.f32 %v1389_v55, 0.0  ;;  %v896_v59 = vmax.f32 %v888_v60, 0.0 }
 0x129   : > { %1403 = vst.msk [vmem:[#allocation2 + $0x90] sm:$0xff] %vm331_vm1, %v1394_v50  ;;  %906 = vst.msk [vmem:[#allocation2 + $0x30] sm:$0xff] %vm331_vm1, %v898_v56  ;;  %v1395_v61 = vmax.f32 %v1387_v57, 0.0  ;;  %v8896_v57 = vld [vmem:[%s11006_s3 + $0x68] sm:$0xff]  }
 0x12a   : > { %1406 = vst.msk [vmem:[#allocation2 + $0xc0] sm:$0xff] %vm331_vm1, %v1397_v58  ;;  %904 = vst.msk [vmem:[#allocation2 + $0x10] sm:$0xff] %vm331_vm1, %v896_v59  ;;  %v7843_v62 = vpop.f32.mrb[4].mxu0 }
 0x12b   : > { %1404 = vst.msk [vmem:[#allocation2 + $0xa0] sm:$0xff] %vm331_vm1, %v1395_v61  ;;  %v893_v63 = vadd.f32 %v7843_v62, %v9772_v18  ;;  %v7899_v0 = vpop.f32.mrb[4].mxu1  ;;  %v857_v1 = vpop.f32.mrb[5].mxu0 }
 0x12c   : > { %v1392_v2 = vadd.f32 %v7899_v0, %v9772_v18  ;;  %v891_v3 = vadd.f32 %v9772_v18, %v857_v1  ;;  %v1356_v6 = vpop.f32.mrb[5].mxu1  ;;  %v7844_v7 = vpop.f32.mrb[6].mxu0 }
 0x12d   : > { %v901_v8 = vmax.f32 %v893_v63, 0.0  ;;  %v1390_v9 = vadd.f32 %v9772_v18, %v1356_v6  ;;  %v894_v10 = vadd.f32 %v7844_v7, %v9772_v18  ;;  %v7900_v12 = vpop.f32.mrb[6].mxu1  ;;  %v860_v15 = vpop.f32.mrb[7].mxu0 }
 0x12e   : > { %v1400_v19 = vmax.f32 %v1392_v2, 0.0  ;;  %v899_v20 = vmax.f32 %v891_v3, 0.0  ;;  %v1393_v33 = vadd.f32 %v7900_v12, %v9772_v18  ;;  %v892_v22 = vadd.f32 %v9772_v18, %v860_v15  ;;  %v1359_v24 = vpop.f32.mrb[7].mxu1  ;;  %v9803_v43 = vld [vmem:[#allocation2 + $0x20] sm:$0xff]  ;;  %v8889_v12 = vld [vmem:[%s11006_s3 + $0x30] sm:$0xff]  }
 0x12f   : > { %909 = vst.msk [vmem:[#allocation2 + $0x60] sm:$0xff] %vm331_vm1, %v901_v8  ;;  %v1398_v25 = vmax.f32 %v1390_v9, 0.0  ;;  %v902_v30 = vmax.f32 %v894_v10, 0.0  ;;  %v1391_v31 = vadd.f32 %v9772_v18, %v1359_v24  ;;  %v9801_v41 = vld [vmem:[#allocation2 + $0xb0] sm:$0xff]  ;;  %v9805_v45 = vld [vmem:[#allocation2 + $0x21] sm:$0xff]  ;;  %v8890_v24 = vld [vmem:[%s11006_s3 + $0x38] sm:$0xff]  }
 0x130   : > { %1409 = vst.msk [vmem:[#allocation2 + $0xf0] sm:$0xff] %vm331_vm1, %v1400_v19  ;;  %907 = vst.msk [vmem:[#allocation2 + $0x40] sm:$0xff] %vm331_vm1, %v899_v20  ;;  %v1401_v39 = vmax.f32 %v1393_v33, 0.0  ;;  %v900_v40 = vmax.f32 %v892_v22, 0.0  ;;  %v2429_v23 = vld [vmem:[#allocation2 + $0x90] sm:$0xff]  ;;  %v2413_v0 = vld [vmem:[#allocation2] sm:$0xff] }
 0x131   : > { %1407 = vst.msk [vmem:[#allocation2 + $0xd0] sm:$0xff] %vm331_vm1, %v1398_v25  ;;  %910 = vst.msk [vmem:[#allocation2 + $0x70] sm:$0xff] %vm331_vm1, %v902_v30  ;;  %v1399_v49 = vmax.f32 %v1391_v31, 0.0  ;;  %v9809_v4 = vld [vmem:[#allocation2 + $0xc0] sm:$0xff]  ;;  %v9811_v5 = vld [vmem:[#allocation2 + $0x10] sm:$0xff] }
 0x132   : > { %v9813_v13 = vld [vmem:[#allocation2 + $0x11] sm:$0xff]  ;;  %1410 = vst.msk [vmem:[#allocation2 + $0x100] sm:$0xff] %vm331_vm1, %v1401_v39  ;;  %908 = vst.msk [vmem:[#allocation2 + $0x50] sm:$0xff] %vm331_vm1, %v900_v40  ;;  %v9817_v26 = vld [vmem:[#allocation2 + $0xa0] sm:$0xff]  ;;  %v3317_v42 = vpack.c.bf16 %v9803_v43, %v9811_v5  ;;  %v2438_v27 = vpack.c.bf16 %v9809_v4, %v9801_v41  ;;  %v2421_v6 = vpack.c.bf16 %v9811_v5, %v2413_v0 }
 0x133   : > { %v9819_v32 = vld [vmem:[#allocation2 + $0xa1] sm:$0xff]  ;;  %1408 = vst.msk [vmem:[#allocation2 + $0xe0] sm:$0xff] %vm331_vm1, %v1399_v49  ;;  %v2437_v44 = vpack.c.bf16 %v9817_v26, %v2429_v23  ;;  %v9825_v11 = vld [vmem:[#allocation2 + $0xb1] sm:$0xff] }
 0x134   : > { %v9840_v34 = vld [vmem:[#allocation2 + $0x30] sm:$0xff]  ;;  %v9882_v61 = vld [vmem:[#allocation2 + $0xc1] sm:$0xff] }
 0x135   : > { %8017 = vmatprep.mubr.msk.bf16.mxu0 %vm331_vm1, %v2437_v44  ;;  %v9848_v37 = vld [vmem:[#allocation2 + $0x31] sm:$0xff]  ;;  %v2422_v8 = vpack.c.bf16 %v9840_v34, %v9803_v43  ;;  %v8888_v9 = vld [vmem:[%s11006_s3 + $0x28] sm:$0xff]   ;;  %v8891_v30 = vld [vmem:[%s11006_s3 + $0x40] sm:$0xff]  }
 0x136   : > { %8018 = vmatmul.mubr.msk.bf16.vlgmr.msra.gmra.mrb[16].mxu0 %vm331_vm1, %v2438_v27  ;;  %v9856_v51 = vld [vmem:[#allocation2 + $0x60] sm:$0xff]  ;;  %v2633_v22 = vpack.c.bf16 %v9848_v37, %v9805_v45  ;;  %v2738_v40 = vld [vmem:[#allocation2 + $0x91] sm:$0xff] }
 0x137   : > { %8026 = vmatpush3.bf16.msra.mxu0 %v9766_v17  ;;  %v9846_v36 = vld [vmem:[#allocation2 + $0x40] sm:$0xff]  ;;  %v9854_v48 = vld [vmem:[#allocation2 + $0xf0] sm:$0xff]  ;;  %v2746_v49 = vpack.c.bf16 %v9819_v32, %v2738_v40 }
 0x138   : > { %v9850_v38 = vld [vmem:[#allocation2 + $0x41] sm:$0xff]  ;;  %v9852_v46 = vld [vmem:[#allocation2 + $0xd0] sm:$0xff]  ;;  %8027 = vmatprep.subr.bf16.mxu0 %v8886_v28 }
 0x139   : > { %v9862_v17 = vld [vmem:[#allocation2 + $0x100] sm:$0xff]  ;;  %v9864_v54 = vld [vmem:[#allocation2 + $0x50] sm:$0xff] }
 0x13a   : > { %v9866_v55 = vld [vmem:[#allocation2 + $0x51] sm:$0xff]  ;;  %v9870_v47 = vld [vmem:[#allocation2 + $0xe0] sm:$0xff]  ;;  %v2440_v63 = vpack.c.bf16 %v9862_v17, %v9854_v48  ;;  %v2423_v10 = vpack.c.bf16 %v9864_v54, %v9846_v36 }
 0x13b   : > { %v9872_v50 = vld [vmem:[#allocation2 + $0xd1] sm:$0xff]  ;;  %v9874_v56 = vld [vmem:[#allocation2 + $0xe1] sm:$0xff]  ;;  %v2439_v58 = vpack.c.bf16 %v9870_v47, %v9852_v46  ;;  %8028 = vmatpush3.bf16.msra.mxu0 %v8886_v28  ;;  %v2634_v25 = vpack.c.bf16 %v9866_v55, %v9850_v38 }
 0x13c   : > { %v9880_v59 = vld [vmem:[#allocation2 + $0x61] sm:$0xff]  ;;  %8037 = vmatprep.subr.bf16.mxu0 %v8887_v35  ;;  %v9888_v1 = vld [vmem:[#allocation2 + $0xf1] sm:$0xff] }
 0x13d   : > { %8021 = vmatprep.mubr.msk.bf16.mxu0 %vm331_vm1, %v2439_v58  ;;  %v9912_v15 = vld [vmem:[#allocation2 + $0x70] sm:$0xff]  ;;  %v2624_v20 = vld [vmem:[#allocation2 + $0x1] sm:$0xff] }
 0x13e   : > { %8022 = vmatmul.mubr.msk.bf16.gmra.mrb[20].mxu0 %vm331_vm1, %v2440_v63  ;;  %v2424_v19 = vpack.c.bf16 %v9912_v15, %v9856_v51  ;;  %v2632_v33 = vpack.c.bf16 %v9813_v13, %v2624_v20  ;;  %v9931_v31 = vld [vmem:[#allocation2 + $0x71] sm:$0xff]  ;;  %v8903_v43 = vld [vmem:[%s11006_s3 + $0xa0] sm:$0xff]  }
 0x13f   : > { %8029 = vmatprep.mubr.msk.bf16.mxu0 %vm331_vm1, %v2421_v6  ;;  %v2635_v39 = vpack.c.bf16 %v9931_v31, %v9880_v59  ;;  %v2747_v6 = vpack.c.bf16 %v9882_v61, %v9825_v11  ;;  %v3316_v5 = vld [vmem:[#allocation2 + $0x80] sm:$0xff] }
 0x146   : > { %8030 = vmatmul.mubr.msk.bf16.vlgmr.msra.gmra.mrb[16].mxu0 %vm331_vm1, %v2422_v8  ;;  %v8892_v8 = vld [vmem:[%s11006_s3 + $0x48] sm:$0xff]  }
 0x147   : > { %8033 = vmatprep.mubr.msk.bf16.mxu0 %vm331_vm1, %v2423_v10  ;;  %8038 = vmatpush3.bf16.msra.mxu0 %v8887_v35 }
 0x148   : > { %8039 = vmatprep.subr.bf16.mxu0 %v8888_v9 }
 0x14b   : > { %8040 = vmatpush3.bf16.msra.mxu0 %v8888_v9 }
 0x14c   : > { %8049 = vmatprep.subr.bf16.mxu0 %v8889_v12 }
 0x14e   : > { %8034 = vmatmul.mubr.msk.bf16.gmra.mrb[20].mxu0 %vm331_vm1, %v2424_v19 }
 0x14f   : > { %8041 = vmatprep.mubr.msk.bf16.mxu0 %vm331_vm1, %v2632_v33  ;;  %v2748_v33 = vpack.c.bf16 %v9874_v56, %v9872_v50 }
 0x156   : > { %8042 = vmatmul.mubr.msk.bf16.vlgmr.msra.gmra.mrb[16].mxu0 %vm331_vm1, %v2633_v22 }
 0x157   : > { %8045 = vmatprep.mubr.msk.bf16.mxu0 %vm331_vm1, %v2634_v25  ;;  %8050 = vmatpush3.bf16.msra.mxu0 %v8889_v12 }
 0x158   : > { %8051 = vmatprep.subr.bf16.mxu0 %v8890_v24 }
 0x15b   : > { %8052 = vmatpush3.bf16.msra.mxu0 %v8890_v24 }
 0x15c   : > { %8061 = vmatprep.subr.bf16.mxu0 %v8891_v30 }
 0x15e   : > { %8046 = vmatmul.mubr.msk.bf16.gmra.mrb[20].mxu0 %vm331_vm1, %v2635_v39 }
 0x15f   : > { %8053 = vmatprep.mubr.msk.bf16.mxu0 %vm331_vm1, %v2746_v49 }
 0x162   : > { %v7951_v23 = vpop.f32.mrb[8].mxu0 }
 0x163   : > { %v1890_v44 = vadd.f32 %v7951_v23, %v9772_v18  ;;  %v8007_v27 = vpop.f32.mrb[8].mxu1  ;;  %v1842_v28 = vpop.f32.mrb[9].mxu0 }
 0x164   : > { %v2390_v35 = vadd.f32 %v8007_v27, %v9772_v18  ;;  %v1888_v58 = vadd.f32 %v9772_v18, %v1842_v28  ;;  %v2342_v63 = vpop.f32.mrb[9].mxu1  ;;  %v7952_v0 = vpop.f32.mrb[10].mxu0 }
 0x165   : > { %v1898_v9 = vmax.f32 %v1890_v44, 0.0  ;;  %v2388_v10 = vadd.f32 %v9772_v18, %v2342_v63  ;;  %v1891_v12 = vadd.f32 %v7952_v0, %v9772_v18  ;;  %v8008_v19 = vpop.f32.mrb[10].mxu1  ;;  %v1845_v20 = vpop.f32.mrb[11].mxu0  ;;  %v9965_v63 = vld [vmem:[#allocation2 + $0x101] sm:$0xff] }
 0x166   : > { %v2398_v22 = vmax.f32 %v2390_v35, 0.0  ;;  %v1896_v24 = vmax.f32 %v1888_v58, 0.0  ;;  %v2391_v25 = vadd.f32 %v8008_v19, %v9772_v18  ;;  %v1889_v39 = vadd.f32 %v9772_v18, %v1845_v20  ;;  %v2345_v40 = vpop.f32.mrb[11].mxu1  ;;  %8054 = vmatmul.mubr.msk.bf16.vlgmr.msra.gmra.mrb[16].mxu0 %vm331_vm1, %v2747_v6  ;;  %v9961_v35 = vld [vmem:[%s11006_s3 + $0x50] sm:$0xff]  }
 0x167   : > { %1907 = vst.msk [vmem:[#allocation2 + $0x140] sm:$0xff] %vm331_vm1, %v1898_v9  ;;  %v2396_v49 = vmax.f32 %v2388_v10, 0.0  ;;  %v1899_v23 = vmax.f32 %v1891_v12, 0.0  ;;  %v2389_v44 = vadd.f32 %v9772_v18, %v2345_v40  ;;  %8057 = vmatprep.mubr.msk.bf16.mxu0 %vm331_vm1, %v2748_v33  ;;  %8062 = vmatpush3.bf16.msra.mxu0 %v8891_v30  ;;  %v2749_v33 = vpack.c.bf16 %v9965_v63, %v9888_v1 }
 0x168   : > { %2407 = vst.msk [vmem:[#allocation2 + $0x1d0] sm:$0xff] %vm331_vm1, %v2398_v22  ;;  %1905 = vst.msk [vmem:[#allocation2 + $0x120] sm:$0xff] %vm331_vm1, %v1896_v24  ;;  %v2399_v27 = vmax.f32 %v2391_v25, 0.0  ;;  %v1897_v28 = vmax.f32 %v1889_v39, 0.0  ;;  %8063 = vmatprep.subr.bf16.mxu0 %v8892_v8 }
 0x169   : > { %2405 = vst.msk [vmem:[#allocation2 + $0x1b0] sm:$0xff] %vm331_vm1, %v2396_v49  ;;  %1908 = vst.msk [vmem:[#allocation2 + $0x150] sm:$0xff] %vm331_vm1, %v1899_v23  ;;  %v2397_v58 = vmax.f32 %v2389_v44, 0.0 }
 0x16a   : > { %2408 = vst.msk [vmem:[#allocation2 + $0x1e0] sm:$0xff] %vm331_vm1, %v2399_v27  ;;  %1906 = vst.msk [vmem:[#allocation2 + $0x130] sm:$0xff] %vm331_vm1, %v1897_v28  ;;  %v7955_v30 = vpop.f32.mrb[12].mxu0 }
 0x16b   : > { %2406 = vst.msk [vmem:[#allocation2 + $0x1c0] sm:$0xff] %vm331_vm1, %v2397_v58  ;;  %v1894_v0 = vadd.f32 %v7955_v30, %v9772_v18  ;;  %v8011_v6 = vpop.f32.mrb[12].mxu1  ;;  %v1858_v9 = vpop.f32.mrb[13].mxu0  ;;  %8064 = vmatpush3.bf16.msra.mxu0 %v8892_v8 }
 0x16c   : > { %v2394_v10 = vadd.f32 %v8011_v6, %v9772_v18  ;;  %v1892_v12 = vadd.f32 %v9772_v18, %v1858_v9  ;;  %v2358_v19 = vpop.f32.mrb[13].mxu1  ;;  %v7956_v20 = vpop.f32.mrb[14].mxu0  ;;  %8073 = vmatprep.subr.bf16.mxu0 %v9961_v35 }
 0x16d   : > { %v1902_v22 = vmax.f32 %v1894_v0, 0.0  ;;  %v2392_v24 = vadd.f32 %v9772_v18, %v2358_v19  ;;  %v1895_v25 = vadd.f32 %v7956_v20, %v9772_v18  ;;  %v8012_v39 = vpop.f32.mrb[14].mxu1  ;;  %v1861_v40 = vpop.f32.mrb[15].mxu0 }
 0x16e   : > { %v2402_v49 = vmax.f32 %v2394_v10, 0.0  ;;  %v1900_v8 = vmax.f32 %v1892_v12, 0.0  ;;  %v2395_v23 = vadd.f32 %v8012_v39, %v9772_v18  ;;  %v1893_v44 = vadd.f32 %v9772_v18, %v1861_v40  ;;  %v2361_v27 = vpop.f32.mrb[15].mxu1  ;;  %8058 = vmatmul.mubr.msk.bf16.gmra.mrb[20].mxu0 %vm331_vm1, %v2749_v33  ;;  %v9985_v10 = vld [vmem:[#allocation2 + $0x140] sm:$0xff] }
 0x16f   : > { %1911 = vst.msk [vmem:[#allocation2 + $0x180] sm:$0xff] %vm331_vm1, %v1902_v22  ;;  %v2400_v28 = vmax.f32 %v2392_v24, 0.0  ;;  %v1903_v58 = vmax.f32 %v1895_v25, 0.0  ;;  %v2393_v30 = vadd.f32 %v9772_v18, %v2361_v27  ;;  %v2852_v9 = vld [vmem:[#allocation2 + $0x120] sm:$0xff]  ;;  %v10002_v25 = vld [vmem:[#allocation2 + $0x1d0] sm:$0xff]  ;;  %v8894_v27 = vld [vmem:[%s11006_s3 + $0x58] sm:$0xff]  }
 0x170   : > { %2411 = vst.msk [vmem:[#allocation2 + $0x210] sm:$0xff] %vm331_vm1, %v2402_v49  ;;  %1909 = vst.msk [vmem:[#allocation2 + $0x160] sm:$0xff] %vm331_vm1, %v1900_v8  ;;  %v2403_v0 = vmax.f32 %v2395_v23, 0.0  ;;  %v1901_v6 = vmax.f32 %v1893_v44, 0.0  ;;  %v9987_v12 = vld [vmem:[#allocation2 + $0x141] sm:$0xff]  ;;  %v9993_v33 = vld [vmem:[#allocation2 + $0x150] sm:$0xff] }
 0x171   : > { %2409 = vst.msk [vmem:[#allocation2 + $0x1f0] sm:$0xff] %vm331_vm1, %v2400_v28  ;;  %1912 = vst.msk [vmem:[#allocation2 + $0x190] sm:$0xff] %vm331_vm1, %v1903_v58  ;;  %v2401_v19 = vmax.f32 %v2393_v30, 0.0  ;;  %v9991_v20 = vld [vmem:[#allocation2 + $0x130] sm:$0xff]  ;;  %v2861_v44 = vpack.c.bf16 %v9993_v33, %v9985_v10  ;;  %v8895_v58 = vld [vmem:[%s11006_s3 + $0x60] sm:$0xff]  }
 0x172   : > { %v9995_v18 = vld [vmem:[#allocation2 + $0x131] sm:$0xff]  ;;  %2412 = vst.msk [vmem:[#allocation2 + $0x220] sm:$0xff] %vm331_vm1, %v2403_v0  ;;  %1910 = vst.msk [vmem:[#allocation2 + $0x170] sm:$0xff] %vm331_vm1, %v1901_v6  ;;  %v2860_v22 = vpack.c.bf16 %v9991_v20, %v2852_v9  ;;  %v10000_v24 = vld [vmem:[#allocation2 + $0x1c0] sm:$0xff] }
 0x173   : > { %v10004_v39 = vld [vmem:[#allocation2 + $0x1c1] sm:$0xff]  ;;  %2410 = vst.msk [vmem:[#allocation2 + $0x200] sm:$0xff] %vm331_vm1, %v2401_v19  ;;  %v10009_v49 = vld [vmem:[#allocation2 + $0x1d1] sm:$0xff] }
 0x174   : > { %8065 = vmatprep.mubr.msk.bf16.mxu0 %vm331_vm1, %v2860_v22  ;;  %v10027_v30 = vld [vmem:[#allocation2 + $0x151] sm:$0xff]  ;;  %v10032_v6 = vld [vmem:[#allocation2 + $0x1e0] sm:$0xff] }
 0x175   : > { %v2966_v21 = vld [vmem:[#allocation2 + $0x1b0] sm:$0xff]  ;;  %v10071_v62 = vld [vmem:[#allocation2 + $0x1e1] sm:$0xff]  ;;  %v2975_v53 = vpack.c.bf16 %v10032_v6, %v10002_v25 }
 0x176   : > { %8066 = vmatmul.mubr.msk.bf16.vlgmr.msra.gmra.mrb[16].mxu0 %vm331_vm1, %v2861_v44  ;;  %v10036_v19 = vld [vmem:[#allocation2 + $0x180] sm:$0xff] }
 0x177   : > { %8074 = vmatpush3.bf16.msra.mxu0 %v9961_v35  ;;  %v10030_v0 = vld [vmem:[#allocation2 + $0x160] sm:$0xff]  ;;  %v10040_v44 = vld [vmem:[#allocation2 + $0x210] sm:$0xff] }
 0x178   : > { %v10034_v9 = vld [vmem:[#allocation2 + $0x161] sm:$0xff]  ;;  %8075 = vmatprep.subr.bf16.mxu0 %v8894_v27  ;;  %v10038_v22 = vld [vmem:[#allocation2 + $0x1f0] sm:$0xff] }
 0x179   : > { %v10046_v35 = vld [vmem:[#allocation2 + $0x170] sm:$0xff]  ;;  %v10064_v2 = vld [vmem:[#allocation2 + $0x181] sm:$0xff] }
 0x17a   : > { %v10048_v23 = vld [vmem:[#allocation2 + $0x190] sm:$0xff]  ;;  %v2862_v7 = vpack.c.bf16 %v10046_v35, %v10030_v0  ;;  %v10056_v3 = vld [vmem:[#allocation2 + $0x200] sm:$0xff] }
 0x17b   : > { %v10050_v8 = vld [vmem:[#allocation2 + $0x171] sm:$0xff]  ;;  %v10060_v28 = vld [vmem:[#allocation2 + $0x201] sm:$0xff]  ;;  %8076 = vmatpush3.bf16.msra.mxu0 %v8894_v27  ;;  %v2863_v40 = vpack.c.bf16 %v10048_v23, %v10036_v19  ;;  %v2974_v27 = vpack.c.bf16 %v10000_v24, %v2966_v21  ;;  %v2976_v21 = vpack.c.bf16 %v10056_v3, %v10038_v22 }
 0x17c   : > { %v10058_v29 = vld [vmem:[#allocation2 + $0x1f1] sm:$0xff]  ;;  %8069 = vmatprep.mubr.msk.bf16.mxu0 %vm331_vm1, %v2862_v7  ;;  %8085 = vmatprep.subr.bf16.mxu0 %v8895_v58  ;;  %v3080_v16 = vld [vmem:[#allocation2 + $0x121] sm:$0xff] }
 0x17d   : > { %v10073_v60 = vld [vmem:[#allocation2 + $0x211] sm:$0xff]  ;;  %v3088_v14 = vpack.c.bf16 %v9995_v18, %v3080_v16 }
 0x17e   : > { %8070 = vmatmul.mubr.msk.bf16.gmra.mrb[20].mxu0 %vm331_vm1, %v2863_v40  ;;  %v8897_v40 = vld [vmem:[%s11006_s3 + $0x70] sm:$0xff]  }
 0x17f   : > { %8077 = vmatprep.mubr.msk.bf16.mxu0 %vm331_vm1, %v2974_v27  ;;  %v10096_v27 = vld [vmem:[#allocation2 + $0x220] sm:$0xff]  ;;  %v10115_v16 = vld [vmem:[#allocation2 + $0x191] sm:$0xff] }
 0x180   : > { %v2977_v7 = vpack.c.bf16 %v10096_v27, %v10040_v44 }
 0x186   : > { %8078 = vmatmul.mubr.msk.bf16.vlgmr.msra.gmra.mrb[16].mxu0 %vm331_vm1, %v2975_v53  ;;  %v3089_v53 = vpack.c.bf16 %v10027_v30, %v9987_v12 }
 0x187   : > { %8081 = vmatprep.mubr.msk.bf16.mxu0 %vm331_vm1, %v2976_v21  ;;  %8086 = vmatpush3.bf16.msra.mxu0 %v8895_v58  ;;  %v8898_v58 = vld [vmem:[%s11006_s3 + $0x78] sm:$0xff]  }
 0x188   : > { %8087 = vmatprep.subr.bf16.mxu0 %v8896_v57  ;;  %v3194_v21 = vld [vmem:[#allocation2 + $0x1b1] sm:$0xff] }
 0x189   : > { %v3202_v52 = vpack.c.bf16 %v10004_v39, %v3194_v21  ;;  %v11017_v21 = vpack.c.bf16 %v9846_v36, %v9840_v34  ;;  %v11019_v34 = vpack.c.bf16 %v9801_v41, %v9817_v26  ;;  %v8904_v36 = vld [vmem:[%s11006_s3 + $0xa8] sm:$0xff]   ;;  %v8905_v41 = vld [vmem:[%s11006_s3 + $0xb0] sm:$0xff]  }
 0x18a   : > { %v3431_v26 = vld [vmem:[#allocation2 + $0x110] sm:$0xff] }
 0x18b   : > { %8088 = vmatpush3.bf16.msra.mxu0 %v8896_v57  ;;  %v3090_v57 = vpack.c.bf16 %v10050_v8, %v10034_v9 }
 0x18c   : > { %8097 = vmatprep.subr.bf16.mxu0 %v8897_v40 }
 0x18e   : > { %8082 = vmatmul.mubr.msk.bf16.gmra.mrb[20].mxu0 %vm331_vm1, %v2977_v7  ;;  %v3091_v7 = vpack.c.bf16 %v10115_v16, %v10064_v2 }
 0x18f   : > { %8089 = vmatprep.mubr.msk.bf16.mxu0 %vm331_vm1, %v3088_v14  ;;  %v8899_v14 = vld [vmem:[%s11006_s3 + $0x80] sm:$0xff]  }
 0x196   : > { %8090 = vmatmul.mubr.msk.bf16.vlgmr.msra.gmra.mrb[16].mxu0 %vm331_vm1, %v3089_v53  ;;  %v8900_v53 = vld [vmem:[%s11006_s3 + $0x88] sm:$0xff]  }
 0x197   : > { %8093 = vmatprep.mubr.msk.bf16.mxu0 %vm331_vm1, %v3090_v57  ;;  %8098 = vmatpush3.bf16.msra.mxu0 %v8897_v40  ;;  %v3203_v40 = vpack.c.bf16 %v10071_v62, %v10009_v49  ;;  %v10134_v57 = vld [vmem:[#allocation2 + $0x221] sm:$0xff] }
 0x198   : > { %8099 = vmatprep.subr.bf16.mxu0 %v8898_v58 }
 0x19b   : > { %8100 = vmatpush3.bf16.msra.mxu0 %v8898_v58  ;;  %v3204_v58 = vpack.c.bf16 %v10060_v28, %v10058_v29 }
 0x19c   : > { %8109 = vmatprep.subr.bf16.mxu0 %v8899_v14 }
 0x19e   : > { %8094 = vmatmul.mubr.msk.bf16.gmra.mrb[20].mxu0 %vm331_vm1, %v3091_v7  ;;  %v3205_v7 = vpack.c.bf16 %v10134_v57, %v10073_v60 }
 0x19f   : > { %8101 = vmatprep.mubr.msk.bf16.mxu0 %vm331_vm1, %v3202_v52  ;;  %v8901_v52 = vld [vmem:[%s11006_s3 + $0x90] sm:$0xff]  }
 0x1a6   : > { %8102 = vmatmul.mubr.msk.bf16.vlgmr.msra.gmra.mrb[16].mxu0 %vm331_vm1, %v3203_v40  ;;  %v11018_v40 = vpack.c.bf16 %v9856_v51, %v9864_v54  ;;  %v11020_v51 = vpack.c.bf16 %v9852_v46, %v9809_v4  ;;  %v11021_v54 = vpack.c.bf16 %v9854_v48, %v9870_v47  ;;  %v11022_v4 = vpack.c.bf16 %v9805_v45, %v9813_v13  ;;  %v8906_v46 = vld [vmem:[%s11006_s3 + $0xb8] sm:$0xff]   ;;  %v8907_v45 = vld [vmem:[%s11006_s3 + $0xc0] sm:$0xff]  }
 0x1a7   : > { %8105 = vmatprep.mubr.msk.bf16.mxu0 %vm331_vm1, %v3204_v58  ;;  %8110 = vmatpush3.bf16.msra.mxu0 %v8899_v14  ;;  %v8902_v14 = vld [vmem:[%s11006_s3 + $0x98] sm:$0xff]   ;;  %v11023_v48 = vpack.c.bf16 %v9850_v38, %v9848_v37  ;;  %v3545_v13 = vld [vmem:[#allocation2 + $0x81] sm:$0xff]  ;;  %v11025_v37 = vpack.c.bf16 %v9825_v11, %v9819_v32  ;;  %v8909_v32 = vld [vmem:[%s11006_s3 + $0xd0] sm:$0xff]  }
 0x1a8   : > { %8111 = vmatprep.subr.bf16.mxu0 %v8900_v53  ;;  %v3549_v47 = vpack.c.bf16 %v3545_v13, %v9931_v31  ;;  %v8908_v38 = vld [vmem:[%s11006_s3 + $0xc8] sm:$0xff]   ;;  %v3659_v11 = vld [vmem:[#allocation2 + $0x111] sm:$0xff]  ;;  %v8919_v13 = vld [vmem:[%s11008_s5] sm:$0xff]  }
 0x1a9   : > { %v3663_v31 = vpack.c.bf16 %v3659_v11, %v9965_v63  ;;  %v8911_v63 = vld [vmem:[%s11006_s3 + $0xe0] sm:$0xff]  }
 0x1ab   : > { %8112 = vmatpush3.bf16.msra.mxu0 %v8900_v53 }
 0x1ac   : > { %8121 = vmatprep.subr.bf16.mxu0 %v8901_v52 }
 0x1ae   : > { %8106 = vmatmul.mubr.msk.bf16.gmra.mrb[20].mxu0 %vm331_vm1, %v3205_v7 }
 0x1af   : > { %8113 = vmatprep.mubr.msk.bf16.mxu0 %vm331_vm1, %v3317_v42  ;;  %v3320_v42 = vpack.c.bf16 %v3316_v5, %v9912_v15  ;;  %v3435_v15 = vpack.c.bf16 %v3431_v26, %v9862_v17  ;;  %v11024_v17 = vpack.c.bf16 %v9880_v59, %v9866_v55  ;;  %v11026_v55 = vpack.c.bf16 %v9872_v50, %v9882_v61 }
 0x1b0   : > { %v11027_v59 = vpack.c.bf16 %v9888_v1, %v9874_v56  ;;  %v11028_v50 = vpack.c.bf16 %v9985_v10, %v9991_v20  ;;  %v8910_v56 = vld [vmem:[%s11006_s3 + $0xd8] sm:$0xff]   ;;  %v11029_v61 = vpack.c.bf16 %v10030_v0, %v9993_v33  ;;  %v11030_v1 = vpack.c.bf16 %v10036_v19, %v10046_v35  ;;  %v3774_v10 = vld [vmem:[#allocation2 + $0x1a0] sm:$0xff]  ;;  %v8912_v0 = vld [vmem:[%s11006_s3 + $0xe8] sm:$0xff]  }
 0x1b1   : > { %v3778_v20 = vpack.c.bf16 %v3774_v10, %v10048_v23  ;;  %v11031_v33 = vpack.c.bf16 %v10002_v25, %v10000_v24  ;;  %v11032_v19 = vpack.c.bf16 %v10038_v22, %v10032_v6  ;;  %v11033_v23 = vpack.c.bf16 %v10040_v44, %v10056_v3  ;;  %v8913_v24 = vld [vmem:[%s11006_s3 + $0xf0] sm:$0xff]   ;;  %v8914_v3 = vld [vmem:[%s11006_s3 + $0xf8] sm:$0xff]  }
 0x1b2   : > { %v3889_v25 = vld [vmem:[#allocation2 + $0x230] sm:$0xff]  ;;  %v11034_v6 = vpack.c.bf16 %v9987_v12, %v9995_v18  ;;  %v11035_v22 = vpack.c.bf16 %v10034_v9, %v10027_v30  ;;  %v11036_v44 = vpack.c.bf16 %v10064_v2, %v10050_v8  ;;  %v11037_v18 = vmov 0.0  }
 0x1b3   : > { %v3893_v35 = vpack.c.bf16 %v3889_v25, %v10096_v27  ;;  %v4003_v27 = vld [vmem:[#allocation2 + $0x1a1] sm:$0xff]  ;;  %v11038_v30 = vpack.c.bf16 %v10009_v49, %v10004_v39  ;;  %v11039_v2 = vpack.c.bf16 %v10058_v29, %v10071_v62  ;;  %v11040_v8 = vpack.c.bf16 %v10073_v60, %v10060_v28  ;;  %v4117_v9 = vld [vmem:[#allocation2 + $0x231] sm:$0xff]  ;;  %4252 = vst.msk [vmem:[#allocation3 + $0x20] sm:$0xff] %vm4247_vm3, %v11037_v18  ;;  %v7106_v49 = vld [vmem:[%s11007_s4] ss:$0 sm:$0xff] }
 0x1b4   : > { %v4007_v12 = vpack.c.bf16 %v4003_v27, %v10115_v16  ;;  %v4121_v16 = vpack.c.bf16 %v4117_v9, %v10134_v57  ;;  %4248 = vst.msk [vmem:[#allocation3] sm:$0xff] %vm4247_vm3, %v11037_v18  ;;  %4249 = vst.msk [vmem:[#allocation3 + $0x8] sm:$0xff] %vm4247_vm3, %v11037_v18  ;;  %v8915_v29 = vld [vmem:[%s11008_s5 + $0x20] sm:$0xff]   ;;  %v8916_v60 = vld [vmem:[%s11008_s5 + $0x28] sm:$0xff]   ;;  %8213 = vmatprep.mubr.msk.bf16.mxu1 %vm9080_vm4, %v11037_v18 }
 0x1b5   : > { %4250 = vst.msk [vmem:[#allocation3 + $0x10] sm:$0xff] %vm4247_vm3, %v11037_v18  ;;  %4251 = vst.msk [vmem:[#allocation3 + $0x18] sm:$0xff] %vm4247_vm3, %v11037_v18  ;;  %8206 = vmatpush3.bf16.msra.mxu1 %v8915_v29  ;;  %v8917_v62 = vld [vmem:[%s11008_s5 + $0x30] sm:$0xff]   ;;  %v8918_v39 = vld [vmem:[%s11008_s5 + $0x38] sm:$0xff]  }
 0x1b6   : > { %8114 = vmatmul.mubr.msk.bf16.vlgmr.msra.gmra.mrb[16].mxu0 %vm331_vm1, %v11017_v21  ;;  %4253 = vst.msk [vmem:[#allocation3 + $0x28] sm:$0xff] %vm4247_vm3, %v11037_v18  ;;  %4254 = vst.msk [vmem:[#allocation3 + $0x30] sm:$0xff] %vm4247_vm3, %v11037_v18  ;;  %8207 = vmatprep.subr.bf16.mxu1 %v11037_v18 }
 0x1b7   : > { %8117 = vmatprep.mubr.msk.bf16.mxu0 %vm331_vm1, %v11018_v40  ;;  %8122 = vmatpush3.bf16.msra.mxu0 %v8901_v52  ;;  %4255 = vst.msk [vmem:[#allocation3 + $0x38] sm:$0xff] %vm4247_vm3, %v11037_v18  ;;  %4256 = vst.msk [vmem:[#allocation3 + $0x40] sm:$0xff] %vm4247_vm3, %v11037_v18 }
 0x1b8   : > { %8123 = vmatprep.subr.bf16.mxu0 %v8902_v14  ;;  %4257 = vst.msk [vmem:[#allocation3 + $0x48] sm:$0xff] %vm4247_vm3, %v11037_v18  ;;  %4258 = vst.msk [vmem:[#allocation3 + $0x50] sm:$0xff] %vm4247_vm3, %v11037_v18 }
 0x1b9   : > { %4259 = vst.msk [vmem:[#allocation3 + $0x58] sm:$0xff] %vm4247_vm3, %v11037_v18  ;;  %4260 = vst.msk [vmem:[#allocation3 + $0x60] sm:$0xff] %vm4247_vm3, %v11037_v18  ;;  %8208 = vmatpush3.bf16.msra.mxu1 %v8916_v60  ;;  %v8927_v60 = vld [vmem:[%s11008_s5 + $0x60] sm:$0xff]  }
 0x1ba   : > { %4261 = vst.msk [vmem:[#allocation3 + $0x68] sm:$0xff] %vm4247_vm3, %v11037_v18  ;;  %4262 = vst.msk [vmem:[#allocation3 + $0x70] sm:$0xff] %vm4247_vm3, %v11037_v18  ;;  %8209 = vmatprep.subr.bf16.mxu1 %v11037_v18 }
 0x1bb   : > { %8124 = vmatpush3.bf16.msra.mxu0 %v8902_v14  ;;  %4263 = vst.msk [vmem:[#allocation3 + $0x78] sm:$0xff] %vm4247_vm3, %v11037_v18 }
 0x1bc   : > { %8133 = vmatprep.subr.bf16.mxu0 %v8903_v43 }
 0x1bd   : > { %8210 = vmatpush3.bf16.msra.mxu1 %v8917_v62 }
 0x1be   : > { %8118 = vmatmul.mubr.msk.bf16.gmra.mrb[20].mxu0 %vm331_vm1, %v3320_v42  ;;  %8211 = vmatprep.subr.bf16.mxu1 %v11037_v18 }
 0x1bf   : > { %8125 = vmatprep.mubr.msk.bf16.mxu0 %vm331_vm1, %v11019_v34 }
 0x1c1   : > { %8212 = vmatpush3.bf16.msra.mxu1 %v8918_v39  ;;  %v8928_v39 = vld [vmem:[%s11008_s5 + $0x68] sm:$0xff]  }
 0x1c2   : > { %8225 = vmatprep.subr.bf16.mxu1 %v11037_v18 }
 0x1c6   : > { %8126 = vmatmul.mubr.msk.bf16.vlgmr.msra.gmra.mrb[16].mxu0 %vm331_vm1, %v11020_v51 }
 0x1c7   : > { %8129 = vmatprep.mubr.msk.bf16.mxu0 %vm331_vm1, %v11021_v54  ;;  %8134 = vmatpush3.bf16.msra.mxu0 %v8903_v43 }
 0x1c8   : > { %8135 = vmatprep.subr.bf16.mxu0 %v8904_v36 }
 0x1cb   : > { %8136 = vmatpush3.bf16.msra.mxu0 %v8904_v36 }
 0x1cc   : > { %8145 = vmatprep.subr.bf16.mxu0 %v8905_v41 }
 0x1ce   : > { %8130 = vmatmul.mubr.msk.bf16.gmra.mrb[20].mxu0 %vm331_vm1, %v3435_v15 }
 0x1cf   : > { %8137 = vmatprep.mubr.msk.bf16.mxu0 %vm331_vm1, %v11022_v4 }
 0x1d6   : > { %8138 = vmatmul.mubr.msk.bf16.vlgmr.msra.gmra.mrb[16].mxu0 %vm331_vm1, %v11023_v48 }
 0x1d7   : > { %8141 = vmatprep.mubr.msk.bf16.mxu0 %vm331_vm1, %v11024_v17  ;;  %8146 = vmatpush3.bf16.msra.mxu0 %v8905_v41 }
 0x1d8   : > { %8147 = vmatprep.subr.bf16.mxu0 %v8906_v46 }
 0x1db   : > { %8148 = vmatpush3.bf16.msra.mxu0 %v8906_v46 }
 0x1dc   : > { %8157 = vmatprep.subr.bf16.mxu0 %v8907_v45 }
 0x1de   : > { %8142 = vmatmul.mubr.msk.bf16.gmra.mrb[20].mxu0 %vm331_vm1, %v3549_v47 }
 0x1df   : > { %8149 = vmatprep.mubr.msk.bf16.mxu0 %vm331_vm1, %v11025_v37 }
 0x1e6   : > { %8150 = vmatmul.mubr.msk.bf16.vlgmr.msra.gmra.mrb[16].mxu0 %vm331_vm1, %v11026_v55 }
 0x1e7   : > { %8153 = vmatprep.mubr.msk.bf16.mxu0 %vm331_vm1, %v11027_v59  ;;  %8158 = vmatpush3.bf16.msra.mxu0 %v8907_v45 }
 0x1e8   : > { %8159 = vmatprep.subr.bf16.mxu0 %v8908_v38 }
 0x1eb   : > { %8160 = vmatpush3.bf16.msra.mxu0 %v8908_v38 }
 0x1ec   : > { %8169 = vmatprep.subr.bf16.mxu0 %v8909_v32 }
 0x1ee   : > { %8154 = vmatmul.mubr.msk.bf16.gmra.mrb[20].mxu0 %vm331_vm1, %v3663_v31 }
 0x1ef   : > { %8161 = vmatprep.mubr.msk.bf16.mxu0 %vm331_vm1, %v11028_v50  ;;  %v8920_v50 = vld [vmem:[%s11008_s5 + $0x8] sm:$0xff]  }
 0x1f6   : > { %8162 = vmatmul.mubr.msk.bf16.vlgmr.msra.gmra.mrb[16].mxu0 %vm331_vm1, %v11029_v61 }
 0x1f7   : > { %8165 = vmatprep.mubr.msk.bf16.mxu0 %vm331_vm1, %v11030_v1  ;;  %8170 = vmatpush3.bf16.msra.mxu0 %v8909_v32 }
 0x1f8   : > { %8171 = vmatprep.subr.bf16.mxu0 %v8910_v56 }
 0x1fb   : > { %8172 = vmatpush3.bf16.msra.mxu0 %v8910_v56 }
 0x1fc   : > { %8181 = vmatprep.subr.bf16.mxu0 %v8911_v63 }
 0x1fe   : > { %8166 = vmatmul.mubr.msk.bf16.gmra.mrb[20].mxu0 %vm331_vm1, %v3778_v20 }
 0x1ff   : > { %8173 = vmatprep.mubr.msk.bf16.mxu0 %vm331_vm1, %v11031_v33  ;;  %v8921_v33 = vld [vmem:[%s11008_s5 + $0x10] sm:$0xff]  }
 0x206   : > { %8174 = vmatmul.mubr.msk.bf16.vlgmr.msra.gmra.mrb[16].mxu0 %vm331_vm1, %v11032_v19  ;;  %v8922_v19 = vld [vmem:[%s11008_s5 + $0x18] sm:$0xff]  }
 0x207   : > { %8177 = vmatprep.mubr.msk.bf16.mxu0 %vm331_vm1, %v11033_v23  ;;  %8182 = vmatpush3.bf16.msra.mxu0 %v8911_v63 }
 0x208   : > { %8183 = vmatprep.subr.bf16.mxu0 %v8912_v0 }
 0x20b   : > { %8184 = vmatpush3.bf16.msra.mxu0 %v8912_v0 }
 0x20c   : > { %8193 = vmatprep.subr.bf16.mxu0 %v8913_v24 }
 0x20e   : > { %8178 = vmatmul.mubr.msk.bf16.gmra.mrb[20].mxu0 %vm331_vm1, %v3893_v35 }
 0x20f   : > { %8185 = vmatprep.mubr.msk.bf16.mxu0 %vm331_vm1, %v11034_v6  ;;  %v8923_v6 = vld [vmem:[%s11008_s5 + $0x40] sm:$0xff]  }
 0x216   : > { %8186 = vmatmul.mubr.msk.bf16.vlgmr.msra.gmra.mrb[16].mxu0 %vm331_vm1, %v11035_v22  ;;  %v8924_v22 = vld [vmem:[%s11008_s5 + $0x48] sm:$0xff]  }
 0x217   : > { %8189 = vmatprep.mubr.msk.bf16.mxu0 %vm331_vm1, %v11036_v44  ;;  %8194 = vmatpush3.bf16.msra.mxu0 %v8913_v24 }
 0x218   : > { %8195 = vmatprep.subr.bf16.mxu0 %v8914_v3 }
 0x21b   : > { %8196 = vmatpush3.bf16.msra.mxu0 %v8914_v3 }
 0x21c   : > { %8421 = vmatprep.subr.bf16.mxu0 %v11037_v18 }
 0x21e   : > { %8190 = vmatmul.mubr.msk.bf16.gmra.mrb[20].mxu0 %vm331_vm1, %v4007_v12  ;;  %v8925_v12 = vld [vmem:[%s11008_s5 + $0x50] sm:$0xff]  }
 0x21f   : > { %8197 = vmatprep.mubr.msk.bf16.mxu0 %vm331_vm1, %v11038_v30 }
 0x226   : > { %8198 = vmatmul.mubr.msk.bf16.vlgmr.msra.gmra.mrb[16].mxu0 %vm331_vm1, %v11039_v2  ;;  %v8926_v2 = vld [vmem:[%s11008_s5 + $0x58] sm:$0xff]  }
 0x227   : > { %8201 = vmatprep.mubr.msk.bf16.mxu0 %vm331_vm1, %v11040_v8 }
 0x22e   : > { %8202 = vmatmul.mubr.msk.bf16.gmra.mrb[20].mxu0 %vm331_vm1, %v4121_v16 }
 0x22f   : > { %8429 = vmatprep.mubr.msk.bf16.mxu0 %vm9080_vm4, %v11037_v18 }
 0x2f9   : > { %v8199_v28 = vpop.f32.mrb[16].mxu0 }
 0x2fa   : > { %v4233_v53 = vadd.f32 %v8199_v28, %v7106_v49  ;;  %v4185_v58 = vpop.f32.mrb[17].mxu0 }
 0x2fb   : > { %v4231_v52 = vadd.f32 %v7106_v49, %v4185_v58  ;;  %v8200_v57 = vpop.f32.mrb[18].mxu0 }
 0x2fc   : > { %v4241_v7 = vmax.f32 %v4233_v53, 0.0  ;;  %v4234_v14 = vadd.f32 %v8200_v57, %v7106_v49  ;;  %v4188_v21 = vpop.f32.mrb[19].mxu0  ;;  %v8930_v53 = vld [vmem:[%s11008_s5 + $0x78] sm:$0xff]   ;;  %v8931_v57 = vld [vmem:[%s11008_s5 + $0x80] sm:$0xff]  }
 0x2fd   : > { %v4239_v40 = vmax.f32 %v4231_v52, 0.0  ;;  %v4232_v43 = vadd.f32 %v7106_v49, %v4188_v21  ;;  %v8933_v21 = vld [vmem:[%s11008_s5 + $0x90] sm:$0xff]  }
 0x2fe   : > { %4266 = vst.msk [vmem:[#allocation3 + $0x20] sm:$0xff] %vm4247_vm3, %v4241_v7  ;;  %v4242_v5 = vmax.f32 %v4234_v14, 0.0  ;;  %v8932_v14 = vld [vmem:[%s11008_s5 + $0x88] sm:$0xff]  }
 0x2ff   : > { %4264 = vst.msk [vmem:[#allocation3] sm:$0xff] %vm4247_vm3, %v4239_v40  ;;  %v4240_v42 = vmax.f32 %v4232_v43, 0.0  ;;  %v8934_v43 = vld [vmem:[%s11008_s5 + $0x98] sm:$0xff]  }
 0x300   : > { %4267 = vst.msk [vmem:[#allocation3 + $0x30] sm:$0xff] %vm4247_vm3, %v4242_v5 }
 0x301   : > { %4265 = vst.msk [vmem:[#allocation3 + $0x10] sm:$0xff] %vm4247_vm3, %v4240_v42  ;;  %v8203_v34 = vpop.f32.mrb[20].mxu0 }
 0x302   : > { %v4237_v36 = vadd.f32 %v8203_v34, %v7106_v49  ;;  %v4201_v51 = vpop.f32.mrb[21].mxu0  ;;  %v8935_v34 = vld [vmem:[%s11008_s5 + $0xa0] sm:$0xff]  }
 0x303   : > { %v4235_v54 = vadd.f32 %v7106_v49, %v4201_v51  ;;  %v8204_v41 = vpop.f32.mrb[22].mxu0  ;;  %v8937_v51 = vld [vmem:[%s11008_s5 + $0xb0] sm:$0xff]  }
 0x304   : > { %v4245_v26 = vmax.f32 %v4237_v36, 0.0  ;;  %v4238_v15 = vadd.f32 %v8204_v41, %v7106_v49  ;;  %v4204_v4 = vpop.f32.mrb[23].mxu0  ;;  %v8936_v36 = vld [vmem:[%s11008_s5 + $0xa8] sm:$0xff]  }
 0x305   : > { %v4243_v46 = vmax.f32 %v4235_v54, 0.0  ;;  %v4236_v48 = vadd.f32 %v7106_v49, %v4204_v4  ;;  %v10362_v59 = vld [vmem:[#allocation3 + $0x21] sm:$0xff]  ;;  %v8929_v49 = vld [vmem:[%s11008_s5 + $0x70] sm:$0xff]   ;;  %v8938_v54 = vld [vmem:[%s11008_s5 + $0xb8] sm:$0xff]  }
 0x306   : > { %4270 = vst.msk [vmem:[#allocation3 + $0x60] sm:$0xff] %vm4247_vm3, %v4245_v26  ;;  %v4246_v17 = vmax.f32 %v4238_v15, 0.0  ;;  %v4289_v47 = vld [vmem:[#allocation3 + $0x1] sm:$0xff] }
 0x307   : > { %4268 = vst.msk [vmem:[#allocation3 + $0x40] sm:$0xff] %vm4247_vm3, %v4243_v46  ;;  %v4244_v45 = vmax.f32 %v4236_v48, 0.0  ;;  %v10364_v32 = vld [vmem:[#allocation3 + $0x22] sm:$0xff]  ;;  %v10377_v56 = vld [vmem:[#allocation3 + $0x31] sm:$0xff] }
 0x308   : > { %4271 = vst.msk [vmem:[#allocation3 + $0x70] sm:$0xff] %vm4247_vm3, %v4246_v17  ;;  %v10356_v37 = vld [vmem:[#allocation3 + $0x11] sm:$0xff]  ;;  %v10394_v0 = vpack.c.bf16 %v10377_v56, %v10362_v59  ;;  %v4272_v35 = vld [vmem:[#allocation3] sm:$0xff]  ;;  %v8940_v4 = vld [vmem:[%s11008_s5 + $0xc8] sm:$0xff]  }
 0x309   : > { %v10358_v38 = vld [vmem:[#allocation3 + $0x12] sm:$0xff]  ;;  %4269 = vst.msk [vmem:[#allocation3 + $0x50] sm:$0xff] %vm4247_vm3, %v4244_v45  ;;  %v4295_v55 = vpack.c.bf16 %v10356_v37, %v4289_v47  ;;  %v4722_v11 = vpack.c.bf16 %v10362_v59, %v10356_v37  ;;  %v4274_v27 = vld [vmem:[#allocation3 + $0x20] sm:$0xff]  ;;  %v8944_v47 = vld [vmem:[%s11008_s5 + $0xe8] sm:$0xff]  }
 0x30a   : > { %v4836_v31 = vpack.c.bf16 %v10364_v32, %v10358_v38  ;;  %v10381_v1 = vld [vmem:[#allocation3 + $0x32] sm:$0xff]  ;;  %v4487_v29 = vld [vmem:[#allocation3 + $0x2] sm:$0xff] }
 0x30b   : > { %8214 = vmatmul.mubr.msk.bf16.vlgmr.msra.gmra.mrb[16].mxu1 %vm4247_vm3, %v4295_v55  ;;  %v4273_v25 = vld [vmem:[#allocation3 + $0x10] sm:$0xff]  ;;  %v4493_v62 = vpack.c.bf16 %v10358_v38, %v4487_v29  ;;  %v10463_v28 = vpack.c.bf16 %v10381_v1, %v10364_v32  ;;  %v8939_v15 = vld [vmem:[%s11008_s5 + $0xc0] sm:$0xff]   ;;  %v8942_v48 = vld [vmem:[%s11008_s5 + $0xd8] sm:$0xff]  }
 0x30c   : > { %8226 = vmatpush3.bf16.msra.mxu1 %v8919_v13  ;;  %8217 = vmatprep.mubr.msk.bf16.mxu1 %vm9080_vm4, %v11037_v18  ;;  %v4278_v3 = vpack.c.bf16 %v4273_v25, %v4272_v35  ;;  %v4275_v44 = vld [vmem:[#allocation3 + $0x30] sm:$0xff]  ;;  %v4608_v7 = vpack.c.bf16 %v4274_v27, %v4273_v25  ;;  %v8943_v13 = vld [vmem:[%s11008_s5 + $0xe0] sm:$0xff]   ;;  %v8946_v38 = vld [vmem:[%s11008_s5 + $0xf8] sm:$0xff]  }
 0x30d   : > { %8227 = vmatprep.subr.bf16.mxu1 %v11037_v18  ;;  %v10429_v30 = vpack.c.bf16 %v4275_v44, %v4274_v27  ;;  %v10506_v5 = vld [vmem:[#allocation3 + $0x60] sm:$0xff]  ;;  %v8941_v46 = vld [vmem:[%s11008_s5 + $0xd0] sm:$0xff]  }
 0x30e   : > { %v10379_v61 = vld [vmem:[#allocation3 + $0x41] sm:$0xff]  ;;  %v8945_v37 = vld [vmem:[%s11008_s5 + $0xf0] sm:$0xff]  }
 0x30f   : > { %v10383_v63 = vld [vmem:[#allocation3 + $0x42] sm:$0xff]  ;;  %v4723_v10 = vpack.c.bf16 %v10379_v61, %v10377_v56  ;;  %v4950_v55 = vld [vmem:[#allocation3 + $0x70] sm:$0xff] }
 0x310   : > { %v4837_v20 = vpack.c.bf16 %v10383_v63, %v10381_v1  ;;  %8228 = vmatpush3.bf16.msra.mxu1 %v8920_v50  ;;  %v10405_v23 = vld [vmem:[#allocation3 + $0x51] sm:$0xff]  ;;  %v4276_v9 = vld [vmem:[#allocation3 + $0x40] sm:$0xff]  ;;  %v4953_v59 = vpack.c.bf16 %v4950_v55, %v10506_v5 }
 0x311   : > { %8229 = vmatprep.subr.bf16.mxu1 %v11037_v18  ;;  %v10409_v24 = vpack.c.bf16 %v10405_v23, %v10379_v61  ;;  %v4277_v8 = vld [vmem:[#allocation3 + $0x50] sm:$0xff]  ;;  %v4609_v40 = vpack.c.bf16 %v4276_v9, %v4275_v44  ;;  %v10540_v41 = vld [vmem:[#allocation3 + $0x61] sm:$0xff]  ;;  %v8950_v50 = vld [vmem:[%s11008_s5 + $0x118] sm:$0xff]  }
 0x312   : > { %v10440_v16 = vpack.c.bf16 %v4277_v8, %v4276_v9  ;;  %v10474_v58 = vld [vmem:[#allocation3 + $0x52] sm:$0xff]  ;;  %v4610_v42 = vpack.c.bf16 %v10506_v5, %v4277_v8  ;;  %v4724_v26 = vpack.c.bf16 %v10540_v41, %v10405_v23  ;;  %v4835_v17 = vld [vmem:[#allocation3 + $0x62] sm:$0xff] }
 0x313   : > { %8218 = vmatmul.mubr.msk.bf16.gmra.mrb[20].mxu1 %vm4247_vm3, %v10394_v0  ;;  %v10478_v52 = vpack.c.bf16 %v10474_v58, %v10383_v63  ;;  %v4838_v45 = vpack.c.bf16 %v4835_v17, %v10474_v58  ;;  %v8947_v32 = vld [vmem:[%s11008_s5 + $0x100] sm:$0xff]   ;;  %v5064_v56 = vld [vmem:[#allocation3 + $0x71] sm:$0xff] }
 0x314   : > { %8230 = vmatpush3.bf16.msra.mxu1 %v8921_v33  ;;  %8221 = vmatprep.mubr.msk.bf16.mxu1 %vm9080_vm4, %v11037_v18  ;;  %v5067_v61 = vpack.c.bf16 %v5064_v56, %v10540_v41  ;;  %v5178_v1 = vld [vmem:[#allocation3 + $0x72] sm:$0xff] }
 0x315   : > { %8231 = vmatprep.subr.bf16.mxu1 %v11037_v18  ;;  %v5181_v63 = vpack.c.bf16 %v5178_v1, %v4835_v17  ;;  %v8954_v17 = vld [vmem:[%s11010_s7 + $0x68] sm:$0xff]  }
 0x318   : > { %8232 = vmatpush3.bf16.msra.mxu1 %v8922_v19 }
 0x319   : > { %8245 = vmatprep.subr.bf16.mxu1 %v11037_v18 }
 0x31b   : > { %8222 = vmatmul.mubr.msk.bf16.gmra.mrb[24].mxu1 %vm4247_vm3, %v10409_v24 }
 0x31c   : > { %8233 = vmatprep.mubr.msk.bf16.mxu1 %vm9080_vm4, %v11037_v18 }
 0x323   : > { %8234 = vmatmul.mubr.msk.bf16.vlgmr.msra.gmra.mrb[28].mxu1 %vm4247_vm3, %v4278_v3 }
 0x324   : > { %8246 = vmatpush3.bf16.msra.mxu1 %v8923_v6  ;;  %8237 = vmatprep.mubr.msk.bf16.mxu1 %vm9080_vm4, %v11037_v18 }
 0x325   : > { %8247 = vmatprep.subr.bf16.mxu1 %v11037_v18 }
 0x328   : > { %8248 = vmatpush3.bf16.msra.mxu1 %v8924_v22 }
 0x329   : > { %8249 = vmatprep.subr.bf16.mxu1 %v11037_v18 }
 0x32b   : > { %8238 = vmatmul.mubr.msk.bf16.gmra.mrb[32].mxu1 %vm4247_vm3, %v10429_v30 }
 0x32c   : > { %8250 = vmatpush3.bf16.msra.mxu1 %v8925_v12  ;;  %8241 = vmatprep.mubr.msk.bf16.mxu1 %vm9080_vm4, %v11037_v18 }
 0x32d   : > { %8251 = vmatprep.subr.bf16.mxu1 %v11037_v18 }
 0x330   : > { %8252 = vmatpush3.bf16.msra.mxu1 %v8926_v2 }
 0x331   : > { %8265 = vmatprep.subr.bf16.mxu1 %v11037_v18 }
 0x333   : > { %8242 = vmatmul.mubr.msk.bf16.gmra.mrb[36].mxu1 %vm4247_vm3, %v10440_v16 }
 0x334   : > { %8253 = vmatprep.mubr.msk.bf16.mxu1 %vm9080_vm4, %v11037_v18 }
 0x33b   : > { %8254 = vmatmul.mubr.msk.bf16.vlgmr.msra.gmra.mrb[40].mxu1 %vm4247_vm3, %v4493_v62 }
 0x33c   : > { %8266 = vmatpush3.bf16.msra.mxu1 %v8927_v60  ;;  %8257 = vmatprep.mubr.msk.bf16.mxu1 %vm9080_vm4, %v11037_v18 }
 0x33d   : > { %8267 = vmatprep.subr.bf16.mxu1 %v11037_v18 }
 0x340   : > { %8268 = vmatpush3.bf16.msra.mxu1 %v8928_v39 }
 0x341   : > { %8269 = vmatprep.subr.bf16.mxu1 %v11037_v18 }
 0x343   : > { %8258 = vmatmul.mubr.msk.bf16.gmra.mrb[44].mxu1 %vm4247_vm3, %v10463_v28 }
 0x344   : > { %8270 = vmatpush3.bf16.msra.mxu1 %v8929_v49  ;;  %8261 = vmatprep.mubr.msk.bf16.mxu1 %vm9080_vm4, %v11037_v18 }
 0x345   : > { %8271 = vmatprep.subr.bf16.mxu1 %v11037_v18 }
 0x348   : > { %8272 = vmatpush3.bf16.msra.mxu1 %v8930_v53 }
 0x349   : > { %8285 = vmatprep.subr.bf16.mxu1 %v11037_v18 }
 0x34b   : > { %8262 = vmatmul.mubr.msk.bf16.gmra.mrb[48].mxu1 %vm4247_vm3, %v10478_v52 }
 0x34c   : > { %8273 = vmatprep.mubr.msk.bf16.mxu1 %vm9080_vm4, %v11037_v18 }
 0x353   : > { %8274 = vmatmul.mubr.msk.bf16.vlgmr.msra.gmra.mrb[52].mxu1 %vm4247_vm3, %v4608_v7 }
 0x354   : > { %8286 = vmatpush3.bf16.msra.mxu1 %v8931_v57  ;;  %8277 = vmatprep.mubr.msk.bf16.mxu1 %vm9080_vm4, %v11037_v18 }
 0x355   : > { %8287 = vmatprep.subr.bf16.mxu1 %v11037_v18 }
 0x358   : > { %8288 = vmatpush3.bf16.msra.mxu1 %v8932_v14 }
 0x359   : > { %8289 = vmatprep.subr.bf16.mxu1 %v11037_v18 }
 0x35b   : > { %8278 = vmatmul.mubr.msk.bf16.gmra.mrb[56].mxu1 %vm4247_vm3, %v4609_v40 }
 0x35c   : > { %8290 = vmatpush3.bf16.msra.mxu1 %v8933_v21  ;;  %8281 = vmatprep.mubr.msk.bf16.mxu1 %vm9080_vm4, %v11037_v18 }
 0x35d   : > { %8291 = vmatprep.subr.bf16.mxu1 %v11037_v18 }
 0x360   : > { %8292 = vmatpush3.bf16.msra.mxu1 %v8934_v43 }
 0x361   : > { %8305 = vmatprep.subr.bf16.mxu1 %v11037_v18 }
 0x363   : > { %8282 = vmatmul.mubr.msk.bf16.gmra.mrb[60].mxu1 %vm4247_vm3, %v4610_v42 }
 0x364   : > { %8293 = vmatprep.mubr.msk.bf16.mxu1 %vm9080_vm4, %v11037_v18 }
 0x36b   : > { %8294 = vmatmul.mubr.msk.bf16.vlgmr.msra.gmra.mrb[64].mxu1 %vm4247_vm3, %v4722_v11  ;;  %v8948_v11 = vld [vmem:[%s11008_s5 + $0x108] sm:$0xff]  }
 0x36c   : > { %8306 = vmatpush3.bf16.msra.mxu1 %v8935_v34  ;;  %8297 = vmatprep.mubr.msk.bf16.mxu1 %vm9080_vm4, %v11037_v18 }
 0x36d   : > { %8307 = vmatprep.subr.bf16.mxu1 %v11037_v18 }
 0x370   : > { %8308 = vmatpush3.bf16.msra.mxu1 %v8936_v36 }
 0x371   : > { %8309 = vmatprep.subr.bf16.mxu1 %v11037_v18 }
 0x373   : > { %8298 = vmatmul.mubr.msk.bf16.gmra.mrb[68].mxu1 %vm4247_vm3, %v4723_v10 }
 0x374   : > { %8310 = vmatpush3.bf16.msra.mxu1 %v8937_v51  ;;  %8301 = vmatprep.mubr.msk.bf16.mxu1 %vm9080_vm4, %v11037_v18 }
 0x375   : > { %8311 = vmatprep.subr.bf16.mxu1 %v11037_v18 }
 0x378   : > { %8312 = vmatpush3.bf16.msra.mxu1 %v8938_v54  ;;  %v8951_v54 = vld [vmem:[%s11010_s7 + $0x20] sm:$0xff]  }
 0x379   : > { %8325 = vmatprep.subr.bf16.mxu1 %v11037_v18 }
 0x37b   : > { %8302 = vmatmul.mubr.msk.bf16.gmra.mrb[72].mxu1 %vm4247_vm3, %v4724_v26 }
 0x37c   : > { %8313 = vmatprep.mubr.msk.bf16.mxu1 %vm9080_vm4, %v11037_v18 }
 0x383   : > { %8314 = vmatmul.mubr.msk.bf16.vlgmr.msra.gmra.mrb[76].mxu1 %vm4247_vm3, %v4836_v31  ;;  %v8949_v31 = vld [vmem:[%s11008_s5 + $0x110] sm:$0xff]  }
 0x384   : > { %8326 = vmatpush3.bf16.msra.mxu1 %v8939_v15  ;;  %8317 = vmatprep.mubr.msk.bf16.mxu1 %vm9080_vm4, %v11037_v18 }
 0x385   : > { %8327 = vmatprep.subr.bf16.mxu1 %v11037_v18 }
 0x388   : > { %8328 = vmatpush3.bf16.msra.mxu1 %v8940_v4 }
 0x389   : > { %8329 = vmatprep.subr.bf16.mxu1 %v11037_v18 }
 0x38b   : > { %8318 = vmatmul.mubr.msk.bf16.gmra.mrb[80].mxu1 %vm4247_vm3, %v4837_v20 }
 0x38c   : > { %8330 = vmatpush3.bf16.msra.mxu1 %v8941_v46  ;;  %8321 = vmatprep.mubr.msk.bf16.mxu1 %vm9080_vm4, %v11037_v18  ;;  %v8953_v46 = vld [vmem:[%s11010_s7 + $0x60] sm:$0xff]  }
 0x38d   : > { %8331 = vmatprep.subr.bf16.mxu1 %v11037_v18  ;;  %8422 = vmatpush3.bf16.msra.mxu0 %v8953_v46 }
 0x38e   : > { %8423 = vmatprep.subr.bf16.mxu0 %v11037_v18 }
 0x390   : > { %8332 = vmatpush3.bf16.msra.mxu1 %v8942_v48  ;;  %v8952_v48 = vld [vmem:[%s11010_s7 + $0x28] sm:$0xff]  }
 0x391   : > { %8345 = vmatprep.subr.bf16.mxu1 %v11037_v18  ;;  %8424 = vmatpush3.bf16.msra.mxu0 %v8954_v17 }
 0x392   : > { %8425 = vmatprep.subr.bf16.mxu0 %v11037_v18 }
 0x393   : > { %8322 = vmatmul.mubr.msk.bf16.gmra.mrb[84].mxu1 %vm4247_vm3, %v4838_v45 }
 0x394   : > { %8333 = vmatprep.mubr.msk.bf16.mxu1 %vm9080_vm4, %v11037_v18 }
 0x39b   : > { %8334 = vmatmul.mubr.msk.bf16.vlgmr.msra.gmra.mrb[88].mxu1 %vm4247_vm3, %v10429_v30 }
 0x39c   : > { %8346 = vmatpush3.bf16.msra.mxu1 %v8943_v13  ;;  %8337 = vmatprep.mubr.msk.bf16.mxu1 %vm9080_vm4, %v11037_v18 }
 0x39d   : > { %8347 = vmatprep.subr.bf16.mxu1 %v11037_v18 }
 0x3a0   : > { %8348 = vmatpush3.bf16.msra.mxu1 %v8944_v47 }
 0x3a1   : > { %8349 = vmatprep.subr.bf16.mxu1 %v11037_v18 }
 0x3a3   : > { %8338 = vmatmul.mubr.msk.bf16.gmra.mrb[92].mxu1 %vm4247_vm3, %v10440_v16 }
 0x3a4   : > { %8350 = vmatpush3.bf16.msra.mxu1 %v8945_v37  ;;  %8341 = vmatprep.mubr.msk.bf16.mxu1 %vm9080_vm4, %v11037_v18  ;;  %v8955_v37 = vld [vmem:[%s11010_s7 + $0x30] sm:$0xff]  }
 0x3a5   : > { %8351 = vmatprep.subr.bf16.mxu1 %v11037_v18 }
 0x3a8   : > { %8352 = vmatpush3.bf16.msra.mxu1 %v8946_v38 }
 0x3a9   : > { %8365 = vmatprep.subr.bf16.mxu1 %v11037_v18 }
 0x3ab   : > { %8342 = vmatmul.mubr.msk.bf16.gmra.mrb[96].mxu1 %vm4247_vm3, %v4953_v59 }
 0x3ac   : > { %8353 = vmatprep.mubr.msk.bf16.mxu1 %vm9080_vm4, %v11037_v18 }
 0x3b3   : > { %8354 = vmatmul.mubr.msk.bf16.vlgmr.msra.gmra.mrb[100].mxu1 %vm4247_vm3, %v10394_v0 }
 0x3b4   : > { %8366 = vmatpush3.bf16.msra.mxu1 %v8947_v32  ;;  %8357 = vmatprep.mubr.msk.bf16.mxu1 %vm9080_vm4, %v11037_v18  ;;  %v8956_v32 = vld [vmem:[%s11010_s7 + $0x70] sm:$0xff]  }
 0x3b5   : > { %8367 = vmatprep.subr.bf16.mxu1 %v11037_v18  ;;  %8426 = vmatpush3.bf16.msra.mxu0 %v8956_v32 }
 0x3b6   : > { %8427 = vmatprep.subr.bf16.mxu0 %v11037_v18 }
 0x3b8   : > { %8368 = vmatpush3.bf16.msra.mxu1 %v8948_v11  ;;  %v8957_v11 = vld [vmem:[%s11010_s7 + $0x38] sm:$0xff]  }
 0x3b9   : > { %8369 = vmatprep.subr.bf16.mxu1 %v11037_v18 }
 0x3bb   : > { %8358 = vmatmul.mubr.msk.bf16.gmra.mrb[104].mxu1 %vm4247_vm3, %v10409_v24 }
 0x3bc   : > { %8370 = vmatpush3.bf16.msra.mxu1 %v8949_v31  ;;  %8361 = vmatprep.mubr.msk.bf16.mxu1 %vm9080_vm4, %v11037_v18  ;;  %v8958_v31 = vld [vmem:[%s11010_s7 + $0x78] sm:$0xff]  }
 0x3bd   : > { %8371 = vmatprep.subr.bf16.mxu1 %v11037_v18  ;;  %8428 = vmatpush3.bf16.msra.mxu0 %v8958_v31 }
 0x3be   : > { %8445 = vmatprep.subr.bf16.mxu0 %v11037_v18 }
 0x3c0   : > { %8372 = vmatpush3.bf16.msra.mxu1 %v8950_v50 }
 0x3c1   : > { %8385 = vmatprep.subr.bf16.mxu1 %v11037_v18 }
 0x3c3   : > { %8362 = vmatmul.mubr.msk.bf16.gmra.mrb[108].mxu1 %vm4247_vm3, %v5067_v61 }
 0x3c4   : > { %8373 = vmatprep.mubr.msk.bf16.mxu1 %vm9080_vm4, %v11037_v18 }
 0x3cb   : > { %8374 = vmatmul.mubr.msk.bf16.vlgmr.msra.gmra.mrb[112].mxu1 %vm4247_vm3, %v10463_v28 }
 0x3cc   : > { %8377 = vmatprep.mubr.msk.bf16.mxu1 %vm9080_vm4, %v11037_v18  ;;  %8386 = vmatpush3.bf16.msra.mxu1 %v8951_v54 }
 0x3cd   : > { %8387 = vmatprep.subr.bf16.mxu1 %v11037_v18 }
 0x3d0   : > { %8388 = vmatpush3.bf16.msra.mxu1 %v8952_v48 }
 0x3d1   : > { %8389 = vmatprep.subr.bf16.mxu1 %v11037_v18 }
 0x3d3   : > { %8378 = vmatmul.mubr.msk.bf16.gmra.mrb[116].mxu1 %vm4247_vm3, %v10478_v52 }
 0x3d4   : > { %8381 = vmatprep.mubr.msk.bf16.mxu1 %vm9080_vm4, %v11037_v18  ;;  %8390 = vmatpush3.bf16.msra.mxu1 %v8955_v37 }
 0x3d5   : > { %8391 = vmatprep.subr.bf16.mxu1 %v11037_v18 }
 0x3d8   : > { %8392 = vmatpush3.bf16.msra.mxu1 %v8957_v11 }
 0x3d9   : > { %8397 = vmatprep.subr.bf16.mxu1 %v11037_v18 }
 0x3db   : > { %8382 = vmatmul.mubr.msk.bf16.gmra.mrb[120].mxu1 %vm4247_vm3, %v5181_v63 }
 0x3dc   : > { %8393 = vmatprep.mubr.msk.bf16.mxu1 %vm9080_vm4, %v11037_v18 }
 0x3de   : > { %v4374_v10 = vpop.f32.mrb[16].mxu1 }
 0x3df   : > { %v8215_v20 = vpop.f32.mrb[17].mxu1 }
 0x3e0   : > { %v4377_v33 = vpop.f32.mrb[18].mxu1 }
 0x3e1   : > { %v8216_v0 = vpop.f32.mrb[19].mxu1 }
 0x3e6   : > { %v4382_v19 = vpop.f32.mrb[20].mxu1 }
 0x3e7   : > { %v8219_v23 = vpop.f32.mrb[21].mxu1 }
 0x3e8   : > { %v4385_v24 = vpop.f32.mrb[22].mxu1 }
 0x3e9   : > { %v8220_v25 = vpop.f32.mrb[23].mxu1 }
 0x3ee   : > { %v4390_v35 = vpop.f32.mrb[24].mxu1 }
 0x3ef   : > { %v8223_v6 = vpop.f32.mrb[25].mxu1 }
 0x3f0   : > { %v4393_v3 = vpop.f32.mrb[26].mxu1 }
 0x3f1   : > { %v8224_v22 = vpop.f32.mrb[27].mxu1 }
 0x3f6   : > { %v4464_v44 = vpop.f32.mrb[28].mxu1 }
 0x3f7   : > { %v4465_v27 = vadd.f32 %v4464_v44, %v4374_v10  ;;  %v8235_v12 = vpop.f32.mrb[29].mxu1 }
 0x3f8   : > { %v4467_v30 = vpop.f32.mrb[30].mxu1 }
 0x3f9   : > { %v4468_v2 = vadd.f32 %v4467_v30, %v4377_v33  ;;  %v8236_v8 = vpop.f32.mrb[31].mxu1 }
 0x3fe   : > { %v4472_v9 = vpop.f32.mrb[32].mxu1 }
 0x3ff   : > { %v4473_v16 = vadd.f32 %v4472_v9, %v4382_v19  ;;  %v8239_v29 = vpop.f32.mrb[33].mxu1 }
 0x400   : > { %v4475_v60 = vpop.f32.mrb[34].mxu1 }
 0x401   : > { %v4476_v62 = vadd.f32 %v4475_v60, %v4385_v24  ;;  %v8240_v39 = vpop.f32.mrb[35].mxu1 }
 0x406   : > { %v4480_v49 = vpop.f32.mrb[36].mxu1 }
 0x407   : > { %v8243_v28 = vpop.f32.mrb[37].mxu1 }
 0x408   : > { %v4483_v53 = vpop.f32.mrb[38].mxu1 }
 0x409   : > { %v8244_v58 = vpop.f32.mrb[39].mxu1 }
 0x40e   : > { %v4572_v52 = vpop.f32.mrb[40].mxu1 }
 0x40f   : > { %v4595_v57 = vadd.f32 %v4572_v52, %v4465_v27  ;;  %v8255_v7 = vpop.f32.mrb[41].mxu1 }
 0x410   : > { %v4575_v14 = vpop.f32.mrb[42].mxu1 }
 0x411   : > { %v4596_v21 = vadd.f32 %v4575_v14, %v4468_v2  ;;  %v8256_v40 = vpop.f32.mrb[43].mxu1 }
 0x416   : > { %v4580_v43 = vpop.f32.mrb[44].mxu1 }
 0x417   : > { %v4597_v5 = vadd.f32 %v4580_v43, %v4473_v16  ;;  %v8259_v42 = vpop.f32.mrb[45].mxu1 }
 0x418   : > { %v4583_v34 = vpop.f32.mrb[46].mxu1 }
 0x419   : > { %v4598_v36 = vadd.f32 %v4583_v34, %v4476_v62  ;;  %v8260_v51 = vpop.f32.mrb[47].mxu1 }
 0x41e   : > { %v4588_v41 = vpop.f32.mrb[48].mxu1 }
 0x41f   : > { %v8263_v26 = vpop.f32.mrb[49].mxu1 }
 0x420   : > { %v4591_v15 = vpop.f32.mrb[50].mxu1 }
 0x421   : > { %v8264_v4 = vpop.f32.mrb[51].mxu1 }
 0x426   : > { %v4687_v45 = vpop.f32.mrb[52].mxu1 }
 0x427   : > { %v4710_v13 = vadd.f32 %v4687_v45, %v4595_v57  ;;  %v8275_v47 = vpop.f32.mrb[53].mxu1 }
 0x428   : > { %v4690_v38 = vpop.f32.mrb[54].mxu1 }
 0x429   : > { %v4711_v55 = vadd.f32 %v4690_v38, %v4596_v21  ;;  %v8276_v59 = vpop.f32.mrb[55].mxu1 }
 0x42e   : > { %v4695_v50 = vpop.f32.mrb[56].mxu1 }
 0x42f   : > { %v4712_v56 = vadd.f32 %v4695_v50, %v4597_v5  ;;  %v8279_v61 = vpop.f32.mrb[57].mxu1 }
 0x430   : > { %v4698_v1 = vpop.f32.mrb[58].mxu1 }
 0x431   : > { %v4713_v63 = vadd.f32 %v4698_v1, %v4598_v36  ;;  %v8280_v10 = vpop.f32.mrb[59].mxu1 }
 0x436   : > { %v4703_v20 = vpop.f32.mrb[60].mxu1 }
 0x437   : > { %v8283_v33 = vpop.f32.mrb[61].mxu1 }
 0x438   : > { %v4706_v0 = vpop.f32.mrb[62].mxu1 }
 0x439   : > { %v8284_v19 = vpop.f32.mrb[63].mxu1 }
 0x43e   : > { %v4801_v23 = vpop.f32.mrb[64].mxu1 }
 0x43f   : > { %v4824_v24 = vadd.f32 %v4801_v23, %v4710_v13  ;;  %v8295_v25 = vpop.f32.mrb[65].mxu1 }
 0x440   : > { %v4804_v35 = vpop.f32.mrb[66].mxu1  ;;  %v7234_v25 = vld [vmem:[%s11009_s6] ss:$0 sm:$0xff] }
 0x441   : > { %v4825_v6 = vadd.f32 %v4804_v35, %v4711_v55  ;;  %v8296_v3 = vpop.f32.mrb[67].mxu1 }
 0x446   : > { %v4809_v22 = vpop.f32.mrb[68].mxu1 }
 0x447   : > { %v4826_v44 = vadd.f32 %v4809_v22, %v4712_v56  ;;  %v8299_v27 = vpop.f32.mrb[69].mxu1 }
 0x448   : > { %v4812_v12 = vpop.f32.mrb[70].mxu1 }
 0x449   : > { %v4827_v30 = vadd.f32 %v4812_v12, %v4713_v63  ;;  %v8300_v2 = vpop.f32.mrb[71].mxu1 }
 0x44e   : > { %v4817_v8 = vpop.f32.mrb[72].mxu1 }
 0x44f   : > { %v8303_v9 = vpop.f32.mrb[73].mxu1 }
 0x450   : > { %v4820_v16 = vpop.f32.mrb[74].mxu1 }
 0x451   : > { %v8304_v29 = vpop.f32.mrb[75].mxu1 }
 0x456   : > { %v4915_v60 = vpop.f32.mrb[76].mxu1 }
 0x457   : > { %v4938_v62 = vadd.f32 %v4915_v60, %v4824_v24  ;;  %v8315_v39 = vpop.f32.mrb[77].mxu1 }
 0x458   : > { %v4918_v49 = vpop.f32.mrb[78].mxu1 }
 0x459   : > { %v4939_v28 = vadd.f32 %v4918_v49, %v4825_v6  ;;  %v8316_v53 = vpop.f32.mrb[79].mxu1 }
 0x45a   : > { %v8959_v53 = vld [vmem:[%s11010_s7] sm:$0xff]  }
 0x45e   : > { %v4923_v58 = vpop.f32.mrb[80].mxu1 }
 0x45f   : > { %v4940_v52 = vadd.f32 %v4923_v58, %v4826_v44  ;;  %v8319_v57 = vpop.f32.mrb[81].mxu1 }
 0x460   : > { %v4926_v7 = vpop.f32.mrb[82].mxu1  ;;  %v8960_v57 = vld [vmem:[%s11010_s7 + $0xa0] sm:$0xff]  }
 0x461   : > { %v4941_v14 = vadd.f32 %v4926_v7, %v4827_v30  ;;  %v8320_v21 = vpop.f32.mrb[83].mxu1 }
 0x466   : > { %v4931_v40 = vpop.f32.mrb[84].mxu1 }
 0x467   : > { %v8323_v43 = vpop.f32.mrb[85].mxu1 }
 0x468   : > { %v4934_v5 = vpop.f32.mrb[86].mxu1 }
 0x469   : > { %v8324_v42 = vpop.f32.mrb[87].mxu1 }
 0x46a   : > { %v8961_v42 = vld [vmem:[%s11010_s7 + $0x8] sm:$0xff]  }
 0x46e   : > { %v5030_v34 = vpop.f32.mrb[88].mxu1 }
 0x46f   : > { %v5053_v36 = vadd.f32 %v5030_v34, %v4938_v62  ;;  %v8335_v51 = vpop.f32.mrb[89].mxu1  ;;  %v8962_v34 = vld [vmem:[%s11010_s7 + $0xa8] sm:$0xff]  }
 0x470   : > { %v5033_v54 = vpop.f32.mrb[90].mxu1  ;;  %v8963_v51 = vld [vmem:[%s11010_s7 + $0x10] sm:$0xff]  }
 0x471   : > { %v5054_v41 = vadd.f32 %v5033_v54, %v4939_v28  ;;  %v8336_v26 = vpop.f32.mrb[91].mxu1  ;;  %v8964_v54 = vld [vmem:[%s11010_s7 + $0xb0] sm:$0xff]  }
 0x472   : > { %v8966_v26 = vld [vmem:[%s11010_s7 + $0xb8] sm:$0xff]  }
 0x476   : > { %v5038_v15 = vpop.f32.mrb[92].mxu1 }
 0x477   : > { %v5055_v4 = vadd.f32 %v5038_v15, %v4940_v52  ;;  %v8339_v46 = vpop.f32.mrb[93].mxu1 }
 0x478   : > { %v5041_v48 = vpop.f32.mrb[94].mxu1  ;;  %v8967_v46 = vld [vmem:[%s11010_s7 + $0x40] sm:$0xff]  }
 0x479   : > { %v5056_v17 = vadd.f32 %v5041_v48, %v4941_v14  ;;  %v8340_v45 = vpop.f32.mrb[95].mxu1  ;;  %v8968_v48 = vld [vmem:[%s11010_s7 + $0xe0] sm:$0xff]  }
 0x47e   : > { %v5046_v13 = vpop.f32.mrb[96].mxu1 }
 0x47f   : > { %v8343_v47 = vpop.f32.mrb[97].mxu1  ;;  %v8969_v13 = vld [vmem:[%s11010_s7 + $0x48] sm:$0xff]  }
 0x480   : > { %v5049_v37 = vpop.f32.mrb[98].mxu1  ;;  %v8970_v47 = vld [vmem:[%s11010_s7 + $0xe8] sm:$0xff]  }
 0x481   : > { %v8344_v38 = vpop.f32.mrb[99].mxu1  ;;  %v8971_v37 = vld [vmem:[%s11010_s7 + $0x50] sm:$0xff]  }
 0x482   : > { %v8972_v38 = vld [vmem:[%s11010_s7 + $0xf0] sm:$0xff]  }
 0x486   : > { %v5144_v55 = vpop.f32.mrb[100].mxu1 }
 0x487   : > { %v5167_v59 = vadd.f32 %v5144_v55, %v5053_v36  ;;  %v8355_v32 = vpop.f32.mrb[101].mxu1  ;;  %v8973_v55 = vld [vmem:[%s11010_s7 + $0x58] sm:$0xff]  }
 0x488   : > { %v5147_v11 = vpop.f32.mrb[102].mxu1 }
 0x489   : > { %v5168_v31 = vadd.f32 %v5147_v11, %v5054_v41  ;;  %v8356_v50 = vpop.f32.mrb[103].mxu1  ;;  %v8965_v41 = vld [vmem:[%s11010_s7 + $0x18] sm:$0xff]  }
 0x48a   : > { %v8976_v50 = vld [vmem:[%s11010_s7 + $0x120] sm:$0xff]  }
 0x48e   : > { %v5152_v56 = vpop.f32.mrb[104].mxu1 }
 0x48f   : > { %v5169_v61 = vadd.f32 %v5152_v56, %v5055_v4  ;;  %v8359_v1 = vpop.f32.mrb[105].mxu1 }
 0x490   : > { %v5155_v63 = vpop.f32.mrb[106].mxu1  ;;  %v8977_v1 = vld [vmem:[%s11010_s7 + $0x88] sm:$0xff]  }
 0x491   : > { %v5170_v10 = vadd.f32 %v5155_v63, %v5056_v17  ;;  %v8360_v20 = vpop.f32.mrb[107].mxu1  ;;  %v8978_v63 = vld [vmem:[%s11010_s7 + $0x128] sm:$0xff]  }
 0x492   : > { %v8980_v20 = vld [vmem:[%s11010_s7 + $0x130] sm:$0xff]  }
 0x496   : > { %v5160_v33 = vpop.f32.mrb[108].mxu1 }
 0x497   : > { %v8363_v0 = vpop.f32.mrb[109].mxu1  ;;  %v8981_v33 = vld [vmem:[%s11010_s7 + $0x98] sm:$0xff]  }
 0x498   : > { %v5163_v19 = vpop.f32.mrb[110].mxu1  ;;  %v8982_v0 = vld [vmem:[%s11010_s7 + $0x138] sm:$0xff]  }
 0x499   : > { %v8364_v23 = vpop.f32.mrb[111].mxu1 }
 0x49e   : > { %v5258_v24 = vpop.f32.mrb[112].mxu1 }
 0x49f   : > { %v5281_v35 = vadd.f32 %v5258_v24, %v5167_v59  ;;  %v8375_v6 = vpop.f32.mrb[113].mxu1  ;;  %v8974_v59 = vld [vmem:[%s11010_s7 + $0xf8] sm:$0xff]   ;;  %v8983_v24 = vld [vmem:[%s11010_s7 + $0xc0] sm:$0xff]  }
 0x4a0   : > { %v5261_v3 = vpop.f32.mrb[114].mxu1 }
 0x4a1   : > { %v5294_v22 = vadd.f32 %v7234_v25, %v5281_v35  ;;  %v5282_v44 = vadd.f32 %v5261_v3, %v5168_v31  ;;  %v8376_v27 = vpop.f32.mrb[115].mxu1  ;;  %v8975_v31 = vld [vmem:[%s11010_s7 + $0x80] sm:$0xff]   ;;  %v8985_v3 = vld [vmem:[%s11010_s7 + $0xc8] sm:$0xff]  }
 0x4a2   : > { %v8988_v27 = vld [vmem:[%s11010_s7 + $0x170] sm:$0xff]  }
 0x4a3   : > { %v5300_v12 = vmax.f32 %v5294_v22, 0.0  ;;  %v5295_v30 = vadd.f32 %v7234_v25, %v5282_v44  ;;  %v8986_v22 = vld [vmem:[%s11010_s7 + $0x168] sm:$0xff]   ;;  %v8987_v44 = vld [vmem:[%s11010_s7 + $0xd0] sm:$0xff]  }
 0x4a5   : > { %5306 = vst.msk [vmem:[#allocation4] sm:$0xff] %vm4247_vm3, %v5300_v12  ;;  %v5301_v2 = vmax.f32 %v5295_v30, 0.0  ;;  %v8989_v12 = vld [vmem:[%s11010_s7 + $0xd8] sm:$0xff]  }
 0x4a6   : > { %v5266_v8 = vpop.f32.mrb[116].mxu1  ;;  %v8990_v30 = vld [vmem:[%s11010_s7 + $0x178] sm:$0xff]  }
 0x4a7   : > { %5307 = vst.msk [vmem:[#allocation4 + $0x8] sm:$0xff] %vm4247_vm3, %v5301_v2  ;;  %v5283_v9 = vadd.f32 %v5266_v8, %v5169_v61  ;;  %v8379_v16 = vpop.f32.mrb[117].mxu1 }
 0x4a8   : > { %v5269_v29 = vpop.f32.mrb[118].mxu1  ;;  %v8992_v16 = vld [vmem:[%s11010_s7 + $0x1a0] sm:$0xff]  }
 0x4a9   : > { %v5296_v60 = vadd.f32 %v7234_v25, %v5283_v9  ;;  %v5284_v62 = vadd.f32 %v5269_v29, %v5170_v10  ;;  %v8380_v39 = vpop.f32.mrb[119].mxu1  ;;  %v8979_v10 = vld [vmem:[%s11010_s7 + $0x90] sm:$0xff]   ;;  %v8991_v9 = vld [vmem:[%s11010_s7 + $0x100] sm:$0xff]  }
 0x4aa   : > { %v8994_v39 = vld [vmem:[%s11010_s7 + $0x1a8] sm:$0xff]  }
 0x4ab   : > { %v5302_v49 = vmax.f32 %v5296_v60, 0.0  ;;  %v5297_v28 = vadd.f32 %v7234_v25, %v5284_v62  ;;  %v8984_v25 = vld [vmem:[%s11010_s7 + $0x160] sm:$0xff]   ;;  %v8993_v62 = vld [vmem:[%s11010_s7 + $0x108] sm:$0xff]  }
 0x4ac   : > { %v5322_v58 = vld [vmem:[#allocation4 + $0x1] sm:$0x1]  ;;  %v5546_v52 = vld [vmem:[#allocation4 + $0x3] sm:$0x1]  ;;  %v5312_v15 = vld [vmem:[#allocation4] sm:$0x1] }
 0x4ad   : > { %5308 = vst.msk [vmem:[#allocation4 + $0x10] sm:$0xff] %vm4247_vm3, %v5302_v49  ;;  %v5303_v7 = vmax.f32 %v5297_v28, 0.0  ;;  %v5323_v14 = vpack.c.bf16 %v5322_v58, %v5322_v58  ;;  %v5547_v21 = vpack.c.bf16 %v5546_v52, %v5546_v52  ;;  %v5313_v17 = vpack.c.bf16 %v5312_v15, %v5312_v15  ;;  %v5467_v32 = vld [vmem:[#allocation4 + $0x2] sm:$0x1]  ;;  %v8995_v49 = vld [vmem:[%s11010_s7 + $0x110] sm:$0xff]   ;;  %v8998_v58 = vld [vmem:[%s11010_s7 + $0x1b8] sm:$0xff]  }
 0x4ae   : > { %v5274_v40 = vpop.f32.mrb[120].mxu1  ;;  %v5704_v4 = vld [vmem:[#allocation4 + $0x9] sm:$0x1]  ;;  %v5862_v11 = vld [vmem:[#allocation4 + $0xb] sm:$0x1]  ;;  %v5468_v56 = vpack.c.bf16 %v5467_v32, %v5467_v32  ;;  %v8996_v28 = vld [vmem:[%s11010_s7 + $0x1b0] sm:$0xff]  }
 0x4af   : > { %5309 = vst.msk [vmem:[#allocation4 + $0x18] sm:$0xff] %vm4247_vm3, %v5303_v7  ;;  %v8383_v43 = vpop.f32.mrb[121].mxu1  ;;  %8394 = vmatmul.mubr.msk.bf16.vlgmr.msra.gmra.mrb[124].mxu1 %vm4247_vm3, %v5323_v14  ;;  %8430 = vmatmul.mubr.msk.bf16.vlgmr.msra.gmra.mrb[24].mxu0 %vm4247_vm3, %v5547_v21  ;;  %v5705_v45 = vpack.c.bf16 %v5704_v4, %v5704_v4  ;;  %v5863_v61 = vpack.c.bf16 %v5862_v11, %v5862_v11  ;;  %v5625_v19 = vld [vmem:[#allocation4 + $0x8] sm:$0x1]  ;;  %v5783_v2 = vld [vmem:[#allocation4 + $0xa] sm:$0x1] }
 0x4b0   : > { %8398 = vmatpush3.bf16.msra.mxu1 %v8959_v53  ;;  %8446 = vmatpush3.bf16.msra.mxu0 %v8960_v57  ;;  %v5277_v5 = vpop.f32.mrb[122].mxu1  ;;  %v5626_v35 = vpack.c.bf16 %v5625_v19, %v5625_v19  ;;  %v5784_v29 = vpack.c.bf16 %v5783_v2, %v5783_v2  ;;  %v8997_v53 = vld [vmem:[%s11010_s7 + $0x118] sm:$0xff]   ;;  %v8999_v7 = vld [vmem:[%s11010_s7 + $0x140] sm:$0xff]   ;;  %v9001_v43 = vld [vmem:[%s11010_s7 + $0x148] sm:$0xff]  }
 0x4b1   : > { %v8384_v36 = vpop.f32.mrb[123].mxu1  ;;  %8399 = vmatprep.subr.bf16.mxu1 %v11037_v18  ;;  %8447 = vmatprep.subr.bf16.mxu0 %v11037_v18  ;;  %v9000_v14 = vld [vmem:[%s11010_s7 + $0x1e0] sm:$0xff]   ;;  %v9002_v5 = vld [vmem:[%s11010_s7 + $0x1e8] sm:$0xff]  }
 0x4b2   : > { %8405 = vmatprep.mubr.msk.bf16.mxu1 %vm9080_vm4, %v11037_v18  ;;  %8453 = vmatprep.mubr.msk.bf16.mxu0 %vm9080_vm4, %v11037_v18  ;;  %v9005_v36 = vld [vmem:[%s11010_s7 + $0x158] sm:$0xff]  }
 0x4b4   : > { %8400 = vmatpush3.bf16.msra.mxu1 %v8961_v42  ;;  %8448 = vmatpush3.bf16.msra.mxu0 %v8962_v34  ;;  %v6020_v23 = vld [vmem:[#allocation4 + $0x11] sm:$0x1]  ;;  %v6178_v8 = vld [vmem:[#allocation4 + $0x13] sm:$0x1]  ;;  %v5941_v52 = vld [vmem:[#allocation4 + $0x10] sm:$0x1] }
 0x4b5   : > { %8401 = vmatprep.subr.bf16.mxu1 %v11037_v18  ;;  %8449 = vmatprep.subr.bf16.mxu0 %v11037_v18  ;;  %v6021_v6 = vpack.c.bf16 %v6020_v23, %v6020_v23  ;;  %v6179_v60 = vpack.c.bf16 %v6178_v8, %v6178_v8  ;;  %v5942_v21 = vpack.c.bf16 %v5941_v52, %v5941_v52  ;;  %v9003_v42 = vld [vmem:[%s11010_s7 + $0x150] sm:$0xff]  }
 0x4b6   : > { %v6336_v57 = vld [vmem:[#allocation4 + $0x19] sm:$0x1]  ;;  %v9004_v34 = vld [vmem:[%s11010_s7 + $0x1f0] sm:$0xff]  }
 0x4b7   : > { %v6337_v40 = vpack.c.bf16 %v6336_v57, %v6336_v57 }
 0x4b8   : > { %8402 = vmatpush3.bf16.msra.mxu1 %v8963_v51  ;;  %8450 = vmatpush3.bf16.msra.mxu0 %v8964_v54  ;;  %v9006_v51 = vld [vmem:[%s11010_s7 + $0x1f8] sm:$0xff]   ;;  %v6099_v54 = vld [vmem:[#allocation4 + $0x12] sm:$0x1] }
 0x4b9   : > { %8403 = vmatprep.subr.bf16.mxu1 %v11037_v18  ;;  %8451 = vmatprep.subr.bf16.mxu0 %v11037_v18  ;;  %v6100_v15 = vpack.c.bf16 %v6099_v54, %v6099_v54 }
 0x4bc   : > { %8404 = vmatpush3.bf16.msra.mxu1 %v8965_v41  ;;  %8452 = vmatpush3.bf16.msra.mxu0 %v8966_v26  ;;  %v6494_v41 = vld [vmem:[#allocation4 + $0x1b] sm:$0x1]  ;;  %v9007_v26 = vld [vmem:[%s11010_s7 + $0x180] sm:$0xff]  }
 0x4bd   : > { %8409 = vmatprep.subr.bf16.mxu1 %v11037_v18  ;;  %8469 = vmatprep.subr.bf16.mxu0 %v11037_v18  ;;  %v6495_v4 = vpack.c.bf16 %v6494_v41, %v6494_v41 }
 0x4bf   : > { %8406 = vmatmul.mubr.msk.bf16.vlgmr.msra.gmra.mrb[128].mxu1 %vm4247_vm3, %v5313_v17  ;;  %8454 = vmatmul.mubr.msk.bf16.vlgmr.msra.gmra.mrb[28].mxu0 %vm4247_vm3, %v5705_v45  ;;  %v9010_v17 = vld [vmem:[%s11010_s7 + $0x198] sm:$0xff]  }
 0x4c0   : > { %8410 = vmatpush3.bf16.msra.mxu1 %v8967_v46  ;;  %8470 = vmatpush3.bf16.msra.mxu0 %v8968_v48  ;;  %v9008_v46 = vld [vmem:[%s11010_s7 + $0x188] sm:$0xff]   ;;  %v9009_v48 = vld [vmem:[%s11010_s7 + $0x190] sm:$0xff]   ;;  %v6257_v45 = vld [vmem:[#allocation4 + $0x18] sm:$0x1] }
 0x4c1   : > { %8411 = vmatprep.subr.bf16.mxu1 %v11037_v18  ;;  %8471 = vmatprep.subr.bf16.mxu0 %v11037_v18 }
 0x4c2   : > { %8417 = vmatprep.mubr.msk.bf16.mxu1 %vm9080_vm4, %v11037_v18  ;;  %8477 = vmatprep.mubr.msk.bf16.mxu0 %vm9080_vm4, %v11037_v18 }
 0x4c4   : > { %8412 = vmatpush3.bf16.msra.mxu1 %v8969_v13  ;;  %8472 = vmatpush3.bf16.msra.mxu0 %v8970_v47  ;;  %v9011_v13 = vld [vmem:[%s11010_s7 + $0x1c0] sm:$0xff]   ;;  %v6258_v47 = vpack.c.bf16 %v6257_v45, %v6257_v45 }
 0x4c5   : > { %8413 = vmatprep.subr.bf16.mxu1 %v11037_v18  ;;  %8473 = vmatprep.subr.bf16.mxu0 %v11037_v18 }
 0x4c8   : > { %8414 = vmatpush3.bf16.msra.mxu1 %v8971_v37  ;;  %8474 = vmatpush3.bf16.msra.mxu0 %v8972_v38  ;;  %v9012_v37 = vld [vmem:[%s11010_s7 + $0x1c8] sm:$0xff]   ;;  %v9013_v38 = vld [vmem:[%s11010_s7 + $0x1d0] sm:$0xff]  }
 0x4c9   : > { %8415 = vmatprep.subr.bf16.mxu1 %v11037_v18  ;;  %8475 = vmatprep.subr.bf16.mxu0 %v11037_v18 }
 0x4cc   : > { %8416 = vmatpush3.bf16.msra.mxu1 %v8973_v55  ;;  %8476 = vmatpush3.bf16.msra.mxu0 %v8974_v59  ;;  %v9014_v55 = vld [vmem:[%s11010_s7 + $0x1d8] sm:$0xff]  }
 0x4cd   : > { %8433 = vmatprep.subr.bf16.mxu1 %v11037_v18  ;;  %8493 = vmatprep.subr.bf16.mxu0 %v11037_v18  ;;  %v6415_v59 = vld [vmem:[#allocation4 + $0x1a] sm:$0x1] }
 0x4ce   : > { %v6416_v32 = vpack.c.bf16 %v6415_v59, %v6415_v59 }
 0x4cf   : > { %8418 = vmatmul.mubr.msk.bf16.vlgmr.msra.gmra.mrb[132].mxu1 %vm4247_vm3, %v5468_v56  ;;  %8478 = vmatmul.mubr.msk.bf16.vlgmr.msra.gmra.mrb[32].mxu0 %vm4247_vm3, %v5863_v61 }
 0x4d0   : > { %8434 = vmatpush3.bf16.msra.mxu1 %v8975_v31  ;;  %8494 = vmatpush3.bf16.msra.mxu0 %v8976_v50 }
 0x4d1   : > { %8435 = vmatprep.subr.bf16.mxu1 %v11037_v18  ;;  %8495 = vmatprep.subr.bf16.mxu0 %v11037_v18 }
 0x4d2   : > { %8441 = vmatprep.mubr.msk.bf16.mxu1 %vm9080_vm4, %v11037_v18  ;;  %8501 = vmatprep.mubr.msk.bf16.mxu0 %vm9080_vm4, %v11037_v18 }
 0x4d4   : > { %8436 = vmatpush3.bf16.msra.mxu1 %v8977_v1  ;;  %8496 = vmatpush3.bf16.msra.mxu0 %v8978_v63 }
 0x4d5   : > { %8437 = vmatprep.subr.bf16.mxu1 %v11037_v18  ;;  %8497 = vmatprep.subr.bf16.mxu0 %v11037_v18 }
 0x4d8   : > { %8438 = vmatpush3.bf16.msra.mxu1 %v8979_v10  ;;  %8498 = vmatpush3.bf16.msra.mxu0 %v8980_v20 }
 0x4d9   : > { %8439 = vmatprep.subr.bf16.mxu1 %v11037_v18  ;;  %8499 = vmatprep.subr.bf16.mxu0 %v11037_v18 }
 0x4dc   : > { %8440 = vmatpush3.bf16.msra.mxu1 %v8981_v33  ;;  %8500 = vmatpush3.bf16.msra.mxu0 %v8982_v0 }
 0x4dd   : > { %8457 = vmatprep.subr.bf16.mxu1 %v11037_v18  ;;  %8517 = vmatprep.subr.bf16.mxu0 %v11037_v18 }
 0x4df   : > { %8442 = vmatmul.mubr.msk.bf16.vlgmr.msra.gmra.mrb[136].mxu1 %vm4247_vm3, %v5626_v35  ;;  %8502 = vmatmul.mubr.msk.bf16.vlgmr.msra.gmra.mrb[36].mxu0 %vm4247_vm3, %v6021_v6 }
 0x4e0   : > { %8458 = vmatpush3.bf16.msra.mxu1 %v8983_v24  ;;  %8518 = vmatpush3.bf16.msra.mxu0 %v8984_v25 }
 0x4e1   : > { %8459 = vmatprep.subr.bf16.mxu1 %v11037_v18  ;;  %8519 = vmatprep.subr.bf16.mxu0 %v11037_v18 }
 0x4e2   : > { %8465 = vmatprep.mubr.msk.bf16.mxu1 %vm9080_vm4, %v11037_v18  ;;  %8525 = vmatprep.mubr.msk.bf16.mxu0 %vm9080_vm4, %v11037_v18 }
 0x4e4   : > { %8460 = vmatpush3.bf16.msra.mxu1 %v8985_v3  ;;  %8520 = vmatpush3.bf16.msra.mxu0 %v8986_v22 }
 0x4e5   : > { %8461 = vmatprep.subr.bf16.mxu1 %v11037_v18  ;;  %8521 = vmatprep.subr.bf16.mxu0 %v11037_v18 }
 0x4e8   : > { %8462 = vmatpush3.bf16.msra.mxu1 %v8987_v44  ;;  %8522 = vmatpush3.bf16.msra.mxu0 %v8988_v27 }
 0x4e9   : > { %8463 = vmatprep.subr.bf16.mxu1 %v11037_v18  ;;  %8523 = vmatprep.subr.bf16.mxu0 %v11037_v18 }
 0x4ec   : > { %8464 = vmatpush3.bf16.msra.mxu1 %v8989_v12  ;;  %8524 = vmatpush3.bf16.msra.mxu0 %v8990_v30 }
 0x4ed   : > { %8481 = vmatprep.subr.bf16.mxu1 %v11037_v18  ;;  %8541 = vmatprep.subr.bf16.mxu0 %v11037_v18 }
 0x4ef   : > { %8466 = vmatmul.mubr.msk.bf16.vlgmr.msra.gmra.mrb[140].mxu1 %vm4247_vm3, %v5784_v29  ;;  %8526 = vmatmul.mubr.msk.bf16.vlgmr.msra.gmra.mrb[40].mxu0 %vm4247_vm3, %v6179_v60 }
 0x4f0   : > { %8482 = vmatpush3.bf16.msra.mxu1 %v8991_v9  ;;  %8542 = vmatpush3.bf16.msra.mxu0 %v8992_v16 }
 0x4f1   : > { %8483 = vmatprep.subr.bf16.mxu1 %v11037_v18  ;;  %8543 = vmatprep.subr.bf16.mxu0 %v11037_v18 }
 0x4f2   : > { %8489 = vmatprep.mubr.msk.bf16.mxu1 %vm9080_vm4, %v11037_v18  ;;  %8549 = vmatprep.mubr.msk.bf16.mxu0 %vm9080_vm4, %v11037_v18 }
 0x4f4   : > { %8484 = vmatpush3.bf16.msra.mxu1 %v8993_v62  ;;  %8544 = vmatpush3.bf16.msra.mxu0 %v8994_v39 }
 0x4f5   : > { %8485 = vmatprep.subr.bf16.mxu1 %v11037_v18  ;;  %8545 = vmatprep.subr.bf16.mxu0 %v11037_v18 }
 0x4f8   : > { %8486 = vmatpush3.bf16.msra.mxu1 %v8995_v49  ;;  %8546 = vmatpush3.bf16.msra.mxu0 %v8996_v28 }
 0x4f9   : > { %8487 = vmatprep.subr.bf16.mxu1 %v11037_v18  ;;  %8547 = vmatprep.subr.bf16.mxu0 %v11037_v18 }
 0x4fc   : > { %8488 = vmatpush3.bf16.msra.mxu1 %v8997_v53  ;;  %8548 = vmatpush3.bf16.msra.mxu0 %v8998_v58 }
 0x4fd   : > { %8505 = vmatprep.subr.bf16.mxu1 %v11037_v18  ;;  %8565 = vmatprep.subr.bf16.mxu0 %v11037_v18 }
 0x4ff   : > { %8490 = vmatmul.mubr.msk.bf16.vlgmr.msra.gmra.mrb[144].mxu1 %vm4247_vm3, %v5942_v21  ;;  %8550 = vmatmul.mubr.msk.bf16.vlgmr.msra.gmra.mrb[44].mxu0 %vm4247_vm3, %v6337_v40 }
 0x500   : > { %8506 = vmatpush3.bf16.msra.mxu1 %v8999_v7  ;;  %8566 = vmatpush3.bf16.msra.mxu0 %v9000_v14 }
 0x501   : > { %8507 = vmatprep.subr.bf16.mxu1 %v11037_v18  ;;  %8567 = vmatprep.subr.bf16.mxu0 %v11037_v18 }
 0x502   : > { %8513 = vmatprep.mubr.msk.bf16.mxu1 %vm9080_vm4, %v11037_v18  ;;  %8573 = vmatprep.mubr.msk.bf16.mxu0 %vm9080_vm4, %v11037_v18 }
 0x504   : > { %8508 = vmatpush3.bf16.msra.mxu1 %v9001_v43  ;;  %8568 = vmatpush3.bf16.msra.mxu0 %v9002_v5 }
 0x505   : > { %8509 = vmatprep.subr.bf16.mxu1 %v11037_v18  ;;  %8569 = vmatprep.subr.bf16.mxu0 %v11037_v18 }
 0x508   : > { %8510 = vmatpush3.bf16.msra.mxu1 %v9003_v42  ;;  %8570 = vmatpush3.bf16.msra.mxu0 %v9004_v34 }
 0x509   : > { %8511 = vmatprep.subr.bf16.mxu1 %v11037_v18  ;;  %8571 = vmatprep.subr.bf16.mxu0 %v11037_v18 }
 0x50c   : > { %8512 = vmatpush3.bf16.msra.mxu1 %v9005_v36  ;;  %8572 = vmatpush3.bf16.msra.mxu0 %v9006_v51 }
 0x50d   : > { %8529 = vmatprep.subr.bf16.mxu1 %v11037_v18 }
 0x50f   : > { %8514 = vmatmul.mubr.msk.bf16.vlgmr.msra.gmra.mrb[148].mxu1 %vm4247_vm3, %v6100_v15  ;;  %8574 = vmatmul.mubr.msk.bf16.vlgmr.msra.gmra.mrb[48].mxu0 %vm4247_vm3, %v6495_v4 }
 0x510   : > { %8530 = vmatpush3.bf16.msra.mxu1 %v9007_v26  ;;  %8537 = vmatprep.mubr.msk.bf16.mxu1 %vm9080_vm4, %v11037_v18 }
 0x511   : > { %8531 = vmatprep.subr.bf16.mxu1 %v11037_v18 }
 0x514   : > { %8532 = vmatpush3.bf16.msra.mxu1 %v9008_v46 }
 0x515   : > { %8533 = vmatprep.subr.bf16.mxu1 %v11037_v18 }
 0x518   : > { %8534 = vmatpush3.bf16.msra.mxu1 %v9009_v48 }
 0x519   : > { %8535 = vmatprep.subr.bf16.mxu1 %v11037_v18 }
 0x51c   : > { %8536 = vmatpush3.bf16.msra.mxu1 %v9010_v17 }
 0x51d   : > { %8553 = vmatprep.subr.bf16.mxu1 %v11037_v18 }
 0x51f   : > { %8538 = vmatmul.mubr.msk.bf16.vlgmr.msra.gmra.mrb[152].mxu1 %vm4247_vm3, %v6258_v47 }
 0x520   : > { %8554 = vmatpush3.bf16.msra.mxu1 %v9011_v13  ;;  %8561 = vmatprep.mubr.msk.bf16.mxu1 %vm9080_vm4, %v11037_v18 }
 0x521   : > { %8555 = vmatprep.subr.bf16.mxu1 %v11037_v18 }
 0x524   : > { %8556 = vmatpush3.bf16.msra.mxu1 %v9012_v37 }
 0x525   : > { %8557 = vmatprep.subr.bf16.mxu1 %v11037_v18 }
 0x528   : > { %8558 = vmatpush3.bf16.msra.mxu1 %v9013_v38 }
 0x529   : > { %8559 = vmatprep.subr.bf16.mxu1 %v11037_v18 }
 0x52c   : > { %8560 = vmatpush3.bf16.msra.mxu1 %v9014_v55 }
 0x52f   : > { %8562 = vmatmul.mubr.msk.bf16.vlgmr.msra.gmra.mrb[156].mxu1 %vm4247_vm3, %v6416_v32 }
 0x582   : > { %v5394_v11 = vpop.f32.mrb[124].mxu1  ;;  %v5618_v31 = vpop.f32.mrb[24].mxu0 }
 0x583   : > { %v8395_v50 = vpop.f32.mrb[125].mxu1  ;;  %v8431_v56 = vpop.f32.mrb[25].mxu0 }
 0x584   : > { %v5397_v61 = vpop.f32.mrb[126].mxu1  ;;  %v5621_v1 = vpop.f32.mrb[26].mxu0 }
 0x585   : > { %v8396_v63 = vpop.f32.mrb[127].mxu1  ;;  %v8432_v10 = vpop.f32.mrb[27].mxu0 }
 0x592   : > { %v5461_v20 = vpop.f32.mrb[128].mxu1  ;;  %v5776_v33 = vpop.f32.mrb[28].mxu0 }
 0x593   : > { %v5462_v0 = vadd.f32 %v5461_v20, %v5394_v11  ;;  %v8407_v19 = vpop.f32.mrb[129].mxu1  ;;  %v8455_v23 = vpop.f32.mrb[29].mxu0 }
 0x594   : > { %v5464_v24 = vpop.f32.mrb[130].mxu1  ;;  %v5779_v18 = vpop.f32.mrb[30].mxu0  ;;  %v6573_v23 = vld [vmem:[%s11011_s8] sm:$0x1] }
 0x595   : > { %v8408_v25 = vpop.f32.mrb[131].mxu1  ;;  %v8456_v35 = vpop.f32.mrb[31].mxu0 }
 0x5a2   : > { %v5539_v6 = vpop.f32.mrb[132].mxu1  ;;  %v5934_v3 = vpop.f32.mrb[32].mxu0 }
 0x5a3   : > { %v5545_v22 = vadd.f32 %v5539_v6, %v5462_v0  ;;  %v8419_v44 = vpop.f32.mrb[133].mxu1  ;;  %v8479_v27 = vpop.f32.mrb[33].mxu0 }
 0x5a4   : > { %v5542_v12 = vpop.f32.mrb[134].mxu1  ;;  %v5937_v30 = vpop.f32.mrb[34].mxu0 }
 0x5a5   : > { %v8420_v2 = vpop.f32.mrb[135].mxu1  ;;  %v8480_v8 = vpop.f32.mrb[35].mxu0  ;;  %v5624_v9 = vadd.f32 %v5618_v31, %v5545_v22 }
 0x5b2   : > { %v5697_v16 = vpop.f32.mrb[136].mxu1  ;;  %v6092_v29 = vpop.f32.mrb[36].mxu0 }
 0x5b3   : > { %v5703_v60 = vadd.f32 %v5697_v16, %v5624_v9  ;;  %v8443_v62 = vpop.f32.mrb[137].mxu1  ;;  %v8503_v39 = vpop.f32.mrb[37].mxu0 }
 0x5b4   : > { %v5700_v49 = vpop.f32.mrb[138].mxu1  ;;  %v6095_v28 = vpop.f32.mrb[38].mxu0 }
 0x5b5   : > { %v8444_v53 = vpop.f32.mrb[139].mxu1  ;;  %v8504_v58 = vpop.f32.mrb[39].mxu0  ;;  %v5782_v52 = vadd.f32 %v5776_v33, %v5703_v60 }
 0x5c2   : > { %v5855_v57 = vpop.f32.mrb[140].mxu1  ;;  %v6250_v7 = vpop.f32.mrb[40].mxu0 }
 0x5c3   : > { %v5861_v14 = vadd.f32 %v5855_v57, %v5782_v52  ;;  %v8467_v21 = vpop.f32.mrb[141].mxu1  ;;  %v8527_v40 = vpop.f32.mrb[41].mxu0 }
 0x5c4   : > { %v5858_v43 = vpop.f32.mrb[142].mxu1  ;;  %v6253_v5 = vpop.f32.mrb[42].mxu0 }
 0x5c5   : > { %v8468_v42 = vpop.f32.mrb[143].mxu1  ;;  %v8528_v34 = vpop.f32.mrb[43].mxu0  ;;  %v5940_v36 = vadd.f32 %v5934_v3, %v5861_v14 }
 0x5d2   : > { %v6013_v51 = vpop.f32.mrb[144].mxu1  ;;  %v6408_v54 = vpop.f32.mrb[44].mxu0 }
 0x5d3   : > { %v6019_v41 = vadd.f32 %v6013_v51, %v5940_v36  ;;  %v8491_v26 = vpop.f32.mrb[145].mxu1  ;;  %v8551_v15 = vpop.f32.mrb[45].mxu0 }
 0x5d4   : > { %v6016_v4 = vpop.f32.mrb[146].mxu1  ;;  %v6411_v46 = vpop.f32.mrb[46].mxu0 }
 0x5d5   : > { %v8492_v48 = vpop.f32.mrb[147].mxu1  ;;  %v8552_v17 = vpop.f32.mrb[47].mxu0  ;;  %v6098_v45 = vadd.f32 %v6092_v29, %v6019_v41 }
 0x5e2   : > { %v6171_v13 = vpop.f32.mrb[148].mxu1  ;;  %v6566_v47 = vpop.f32.mrb[48].mxu0 }
 0x5e3   : > { %v6177_v37 = vadd.f32 %v6171_v13, %v6098_v45  ;;  %v8515_v38 = vpop.f32.mrb[149].mxu1  ;;  %v8575_v55 = vpop.f32.mrb[49].mxu0 }
 0x5e4   : > { %v6174_v59 = vpop.f32.mrb[150].mxu1  ;;  %v6569_v32 = vpop.f32.mrb[50].mxu0 }
 0x5e5   : > { %v8516_v11 = vpop.f32.mrb[151].mxu1  ;;  %v8576_v31 = vpop.f32.mrb[51].mxu0  ;;  %v6256_v50 = vadd.f32 %v6250_v7, %v6177_v37 }
 0x5f2   : > { %v6329_v56 = vpop.f32.mrb[152].mxu1 }
 0x5f3   : > { %v6335_v61 = vadd.f32 %v6329_v56, %v6256_v50  ;;  %v8539_v1 = vpop.f32.mrb[153].mxu1 }
 0x5f4   : > { %v6332_v63 = vpop.f32.mrb[154].mxu1 }
 0x5f5   : > { %v8540_v10 = vpop.f32.mrb[155].mxu1  ;;  %v6414_v20 = vadd.f32 %v6408_v54, %v6335_v61 }
 0x602   : > { %v6487_v33 = vpop.f32.mrb[156].mxu1 }
 0x603   : > { %v6493_v0 = vadd.f32 %v6487_v33, %v6414_v20  ;;  %v8563_v19 = vpop.f32.mrb[157].mxu1 }
 0x604   : > { %v6490_v24 = vpop.f32.mrb[158].mxu1 }
 0x605   : > { %v6572_v18 = vadd.f32 %v6566_v47, %v6493_v0  ;;  %v8564_v25 = vpop.f32.mrb[159].mxu1 }
 0x607   : > { %v6574_v35 = vadd.f32 %v6573_v23, %v6572_v18 }
 0x609   : > { %v6575_v6 = vmax.f32 %v6574_v35, 0.0 }
 0x60b   : > { %6576 = vst.msk [vmem:[%s324_s27] sm:$0x1] %vm333_vm2, %v6575_v6 }
 0x60c   : > { %9028 = shalt.err (!%p9025_p3)
}
 0x60d   : > { %s9029_s23 = scalar_lea.hbm %s10960_s17, 16  ;;  %s9033_s27 = scalar_lea.hbm %s11012_s9, 32 }
 0x60e   : > { %p9030_p4 = scmp.ne.s32.totalorder %s10960_s17, %s9029_s23  ;;  %p9034_p9 = scmp.lt.u32.totalorder %s10960_s17, %s11012_s9 }
 0x60f   : > { %p9035_p10 = scmp.lt.u32.totalorder %s9033_s27, %s9029_s23  ;;  %p9037_p12 = scmp.lt.u32.totalorder %s9029_s23, %s10960_s17 }
 0x610   : > { %p9031_p7 = pnand %p9030_p4, %p9170_p5 }
 0x611   : > { %p9036_p11 = por %p9035_p10, %p9034_p9 }
 0x612   : > { %p9032_p8 = pneg %p9031_p7 }
 0x613   : > { %p9038_p13 = por %p9037_p12, %p9036_p11 }
 0x615   : > { %p9039_p0 = pnand %p9038_p13, %p9032_p8 }
 0x617   : > { %9042 = shalt.err (!%p9039_p0)
}
 0x618   : > { %8794 = dma.vmem_to_hbm [thread:$0]  (%p9170_p5), %s10962_s29, 16, %s10960_s17, %s6578_s25  }
 0x619 PF: > { %p8800_p1 = scmp.ge.s32.totalorder %s9077_s12, 2  ;;  %s6602_s21 = sand.u32 1, %s9065_s30  }
 0x61a   : > { %s6603_s13 = scalar_lea.sflag [#allocation6], %s6602_s21 }
 0x61b   : > { %p8797_p2 = pnand %p8800_p1, %p9174_p6 }
 0x61d   : > { %9060 = dma.done.wait (!%p8797_p2), %s6603_s13, 16  }
 0x61e   : > { %9062 = vsyncadd (!%p8797_p2), %s6603_s13, 4294967280  ;;  %p19_p3 = scmp.ge.s32.totalorder %s9157_s15, 4   ;;  %s11041_s30 = smov %s9069_s10 }
 0x61f   : > { %s11042_s10 = smov %s9073_s11  ;;  %s11043_s11 = smov %s9168_s18 }
 0x620   : > { %s11044_s12 = smov %s9157_s15  ;;  %21 = sbr.rel (!%p19_p3) target bundleno = 3 (0x3), region = 146 }
 0x627   :  { %6607 = vsyncpa [#allocation6], 1 }
 0x628   :  { %6609 = vsyncpa [#allocation6 + $0x1], 1 }

</bundles_post_ra>
